<compile_context>
chip_gen: v7x
topology: tpu7x:2x2x1
jax: 0.10.0
libtpu: 0.0.40
codegen_flags: <defaults>
</compile_context>

<pallas_src>
import jax
import jax.numpy as jnp
from jax import lax
from jax.experimental import pallas as pl
from jax.experimental.pallas import tpu as pltpu


def _round_up(x, m):
    return (x + m - 1) // m * m


def _down_layer_kernel(x_ref, w1_ref, sh1_ref, w2_ref, sh2_ref,
                       o_ref, pad1, pad2):
    """One batch element per grid step.

    x_ref  : (1, Ho, 2, Wo, 2*Cin) bf16  input, 2x2 pool pairs split out
    w1_ref : (9, Cin, Cmid_p)      bf16  conv1 weights (BN scale folded in)
    sh1_ref: (1, Cmid_p)           f32   conv1 folded BN shift
    w2_ref : (9, Cmid_p, Cout_p)   bf16  conv2 weights (BN scale folded in)
    sh2_ref: (1, Cout_p)           f32   conv2 folded BN shift
    o_ref  : (1, Ho*Wo, Cout_p)    f32   output slab
    pad1   : VMEM (Ho+2, Wo+2, Cin)    bf16  zero-padded pooled activations
    pad2   : VMEM (Ho+2, Wo+2, Cmid_p) bf16  zero-padded mid activations
    """
    Ho = x_ref.shape[1]
    Wo = x_ref.shape[3]
    Cin = x_ref.shape[4] // 2
    Cmid = pad2.shape[2]
    Cout = o_ref.shape[2]

    # ---- re-zero only the 1-pixel halo border (interior overwritten below).
    # Kept per-step (cheap) so the kernel stays megacore-safe under
    # dimension_semantics=("parallel",) on v7x.
    pad1[0:1, :, :] = jnp.zeros((1, Wo + 2, Cin), pad1.dtype)
    pad1[Ho + 1:Ho + 2, :, :] = jnp.zeros((1, Wo + 2, Cin), pad1.dtype)
    pad1[:, 0:1, :] = jnp.zeros((Ho + 2, 1, Cin), pad1.dtype)
    pad1[:, Wo + 1:Wo + 2, :] = jnp.zeros((Ho + 2, 1, Cin), pad1.dtype)
    pad2[0:1, :, :] = jnp.zeros((1, Wo + 2, Cmid), pad2.dtype)
    pad2[Ho + 1:Ho + 2, :, :] = jnp.zeros((1, Wo + 2, Cmid), pad2.dtype)
    pad2[:, 0:1, :] = jnp.zeros((Ho + 2, 1, Cmid), pad2.dtype)
    pad2[:, Wo + 1:Wo + 2, :] = jnp.zeros((Ho + 2, 1, Cmid), pad2.dtype)

    # ---- 2x2 max pool (stride 2), in bf16 (max commutes with the rounding) --
    xb = x_ref[0]                                    # (Ho, 2, Wo, 2*Cin)
    hmax = jnp.maximum(xb[:, 0], xb[:, 1])           # (Ho, Wo, 2*Cin)
    pooled = jnp.maximum(hmax[:, :, :Cin], hmax[:, :, Cin:])   # (Ho, Wo, Cin)
    pad1[1:Ho + 1, 1:Wo + 1, :] = pooled.astype(pad1.dtype)

    # ---- conv1: 9 accumulating per-tap bf16 matmuls, f32 acc, shift + ReLU --
    acc1 = jnp.zeros((Ho * Wo, Cmid), jnp.float32)
    for t in range(9):
        dh, dw = t // 3, t % 3
        tap = pad1[dh:dh + Ho, dw:dw + Wo, :].reshape(Ho * Wo, Cin)
        acc1 = acc1 + jnp.dot(tap, w1_ref[t],
                              preferred_element_type=jnp.float32)
    y1 = jnp.maximum(acc1 + sh1_ref[...], 0.0)
    pad2[1:Ho + 1, 1:Wo + 1, :] = y1.reshape(Ho, Wo, Cmid).astype(pad2.dtype)

    # ---- conv2: 9 accumulating per-tap bf16 matmuls, f32 acc, shift + ReLU --
    acc2 = jnp.zeros((Ho * Wo, Cout), jnp.float32)
    for t in range(9):
        dh, dw = t // 3, t % 3
        tap = pad2[dh:dh + Ho, dw:dw + Wo, :].reshape(Ho * Wo, Cmid)
        acc2 = acc2 + jnp.dot(tap, w2_ref[t],
                              preferred_element_type=jnp.float32)
    y2 = jnp.maximum(acc2 + sh2_ref[...], 0.0)

    # ---- single lane-dense slab store --------------------------------------
    o_ref[0] = y2.astype(o_ref.dtype)


def _vmem_limit_bytes(Ho, Wo, Cin, Cmid_p, Cout_p):
    """Shape-aware VMEM budget (per-step working set, with headroom)."""
    inp = 2 * (Ho * 2 * Wo * 2 * Cin) * 2            # double-buffered bf16 input
    outb = 2 * (Ho * Wo * Cout_p) * 4                # double-buffered f32 output
    pads = (Ho + 2) * (Wo + 2) * (Cin + Cmid_p) * 2  # bf16 padded scratch
    wts = 2 * 9 * (Cin * Cmid_p + Cmid_p * Cout_p) * 2
    acc = Ho * Wo * (Cmid_p + Cout_p) * 4            # live f32 accumulators
    est = int(1.5 * (inp + outb + pads + wts + acc))
    return max(32 * 1024 * 1024, min(est, 100 * 1024 * 1024))


def down_layer_forward(x_nchw, params):
    """DownLayer forward: NCHW in -> NCHW out (N, out_ch, H//2, W//2)."""
    w1, sc1, sh1, w2, sc2, sh2 = params
    N, Cin, H, W = x_nchw.shape
    assert H % 2 == 0 and W % 2 == 0, "MaxPool2d(2) path assumes even H, W"
    Ho, Wo = H // 2, W // 2
    Cmid = w1.shape[3]
    Cout = w2.shape[3]
    Cmid_p = _round_up(Cmid, 128)
    Cout_p = _round_up(Cout, 128)

    # glue: NCHW -> NHWC, bf16, then split the 2x2 pool pairs out
    x = jnp.transpose(x_nchw, (0, 2, 3, 1)).astype(jnp.bfloat16)  # (N,H,W,Cin)
    xr = x.reshape(N, Ho, 2, Wo, 2 * Cin)                         # free reshape

    # fold BN scale into the weights in f32, pad channels to lane width,
    # then cast to bf16 for the MXU; only the shift stays separate (f32).
    w1f = (w1 * sc1[0]).astype(jnp.float32)                 # (3,3,Cin,Cmid)
    w2f = (w2 * sc2[0]).astype(jnp.float32)                 # (3,3,Cmid,Cout)
    w1p = jnp.zeros((3, 3, Cin, Cmid_p), jnp.float32)
    w1p = w1p.at[:, :, :, :Cmid].set(w1f)
    w2p = jnp.zeros((3, 3, Cmid_p, Cout_p), jnp.float32)
    w2p = w2p.at[:, :, :Cmid, :Cout].set(w2f)
    w1_k = w1p.reshape(9, Cin, Cmid_p).astype(jnp.bfloat16)
    w2_k = w2p.reshape(9, Cmid_p, Cout_p).astype(jnp.bfloat16)
    sh1_k = jnp.zeros((1, Cmid_p), jnp.float32).at[:, :Cmid].set(
        sh1.astype(jnp.float32))
    sh2_k = jnp.zeros((1, Cout_p), jnp.float32).at[:, :Cout].set(
        sh2.astype(jnp.float32))

    out = pl.pallas_call(
        _down_layer_kernel,
        out_shape=jax.ShapeDtypeStruct((N, Ho * Wo, Cout_p), x_nchw.dtype),
        grid_spec=pltpu.PrefetchScalarGridSpec(
            num_scalar_prefetch=0,
            grid=(N,),
            in_specs=[
                pl.BlockSpec((1, Ho, 2, Wo, 2 * Cin),
                             lambda b: (b, 0, 0, 0, 0)),
                pl.BlockSpec((9, Cin, Cmid_p), lambda b: (0, 0, 0)),
                pl.BlockSpec((1, Cmid_p), lambda b: (0, 0)),
                pl.BlockSpec((9, Cmid_p, Cout_p), lambda b: (0, 0, 0)),
                pl.BlockSpec((1, Cout_p), lambda b: (0, 0)),
            ],
            out_specs=pl.BlockSpec((1, Ho * Wo, Cout_p), lambda b: (b, 0, 0)),
            scratch_shapes=[
                pltpu.VMEM((Ho + 2, Wo + 2, Cin), jnp.bfloat16),
                pltpu.VMEM((Ho + 2, Wo + 2, Cmid_p), jnp.bfloat16),
            ],
        ),
        compiler_params=pltpu.CompilerParams(
            dimension_semantics=("parallel",),
            vmem_limit_bytes=_vmem_limit_bytes(Ho, Wo, Cin, Cmid_p, Cout_p)),
    )(xr, w1_k, sh1_k, w2_k, sh2_k)

    out = out[:, :, :Cout].reshape(N, Ho, Wo, Cout)
    return jnp.transpose(out, (0, 3, 1, 2))                 # back to NCHW


def init_params(key, in_ch, out_ch, mid_ch=None, eps=1e-5):
    """Deterministic synthetic parameters; BN folded into (scale, shift)."""
    if not mid_ch:
        mid_ch = out_ch
    ks = jax.random.split(key, 12)

    w1 = 0.1 * jax.random.normal(ks[0], (3, 3, in_ch, mid_ch), jnp.float32)
    b1 = 0.1 * jax.random.normal(ks[1], (mid_ch,), jnp.float32)
    g1 = 1.0 + 0.1 * jax.random.normal(ks[2], (mid_ch,), jnp.float32)
    be1 = 0.1 * jax.random.normal(ks[3], (mid_ch,), jnp.float32)
    rm1 = 0.1 * jax.random.normal(ks[4], (mid_ch,), jnp.float32)
    rv1 = jnp.abs(jax.random.normal(ks[5], (mid_ch,), jnp.float32)) + 0.5

    w2 = 0.1 * jax.random.normal(ks[6], (3, 3, mid_ch, out_ch), jnp.float32)
    b2 = 0.1 * jax.random.normal(ks[7], (out_ch,), jnp.float32)
    g2 = 1.0 + 0.1 * jax.random.normal(ks[8], (out_ch,), jnp.float32)
    be2 = 0.1 * jax.random.normal(ks[9], (out_ch,), jnp.float32)
    rm2 = 0.1 * jax.random.normal(ks[10], (out_ch,), jnp.float32)
    rv2 = jnp.abs(jax.random.normal(ks[11], (out_ch,), jnp.float32)) + 0.5

    scale1 = g1 / jnp.sqrt(rv1 + eps)
    shift1 = (b1 - rm1) * scale1 + be1
    scale2 = g2 / jnp.sqrt(rv2 + eps)
    shift2 = (b2 - rm2) * scale2 + be2

    return (w1, scale1.reshape(1, -1), shift1.reshape(1, -1),
            w2, scale2.reshape(1, -1), shift2.reshape(1, -1))


def reference_forward(x_nchw, params):
    """Pure-JAX f32 reference of the same forward (for correctness check)."""
    w1, sc1, sh1, w2, sc2, sh2 = params
    x = jnp.transpose(x_nchw, (0, 2, 3, 1))
    pooled = lax.reduce_window(x, -jnp.inf, lax.max,
                               (1, 2, 2, 1), (1, 2, 2, 1), 'VALID')
    dn1 = lax.conv_dimension_numbers(pooled.shape, w1.shape,
                                     ('NHWC', 'HWIO', 'NHWC'))
    y = lax.conv_general_dilated(pooled, w1, (1, 1), 'SAME',
                                 dimension_numbers=dn1)
    y = jnp.maximum(y * sc1[0] + sh1[0], 0.0)
    dn2 = lax.conv_dimension_numbers(y.shape, w2.shape,
                                     ('NHWC', 'HWIO', 'NHWC'))
    y = lax.conv_general_dilated(y, w2, (1, 1), 'SAME',
                                 dimension_numbers=dn2)
    y = jnp.maximum(y * sc2[0] + sh2[0], 0.0)
    return jnp.transpose(y, (0, 3, 1, 2))


if __name__ == "__main__":
    key = jax.random.PRNGKey(0)
    kx, kp = jax.random.split(key)

    N, Cin, H, W = 2, 4, 16, 16      # input (NCHW), like the PyTorch module
    out_ch = 8                       # DownLayer(in_ch=4, out_ch=8), bn='both'

    x = jax.random.normal(kx, (N, Cin, H, W), jnp.float32)
    params = init_params(kp, Cin, out_ch)

    out = down_layer_forward(x, params)
    out = jax.block_until_ready(out)

    assert out.shape == (N, out_ch, H // 2, W // 2), out.shape

    ref = reference_forward(x, params)
    max_err = float(jnp.max(jnp.abs(out - ref)))
    # Tolerance accounts for bf16 MXU inputs / bf16 pooled & mid activations
    # (f32 accumulation, f32 shift+ReLU) vs the f32 reference.
    if max_err > 5e-2:
        raise AssertionError(f"kernel/reference mismatch: max abs err={max_err}")

    print("KERNEL_OK")
</pallas_src>

<mosaic_0001>
module attributes {stable_mosaic.version = 11 : i64} {
  func.func @_down_layer_kernel(%arg0: i32, %arg1: memref<1x8x2x8x8xbf16, #tpu.memory_space<vmem>>, %arg2: memref<9x4x128xbf16, #tpu.memory_space<vmem>>, %arg3: memref<1x128xf32, #tpu.memory_space<vmem>>, %arg4: memref<9x128x128xbf16, #tpu.memory_space<vmem>>, %arg5: memref<1x128xf32, #tpu.memory_space<vmem>>, %arg6: memref<1x64x128xf32, #tpu.memory_space<vmem>>, %arg7: memref<10x10x4xbf16, #tpu.memory_space<vmem>>, %arg8: memref<10x10x128xbf16, #tpu.memory_space<vmem>>) attributes {dimension_semantics = [#tpu.dimension_semantics<parallel>], iteration_bounds = array<i64: 2>, scalar_prefetch = 0 : i64, scratch_operands = 2 : i64, tpu.core_type = #tpu.core_type<tc>, window_params = [{transform_indices = @transform_0, window_bounds = array<i64: 1, 8, 2, 8, 8>}, {pipeline_mode = #tpu.pipeline_mode<synchronous>, transform_indices = @transform_1, window_bounds = array<i64: 9, 4, 128>}, {pipeline_mode = #tpu.pipeline_mode<synchronous>, transform_indices = @transform_2, window_bounds = array<i64: 1, 128>}, {pipeline_mode = #tpu.pipeline_mode<synchronous>, transform_indices = @transform_3, window_bounds = array<i64: 9, 128, 128>}, {pipeline_mode = #tpu.pipeline_mode<synchronous>, transform_indices = @transform_4, window_bounds = array<i64: 1, 128>}, {transform_indices = @transform_5, window_bounds = array<i64: 1, 64, 128>}]} {
    %cst = arith.constant 0.000000e+00 : bf16
    %0 = vector.broadcast %cst : bf16 to vector<1x10x4xbf16>
    %c0 = arith.constant 0 : index
    %c0_0 = arith.constant 0 : index
    %c0_1 = arith.constant 0 : index
    %1 = vector.load %arg7[%c0, %c0_0, %c0_1] : memref<10x10x4xbf16, #tpu.memory_space<vmem>>, vector<1x10x4xbf16>
    tpu.vector_store %arg7[%c0, %c0_0, %c0_1], %0 {strides = array<i32>} : memref<10x10x4xbf16, #tpu.memory_space<vmem>>, vector<1x10x4xbf16>,
    %cst_2 = arith.constant 0.000000e+00 : bf16
    %2 = vector.broadcast %cst_2 : bf16 to vector<1x10x4xbf16>
    %c9 = arith.constant 9 : index
    %c0_3 = arith.constant 0 : index
    %c0_4 = arith.constant 0 : index
    %3 = vector.load %arg7[%c9, %c0_3, %c0_4] : memref<10x10x4xbf16, #tpu.memory_space<vmem>>, vector<1x10x4xbf16>
    tpu.vector_store %arg7[%c9, %c0_3, %c0_4], %2 {strides = array<i32>} : memref<10x10x4xbf16, #tpu.memory_space<vmem>>, vector<1x10x4xbf16>,
    %cst_5 = arith.constant 0.000000e+00 : bf16
    %4 = vector.broadcast %cst_5 : bf16 to vector<10x1x4xbf16>
    %c0_6 = arith.constant 0 : index
    %c0_7 = arith.constant 0 : index
    %c0_8 = arith.constant 0 : index
    %5 = vector.load %arg7[%c0_6, %c0_7, %c0_8] : memref<10x10x4xbf16, #tpu.memory_space<vmem>>, vector<10x1x4xbf16>
    tpu.vector_store %arg7[%c0_6, %c0_7, %c0_8], %4 {strides = array<i32>} : memref<10x10x4xbf16, #tpu.memory_space<vmem>>, vector<10x1x4xbf16>,
    %cst_9 = arith.constant 0.000000e+00 : bf16
    %6 = vector.broadcast %cst_9 : bf16 to vector<10x1x4xbf16>
    %c0_10 = arith.constant 0 : index
    %c9_11 = arith.constant 9 : index
    %c0_12 = arith.constant 0 : index
    %7 = vector.load %arg7[%c0_10, %c9_11, %c0_12] : memref<10x10x4xbf16, #tpu.memory_space<vmem>>, vector<10x1x4xbf16>
    tpu.vector_store %arg7[%c0_10, %c9_11, %c0_12], %6 {strides = array<i32>} : memref<10x10x4xbf16, #tpu.memory_space<vmem>>, vector<10x1x4xbf16>,
    %cst_13 = arith.constant 0.000000e+00 : bf16
    %8 = vector.broadcast %cst_13 : bf16 to vector<1x10x128xbf16>
    %c0_14 = arith.constant 0 : index
    %c0_15 = arith.constant 0 : index
    %c0_16 = arith.constant 0 : index
    %9 = vector.load %arg8[%c0_14, %c0_15, %c0_16] : memref<10x10x128xbf16, #tpu.memory_space<vmem>>, vector<1x10x128xbf16>
    tpu.vector_store %arg8[%c0_14, %c0_15, %c0_16], %8 {strides = array<i32>} : memref<10x10x128xbf16, #tpu.memory_space<vmem>>, vector<1x10x128xbf16>,
    %cst_17 = arith.constant 0.000000e+00 : bf16
    %10 = vector.broadcast %cst_17 : bf16 to vector<1x10x128xbf16>
    %c9_18 = arith.constant 9 : index
    %c0_19 = arith.constant 0 : index
    %c0_20 = arith.constant 0 : index
    %11 = vector.load %arg8[%c9_18, %c0_19, %c0_20] : memref<10x10x128xbf16, #tpu.memory_space<vmem>>, vector<1x10x128xbf16>
    tpu.vector_store %arg8[%c9_18, %c0_19, %c0_20], %10 {strides = array<i32>} : memref<10x10x128xbf16, #tpu.memory_space<vmem>>, vector<1x10x128xbf16>,
    %cst_21 = arith.constant 0.000000e+00 : bf16
    %12 = vector.broadcast %cst_21 : bf16 to vector<10x1x128xbf16>
    %c0_22 = arith.constant 0 : index
    %c0_23 = arith.constant 0 : index
    %c0_24 = arith.constant 0 : index
    %13 = vector.load %arg8[%c0_22, %c0_23, %c0_24] : memref<10x10x128xbf16, #tpu.memory_space<vmem>>, vector<10x1x128xbf16>
    tpu.vector_store %arg8[%c0_22, %c0_23, %c0_24], %12 {strides = array<i32>} : memref<10x10x128xbf16, #tpu.memory_space<vmem>>, vector<10x1x128xbf16>,
    %cst_25 = arith.constant 0.000000e+00 : bf16
    %14 = vector.broadcast %cst_25 : bf16 to vector<10x1x128xbf16>
    %c0_26 = arith.constant 0 : index
    %c9_27 = arith.constant 9 : index
    %c0_28 = arith.constant 0 : index
    %15 = vector.load %arg8[%c0_26, %c9_27, %c0_28] : memref<10x10x128xbf16, #tpu.memory_space<vmem>>, vector<10x1x128xbf16>
    tpu.vector_store %arg8[%c0_26, %c9_27, %c0_28], %14 {strides = array<i32>} : memref<10x10x128xbf16, #tpu.memory_space<vmem>>, vector<10x1x128xbf16>,
    %c0_29 = arith.constant 0 : index
    %c0_30 = arith.constant 0 : index
    %c0_31 = arith.constant 0 : index
    %c0_32 = arith.constant 0 : index
    %c0_33 = arith.constant 0 : index
    %16 = vector.load %arg1[%c0_29, %c0_30, %c0_31, %c0_32, %c0_33] : memref<1x8x2x8x8xbf16, #tpu.memory_space<vmem>>, vector<1x8x2x8x8xbf16>
    %17 = vector.shape_cast %16 : vector<1x8x2x8x8xbf16> to vector<8x2x8x8xbf16>
    %18 = vector.extract_strided_slice %17 {offsets = [0, 0, 0, 0], sizes = [8, 1, 8, 8], strides = [1, 1, 1, 1]} : vector<8x2x8x8xbf16> to vector<8x1x8x8xbf16>
    %19 = vector.shape_cast %18 : vector<8x1x8x8xbf16> to vector<8x8x8xbf16>
    %20 = vector.extract_strided_slice %17 {offsets = [0, 1, 0, 0], sizes = [8, 1, 8, 8], strides = [1, 1, 1, 1]} : vector<8x2x8x8xbf16> to vector<8x1x8x8xbf16>
    %21 = vector.shape_cast %20 : vector<8x1x8x8xbf16> to vector<8x8x8xbf16>
    %22 = arith.maximumf %19, %21 : vector<8x8x8xbf16>
    %23 = vector.extract_strided_slice %22 {offsets = [0, 0, 0], sizes = [8, 8, 4], strides = [1, 1, 1]} : vector<8x8x8xbf16> to vector<8x8x4xbf16>
    %24 = vector.extract_strided_slice %22 {offsets = [0, 0, 4], sizes = [8, 8, 4], strides = [1, 1, 1]} : vector<8x8x8xbf16> to vector<8x8x4xbf16>
    %25 = arith.maximumf %23, %24 : vector<8x8x4xbf16>
    %c1 = arith.constant 1 : index
    %c1_34 = arith.constant 1 : index
    %c0_35 = arith.constant 0 : index
    %26 = vector.load %arg7[%c1, %c1_34, %c0_35] : memref<10x10x4xbf16, #tpu.memory_space<vmem>>, vector<8x8x4xbf16>
    tpu.vector_store %arg7[%c1, %c1_34, %c0_35], %25 {strides = array<i32>} : memref<10x10x4xbf16, #tpu.memory_space<vmem>>, vector<8x8x4xbf16>,
    %cst_36 = arith.constant 0.000000e+00 : f32
    %27 = vector.broadcast %cst_36 : f32 to vector<64x128xf32>
    %c0_37 = arith.constant 0 : index
    %c0_38 = arith.constant 0 : index
    %c0_39 = arith.constant 0 : index
    %28 = vector.load %arg7[%c0_37, %c0_38, %c0_39] : memref<10x10x4xbf16, #tpu.memory_space<vmem>>, vector<8x8x4xbf16>
    %29 = vector.shape_cast %28 : vector<8x8x4xbf16> to vector<64x4xbf16>
    %c0_40 = arith.constant 0 : index
    %c0_41 = arith.constant 0 : index
    %c0_42 = arith.constant 0 : index
    %30 = vector.load %arg2[%c0_40, %c0_41, %c0_42] : memref<9x4x128xbf16, #tpu.memory_space<vmem>>, vector<1x4x128xbf16>
    %31 = vector.shape_cast %30 : vector<1x4x128xbf16> to vector<4x128xbf16>
    %cst_43 = arith.constant dense<0.000000e+00> : vector<64x128xf32>
    %32 = tpu.matmul %29, %31, %cst_43 {dimension_numbers = #tpu.dot_dimension_numbers<[1], [0], [0], [1], [0, 0, 1, 1], [], []>} : vector<64x4xbf16>, vector<4x128xbf16>, vector<64x128xf32> -> vector<64x128xf32>
    %33 = arith.addf %27, %32 : vector<64x128xf32>
    %c0_44 = arith.constant 0 : index
    %c1_45 = arith.constant 1 : index
    %c0_46 = arith.constant 0 : index
    %34 = vector.load %arg7[%c0_44, %c1_45, %c0_46] : memref<10x10x4xbf16, #tpu.memory_space<vmem>>, vector<8x8x4xbf16>
    %35 = vector.shape_cast %34 : vector<8x8x4xbf16> to vector<64x4xbf16>
    %c1_47 = arith.constant 1 : index
    %c0_48 = arith.constant 0 : index
    %c0_49 = arith.constant 0 : index
    %36 = vector.load %arg2[%c1_47, %c0_48, %c0_49] : memref<9x4x128xbf16, #tpu.memory_space<vmem>>, vector<1x4x128xbf16>
    %37 = vector.shape_cast %36 : vector<1x4x128xbf16> to vector<4x128xbf16>
    %cst_50 = arith.constant dense<0.000000e+00> : vector<64x128xf32>
    %38 = tpu.matmul %35, %37, %cst_50 {dimension_numbers = #tpu.dot_dimension_numbers<[1], [0], [0], [1], [0, 0, 1, 1], [], []>} : vector<64x4xbf16>, vector<4x128xbf16>, vector<64x128xf32> -> vector<64x128xf32>
    %39 = arith.addf %33, %38 : vector<64x128xf32>
    %c0_51 = arith.constant 0 : index
    %c2 = arith.constant 2 : index
    %c0_52 = arith.constant 0 : index
    %40 = vector.load %arg7[%c0_51, %c2, %c0_52] : memref<10x10x4xbf16, #tpu.memory_space<vmem>>, vector<8x8x4xbf16>
    %41 = vector.shape_cast %40 : vector<8x8x4xbf16> to vector<64x4xbf16>
    %c2_53 = arith.constant 2 : index
    %c0_54 = arith.constant 0 : index
    %c0_55 = arith.constant 0 : index
    %42 = vector.load %arg2[%c2_53, %c0_54, %c0_55] : memref<9x4x128xbf16, #tpu.memory_space<vmem>>, vector<1x4x128xbf16>
    %43 = vector.shape_cast %42 : vector<1x4x128xbf16> to vector<4x128xbf16>
    %cst_56 = arith.constant dense<0.000000e+00> : vector<64x128xf32>
    %44 = tpu.matmul %41, %43, %cst_56 {dimension_numbers = #tpu.dot_dimension_numbers<[1], [0], [0], [1], [0, 0, 1, 1], [], []>} : vector<64x4xbf16>, vector<4x128xbf16>, vector<64x128xf32> -> vector<64x128xf32>
    %45 = arith.addf %39, %44 : vector<64x128xf32>
    %c1_57 = arith.constant 1 : index
    %c0_58 = arith.constant 0 : index
    %c0_59 = arith.constant 0 : index
    %46 = vector.load %arg7[%c1_57, %c0_58, %c0_59] : memref<10x10x4xbf16, #tpu.memory_space<vmem>>, vector<8x8x4xbf16>
    %47 = vector.shape_cast %46 : vector<8x8x4xbf16> to vector<64x4xbf16>
    %c3 = arith.constant 3 : index
    %c0_60 = arith.constant 0 : index
    %c0_61 = arith.constant 0 : index
    %48 = vector.load %arg2[%c3, %c0_60, %c0_61] : memref<9x4x128xbf16, #tpu.memory_space<vmem>>, vector<1x4x128xbf16>
    %49 = vector.shape_cast %48 : vector<1x4x128xbf16> to vector<4x128xbf16>
    %cst_62 = arith.constant dense<0.000000e+00> : vector<64x128xf32>
    %50 = tpu.matmul %47, %49, %cst_62 {dimension_numbers = #tpu.dot_dimension_numbers<[1], [0], [0], [1], [0, 0, 1, 1], [], []>} : vector<64x4xbf16>, vector<4x128xbf16>, vector<64x128xf32> -> vector<64x128xf32>
    %51 = arith.addf %45, %50 : vector<64x128xf32>
    %c1_63 = arith.constant 1 : index
    %c1_64 = arith.constant 1 : index
    %c0_65 = arith.constant 0 : index
    %52 = vector.load %arg7[%c1_63, %c1_64, %c0_65] : memref<10x10x4xbf16, #tpu.memory_space<vmem>>, vector<8x8x4xbf16>
    %53 = vector.shape_cast %52 : vector<8x8x4xbf16> to vector<64x4xbf16>
    %c4 = arith.constant 4 : index
    %c0_66 = arith.constant 0 : index
    %c0_67 = arith.constant 0 : index
    %54 = vector.load %arg2[%c4, %c0_66, %c0_67] : memref<9x4x128xbf16, #tpu.memory_space<vmem>>, vector<1x4x128xbf16>
    %55 = vector.shape_cast %54 : vector<1x4x128xbf16> to vector<4x128xbf16>
    %cst_68 = arith.constant dense<0.000000e+00> : vector<64x128xf32>
    %56 = tpu.matmul %53, %55, %cst_68 {dimension_numbers = #tpu.dot_dimension_numbers<[1], [0], [0], [1], [0, 0, 1, 1], [], []>} : vector<64x4xbf16>, vector<4x128xbf16>, vector<64x128xf32> -> vector<64x128xf32>
    %57 = arith.addf %51, %56 : vector<64x128xf32>
    %c1_69 = arith.constant 1 : index
    %c2_70 = arith.constant 2 : index
    %c0_71 = arith.constant 0 : index
    %58 = vector.load %arg7[%c1_69, %c2_70, %c0_71] : memref<10x10x4xbf16, #tpu.memory_space<vmem>>, vector<8x8x4xbf16>
    %59 = vector.shape_cast %58 : vector<8x8x4xbf16> to vector<64x4xbf16>
    %c5 = arith.constant 5 : index
    %c0_72 = arith.constant 0 : index
    %c0_73 = arith.constant 0 : index
    %60 = vector.load %arg2[%c5, %c0_72, %c0_73] : memref<9x4x128xbf16, #tpu.memory_space<vmem>>, vector<1x4x128xbf16>
    %61 = vector.shape_cast %60 : vector<1x4x128xbf16> to vector<4x128xbf16>
    %cst_74 = arith.constant dense<0.000000e+00> : vector<64x128xf32>
    %62 = tpu.matmul %59, %61, %cst_74 {dimension_numbers = #tpu.dot_dimension_numbers<[1], [0], [0], [1], [0, 0, 1, 1], [], []>} : vector<64x4xbf16>, vector<4x128xbf16>, vector<64x128xf32> -> vector<64x128xf32>
    %63 = arith.addf %57, %62 : vector<64x128xf32>
    %c2_75 = arith.constant 2 : index
    %c0_76 = arith.constant 0 : index
    %c0_77 = arith.constant 0 : index
    %64 = vector.load %arg7[%c2_75, %c0_76, %c0_77] : memref<10x10x4xbf16, #tpu.memory_space<vmem>>, vector<8x8x4xbf16>
    %65 = vector.shape_cast %64 : vector<8x8x4xbf16> to vector<64x4xbf16>
    %c6 = arith.constant 6 : index
    %c0_78 = arith.constant 0 : index
    %c0_79 = arith.constant 0 : index
    %66 = vector.load %arg2[%c6, %c0_78, %c0_79] : memref<9x4x128xbf16, #tpu.memory_space<vmem>>, vector<1x4x128xbf16>
    %67 = vector.shape_cast %66 : vector<1x4x128xbf16> to vector<4x128xbf16>
    %cst_80 = arith.constant dense<0.000000e+00> : vector<64x128xf32>
    %68 = tpu.matmul %65, %67, %cst_80 {dimension_numbers = #tpu.dot_dimension_numbers<[1], [0], [0], [1], [0, 0, 1, 1], [], []>} : vector<64x4xbf16>, vector<4x128xbf16>, vector<64x128xf32> -> vector<64x128xf32>
    %69 = arith.addf %63, %68 : vector<64x128xf32>
    %c2_81 = arith.constant 2 : index
    %c1_82 = arith.constant 1 : index
    %c0_83 = arith.constant 0 : index
    %70 = vector.load %arg7[%c2_81, %c1_82, %c0_83] : memref<10x10x4xbf16, #tpu.memory_space<vmem>>, vector<8x8x4xbf16>
    %71 = vector.shape_cast %70 : vector<8x8x4xbf16> to vector<64x4xbf16>
    %c7 = arith.constant 7 : index
    %c0_84 = arith.constant 0 : index
    %c0_85 = arith.constant 0 : index
    %72 = vector.load %arg2[%c7, %c0_84, %c0_85] : memref<9x4x128xbf16, #tpu.memory_space<vmem>>, vector<1x4x128xbf16>
    %73 = vector.shape_cast %72 : vector<1x4x128xbf16> to vector<4x128xbf16>
    %cst_86 = arith.constant dense<0.000000e+00> : vector<64x128xf32>
    %74 = tpu.matmul %71, %73, %cst_86 {dimension_numbers = #tpu.dot_dimension_numbers<[1], [0], [0], [1], [0, 0, 1, 1], [], []>} : vector<64x4xbf16>, vector<4x128xbf16>, vector<64x128xf32> -> vector<64x128xf32>
    %75 = arith.addf %69, %74 : vector<64x128xf32>
    %c2_87 = arith.constant 2 : index
    %c2_88 = arith.constant 2 : index
    %c0_89 = arith.constant 0 : index
    %76 = vector.load %arg7[%c2_87, %c2_88, %c0_89] : memref<10x10x4xbf16, #tpu.memory_space<vmem>>, vector<8x8x4xbf16>
    %77 = vector.shape_cast %76 : vector<8x8x4xbf16> to vector<64x4xbf16>
    %c8 = arith.constant 8 : index
    %c0_90 = arith.constant 0 : index
    %c0_91 = arith.constant 0 : index
    %78 = vector.load %arg2[%c8, %c0_90, %c0_91] : memref<9x4x128xbf16, #tpu.memory_space<vmem>>, vector<1x4x128xbf16>
    %79 = vector.shape_cast %78 : vector<1x4x128xbf16> to vector<4x128xbf16>
    %cst_92 = arith.constant dense<0.000000e+00> : vector<64x128xf32>
    %80 = tpu.matmul %77, %79, %cst_92 {dimension_numbers = #tpu.dot_dimension_numbers<[1], [0], [0], [1], [0, 0, 1, 1], [], []>} : vector<64x4xbf16>, vector<4x128xbf16>, vector<64x128xf32> -> vector<64x128xf32>
    %81 = arith.addf %75, %80 : vector<64x128xf32>
    %c0_93 = arith.constant 0 : index
    %c0_94 = arith.constant 0 : index
    %82 = vector.load %arg3[%c0_93, %c0_94] : memref<1x128xf32, #tpu.memory_space<vmem>>, vector<1x128xf32>
    %83 = vector.broadcast %82 : vector<1x128xf32> to vector<64x128xf32>
    %84 = arith.addf %81, %83 : vector<64x128xf32>
    %cst_95 = arith.constant 0.000000e+00 : f32
    %85 = vector.broadcast %cst_95 : f32 to vector<64x128xf32>
    %86 = arith.maximumf %84, %85 : vector<64x128xf32>
    %87 = vector.shape_cast %86 : vector<64x128xf32> to vector<8x8x128xf32>
    %88 = arith.truncf %87 : vector<8x8x128xf32> to vector<8x8x128xbf16>
    %c1_96 = arith.constant 1 : index
    %c1_97 = arith.constant 1 : index
    %c0_98 = arith.constant 0 : index
    %89 = vector.load %arg8[%c1_96, %c1_97, %c0_98] : memref<10x10x128xbf16, #tpu.memory_space<vmem>>, vector<8x8x128xbf16>
    tpu.vector_store %arg8[%c1_96, %c1_97, %c0_98], %88 {strides = array<i32>} : memref<10x10x128xbf16, #tpu.memory_space<vmem>>, vector<8x8x128xbf16>,
    %cst_99 = arith.constant 0.000000e+00 : f32
    %90 = vector.broadcast %cst_99 : f32 to vector<64x128xf32>
    %c0_100 = arith.constant 0 : index
    %c0_101 = arith.constant 0 : index
    %c0_102 = arith.constant 0 : index
    %91 = vector.load %arg8[%c0_100, %c0_101, %c0_102] : memref<10x10x128xbf16, #tpu.memory_space<vmem>>, vector<8x8x128xbf16>
    %92 = vector.shape_cast %91 : vector<8x8x128xbf16> to vector<64x128xbf16>
    %c0_103 = arith.constant 0 : index
    %c0_104 = arith.constant 0 : index
    %c0_105 = arith.constant 0 : index
    %93 = vector.load %arg4[%c0_103, %c0_104, %c0_105] : memref<9x128x128xbf16, #tpu.memory_space<vmem>>, vector<1x128x128xbf16>
    %94 = vector.shape_cast %93 : vector<1x128x128xbf16> to vector<128x128xbf16>
    %cst_106 = arith.constant dense<0.000000e+00> : vector<64x128xf32>
    %95 = tpu.matmul %92, %94, %cst_106 {dimension_numbers = #tpu.dot_dimension_numbers<[1], [0], [0], [1], [0, 0, 1, 1], [], []>} : vector<64x128xbf16>, vector<128x128xbf16>, vector<64x128xf32> -> vector<64x128xf32>
    %96 = arith.addf %90, %95 : vector<64x128xf32>
    %c0_107 = arith.constant 0 : index
    %c1_108 = arith.constant 1 : index
    %c0_109 = arith.constant 0 : index
    %97 = vector.load %arg8[%c0_107, %c1_108, %c0_109] : memref<10x10x128xbf16, #tpu.memory_space<vmem>>, vector<8x8x128xbf16>
    %98 = vector.shape_cast %97 : vector<8x8x128xbf16> to vector<64x128xbf16>
    %c1_110 = arith.constant 1 : index
    %c0_111 = arith.constant 0 : index
    %c0_112 = arith.constant 0 : index
    %99 = vector.load %arg4[%c1_110, %c0_111, %c0_112] : memref<9x128x128xbf16, #tpu.memory_space<vmem>>, vector<1x128x128xbf16>
    %100 = vector.shape_cast %99 : vector<1x128x128xbf16> to vector<128x128xbf16>
    %cst_113 = arith.constant dense<0.000000e+00> : vector<64x128xf32>
    %101 = tpu.matmul %98, %100, %cst_113 {dimension_numbers = #tpu.dot_dimension_numbers<[1], [0], [0], [1], [0, 0, 1, 1], [], []>} : vector<64x128xbf16>, vector<128x128xbf16>, vector<64x128xf32> -> vector<64x128xf32>
    %102 = arith.addf %96, %101 : vector<64x128xf32>
    %c0_114 = arith.constant 0 : index
    %c2_115 = arith.constant 2 : index
    %c0_116 = arith.constant 0 : index
    %103 = vector.load %arg8[%c0_114, %c2_115, %c0_116] : memref<10x10x128xbf16, #tpu.memory_space<vmem>>, vector<8x8x128xbf16>
    %104 = vector.shape_cast %103 : vector<8x8x128xbf16> to vector<64x128xbf16>
    %c2_117 = arith.constant 2 : index
    %c0_118 = arith.constant 0 : index
    %c0_119 = arith.constant 0 : index
    %105 = vector.load %arg4[%c2_117, %c0_118, %c0_119] : memref<9x128x128xbf16, #tpu.memory_space<vmem>>, vector<1x128x128xbf16>
    %106 = vector.shape_cast %105 : vector<1x128x128xbf16> to vector<128x128xbf16>
    %cst_120 = arith.constant dense<0.000000e+00> : vector<64x128xf32>
    %107 = tpu.matmul %104, %106, %cst_120 {dimension_numbers = #tpu.dot_dimension_numbers<[1], [0], [0], [1], [0, 0, 1, 1], [], []>} : vector<64x128xbf16>, vector<128x128xbf16>, vector<64x128xf32> -> vector<64x128xf32>
    %108 = arith.addf %102, %107 : vector<64x128xf32>
    %c1_121 = arith.constant 1 : index
    %c0_122 = arith.constant 0 : index
    %c0_123 = arith.constant 0 : index
    %109 = vector.load %arg8[%c1_121, %c0_122, %c0_123] : memref<10x10x128xbf16, #tpu.memory_space<vmem>>, vector<8x8x128xbf16>
    %110 = vector.shape_cast %109 : vector<8x8x128xbf16> to vector<64x128xbf16>
    %c3_124 = arith.constant 3 : index
    %c0_125 = arith.constant 0 : index
    %c0_126 = arith.constant 0 : index
    %111 = vector.load %arg4[%c3_124, %c0_125, %c0_126] : memref<9x128x128xbf16, #tpu.memory_space<vmem>>, vector<1x128x128xbf16>
    %112 = vector.shape_cast %111 : vector<1x128x128xbf16> to vector<128x128xbf16>
    %cst_127 = arith.constant dense<0.000000e+00> : vector<64x128xf32>
    %113 = tpu.matmul %110, %112, %cst_127 {dimension_numbers = #tpu.dot_dimension_numbers<[1], [0], [0], [1], [0, 0, 1, 1], [], []>} : vector<64x128xbf16>, vector<128x128xbf16>, vector<64x128xf32> -> vector<64x128xf32>
    %114 = arith.addf %108, %113 : vector<64x128xf32>
    %c1_128 = arith.constant 1 : index
    %c1_129 = arith.constant 1 : index
    %c0_130 = arith.constant 0 : index
    %115 = vector.load %arg8[%c1_128, %c1_129, %c0_130] : memref<10x10x128xbf16, #tpu.memory_space<vmem>>, vector<8x8x128xbf16>
    %116 = vector.shape_cast %115 : vector<8x8x128xbf16> to vector<64x128xbf16>
    %c4_131 = arith.constant 4 : index
    %c0_132 = arith.constant 0 : index
    %c0_133 = arith.constant 0 : index
    %117 = vector.load %arg4[%c4_131, %c0_132, %c0_133] : memref<9x128x128xbf16, #tpu.memory_space<vmem>>, vector<1x128x128xbf16>
    %118 = vector.shape_cast %117 : vector<1x128x128xbf16> to vector<128x128xbf16>
    %cst_134 = arith.constant dense<0.000000e+00> : vector<64x128xf32>
    %119 = tpu.matmul %116, %118, %cst_134 {dimension_numbers = #tpu.dot_dimension_numbers<[1], [0], [0], [1], [0, 0, 1, 1], [], []>} : vector<64x128xbf16>, vector<128x128xbf16>, vector<64x128xf32> -> vector<64x128xf32>
    %120 = arith.addf %114, %119 : vector<64x128xf32>
    %c1_135 = arith.constant 1 : index
    %c2_136 = arith.constant 2 : index
    %c0_137 = arith.constant 0 : index
    %121 = vector.load %arg8[%c1_135, %c2_136, %c0_137] : memref<10x10x128xbf16, #tpu.memory_space<vmem>>, vector<8x8x128xbf16>
    %122 = vector.shape_cast %121 : vector<8x8x128xbf16> to vector<64x128xbf16>
    %c5_138 = arith.constant 5 : index
    %c0_139 = arith.constant 0 : index
    %c0_140 = arith.constant 0 : index
    %123 = vector.load %arg4[%c5_138, %c0_139, %c0_140] : memref<9x128x128xbf16, #tpu.memory_space<vmem>>, vector<1x128x128xbf16>
    %124 = vector.shape_cast %123 : vector<1x128x128xbf16> to vector<128x128xbf16>
    %cst_141 = arith.constant dense<0.000000e+00> : vector<64x128xf32>
    %125 = tpu.matmul %122, %124, %cst_141 {dimension_numbers = #tpu.dot_dimension_numbers<[1], [0], [0], [1], [0, 0, 1, 1], [], []>} : vector<64x128xbf16>, vector<128x128xbf16>, vector<64x128xf32> -> vector<64x128xf32>
    %126 = arith.addf %120, %125 : vector<64x128xf32>
    %c2_142 = arith.constant 2 : index
    %c0_143 = arith.constant 0 : index
    %c0_144 = arith.constant 0 : index
    %127 = vector.load %arg8[%c2_142, %c0_143, %c0_144] : memref<10x10x128xbf16, #tpu.memory_space<vmem>>, vector<8x8x128xbf16>
    %128 = vector.shape_cast %127 : vector<8x8x128xbf16> to vector<64x128xbf16>
    %c6_145 = arith.constant 6 : index
    %c0_146 = arith.constant 0 : index
    %c0_147 = arith.constant 0 : index
    %129 = vector.load %arg4[%c6_145, %c0_146, %c0_147] : memref<9x128x128xbf16, #tpu.memory_space<vmem>>, vector<1x128x128xbf16>
    %130 = vector.shape_cast %129 : vector<1x128x128xbf16> to vector<128x128xbf16>
    %cst_148 = arith.constant dense<0.000000e+00> : vector<64x128xf32>
    %131 = tpu.matmul %128, %130, %cst_148 {dimension_numbers = #tpu.dot_dimension_numbers<[1], [0], [0], [1], [0, 0, 1, 1], [], []>} : vector<64x128xbf16>, vector<128x128xbf16>, vector<64x128xf32> -> vector<64x128xf32>
    %132 = arith.addf %126, %131 : vector<64x128xf32>
    %c2_149 = arith.constant 2 : index
    %c1_150 = arith.constant 1 : index
    %c0_151 = arith.constant 0 : index
    %133 = vector.load %arg8[%c2_149, %c1_150, %c0_151] : memref<10x10x128xbf16, #tpu.memory_space<vmem>>, vector<8x8x128xbf16>
    %134 = vector.shape_cast %133 : vector<8x8x128xbf16> to vector<64x128xbf16>
    %c7_152 = arith.constant 7 : index
    %c0_153 = arith.constant 0 : index
    %c0_154 = arith.constant 0 : index
    %135 = vector.load %arg4[%c7_152, %c0_153, %c0_154] : memref<9x128x128xbf16, #tpu.memory_space<vmem>>, vector<1x128x128xbf16>
    %136 = vector.shape_cast %135 : vector<1x128x128xbf16> to vector<128x128xbf16>
    %cst_155 = arith.constant dense<0.000000e+00> : vector<64x128xf32>
    %137 = tpu.matmul %134, %136, %cst_155 {dimension_numbers = #tpu.dot_dimension_numbers<[1], [0], [0], [1], [0, 0, 1, 1], [], []>} : vector<64x128xbf16>, vector<128x128xbf16>, vector<64x128xf32> -> vector<64x128xf32>
    %138 = arith.addf %132, %137 : vector<64x128xf32>
    %c2_156 = arith.constant 2 : index
    %c2_157 = arith.constant 2 : index
    %c0_158 = arith.constant 0 : index
    %139 = vector.load %arg8[%c2_156, %c2_157, %c0_158] : memref<10x10x128xbf16, #tpu.memory_space<vmem>>, vector<8x8x128xbf16>
    %140 = vector.shape_cast %139 : vector<8x8x128xbf16> to vector<64x128xbf16>
    %c8_159 = arith.constant 8 : index
    %c0_160 = arith.constant 0 : index
    %c0_161 = arith.constant 0 : index
    %141 = vector.load %arg4[%c8_159, %c0_160, %c0_161] : memref<9x128x128xbf16, #tpu.memory_space<vmem>>, vector<1x128x128xbf16>
    %142 = vector.shape_cast %141 : vector<1x128x128xbf16> to vector<128x128xbf16>
    %cst_162 = arith.constant dense<0.000000e+00> : vector<64x128xf32>
    %143 = tpu.matmul %140, %142, %cst_162 {dimension_numbers = #tpu.dot_dimension_numbers<[1], [0], [0], [1], [0, 0, 1, 1], [], []>} : vector<64x128xbf16>, vector<128x128xbf16>, vector<64x128xf32> -> vector<64x128xf32>
    %144 = arith.addf %138, %143 : vector<64x128xf32>
    %c0_163 = arith.constant 0 : index
    %c0_164 = arith.constant 0 : index
    %145 = vector.load %arg5[%c0_163, %c0_164] : memref<1x128xf32, #tpu.memory_space<vmem>>, vector<1x128xf32>
    %146 = vector.broadcast %145 : vector<1x128xf32> to vector<64x128xf32>
    %147 = arith.addf %144, %146 : vector<64x128xf32>
    %cst_165 = arith.constant 0.000000e+00 : f32
    %148 = vector.broadcast %cst_165 : f32 to vector<64x128xf32>
    %149 = arith.maximumf %147, %148 : vector<64x128xf32>
    %c0_166 = arith.constant 0 : index
    %c0_167 = arith.constant 0 : index
    %c0_168 = arith.constant 0 : index
    %150 = vector.load %arg6[%c0_166, %c0_167, %c0_168] : memref<1x64x128xf32, #tpu.memory_space<vmem>>, vector<1x64x128xf32>
    %151 = vector.shape_cast %150 : vector<1x64x128xf32> to vector<64x128xf32>
    %152 = vector.shape_cast %149 : vector<64x128xf32> to vector<1x64x128xf32>
    tpu.vector_store %arg6[%c0_166, %c0_167, %c0_168], %152 {strides = array<i32>} : memref<1x64x128xf32, #tpu.memory_space<vmem>>, vector<1x64x128xf32>,
    return
  }
  func.func @transform_0(%arg0: i32) -> (i32, i32, i32, i32, i32) {
    %c0_i32 = arith.constant 0 : i32
    %c0_i32_0 = arith.constant 0 : i32
    %c0_i32_1 = arith.constant 0 : i32
    %c0_i32_2 = arith.constant 0 : i32
    %c0_i32_3 = arith.constant 0 : i32
    return %arg0, %c0_i32, %c0_i32_0, %c0_i32_1, %c0_i32_2 : i32, i32, i32, i32, i32
  }
  func.func @transform_1(%arg0: i32) -> (i32, i32, i32) {
    %c0_i32 = arith.constant 0 : i32
    %c0_i32_0 = arith.constant 0 : i32
    %c0_i32_1 = arith.constant 0 : i32
    %c0_i32_2 = arith.constant 0 : i32
    return %c0_i32, %c0_i32_0, %c0_i32_1 : i32, i32, i32
  }
  func.func @transform_2(%arg0: i32) -> (i32, i32) {
    %c0_i32 = arith.constant 0 : i32
    %c0_i32_0 = arith.constant 0 : i32
    %c0_i32_1 = arith.constant 0 : i32
    return %c0_i32, %c0_i32_0 : i32, i32
  }
  func.func @transform_3(%arg0: i32) -> (i32, i32, i32) {
    %c0_i32 = arith.constant 0 : i32
    %c0_i32_0 = arith.constant 0 : i32
    %c0_i32_1 = arith.constant 0 : i32
    %c0_i32_2 = arith.constant 0 : i32
    return %c0_i32, %c0_i32_0, %c0_i32_1 : i32, i32, i32
  }
  func.func @transform_4(%arg0: i32) -> (i32, i32) {
    %c0_i32 = arith.constant 0 : i32
    %c0_i32_0 = arith.constant 0 : i32
    %c0_i32_1 = arith.constant 0 : i32
    return %c0_i32, %c0_i32_0 : i32, i32
  }
  func.func @transform_5(%arg0: i32) -> (i32, i32, i32) {
    %c0_i32 = arith.constant 0 : i32
    %c0_i32_0 = arith.constant 0 : i32
    %c0_i32_1 = arith.constant 0 : i32
    return %arg0, %c0_i32, %c0_i32_0 : i32, i32, i32
  }
}

</mosaic_0001>

<bundles_post_ra>
// kernel: tpu_custom_call.1
= control target key start
LH: loop header
LB: loop body
LE: loop exit
PB: predicated region body
PF: predicated region fallthrough
CT: control target
= control target key end

     0   :  { %10 = vsyncpa [#allocation5], 0  ;;  %s6793_s0 = inlined_call_operand.hbm [shape: bf16[2,8,2,8,8], index: 0, kind: input, shape index: {}]   ;;  %s6794_s1 = inlined_call_operand.hbm [shape: bf16[9,4,128], index: 1, kind: input, shape index: {}]   ;;  %s6795_s2 = inlined_call_operand.vmem [shape: f32[1,128], index: 2, kind: input, shape index: {}]   ;;  %s6796_s3 = inlined_call_operand.hbm [shape: bf16[9,128,128], index: 3, kind: input, shape index: {}]   ;;  %s6797_s4 = inlined_call_operand.vmem [shape: f32[1,128], index: 4, kind: input, shape index: {}]   ;;  %s6798_s5 = inlined_call_operand.hbm [shape: f32[2,64,128], index: 5, kind: output, shape index: {}]  }
   0x1   :  { %12 = vsyncpa [#allocation5 + $0x1], 0 }
   0x2   :  { %13 = vsyncpa [#allocation8], 0 }
   0x3   :  { %14 = vsyncpa [#allocation6], 0 }
   0x4   :  { %16 = vsyncpa [#allocation6 + $0x1], 0  ;;  %s5644_s18 = smov 0   ;;  %s5646_s19 = smov 0  }
   0x5   :  { %s5648_s20 = smov 0   ;;  %s5650_s21 = smov 0  }
   0x6 LB: > { %s5665_s22 = sadd.s32 4294967295, %s5600_s21   ;;  %s4395_s23 = sadd.s32 4294967294, %s5600_s21   ;;  %s5600_s21 = sphi %s5650_s21, %s6834_s21   ;;  %s5596_s20 = sphi %s5648_s20, %s6833_s20   ;;  %s5592_s19 = sphi %s5646_s19, %s6832_s19   ;;  %s5588_s18 = sphi %s5644_s18, %s6831_s18  }
   0x7   : > { %p42_p0 = scmp.ne.s32.totalorder %s5592_s19, %s5588_s18  ;;  %p6799_p1 = scmp.eq.s32.totalorder %s5665_s22, 0 }
   0x8   : > { %p156_p3 = scmp.eq.s32.totalorder %s4395_s23, 1  ;;  %p4396_p5 = scmp.ge.s32.totalorder %s5600_s21, 1 }
   0x9   : > { %p5674_p4 = por %p6799_p1, %p42_p0  ;;  %p163_p7 = scmp.lt.s32.totalorder %s5600_s21, 3 }
   0xa   : > { %p5679_p6 = por %p156_p3, %p42_p0  ;;  %s5602_s27 = smov [#allocation7]  }
   0xb   : > { %s6802_s24 = scalar_select %p5674_p4, 1, 0 }
   0xc   : > { %s6803_s25 = scalar_select %p5679_p6, 1, 0 }
   0xd   : > { %p5684_p8 = pnand %p4396_p5, %p163_p7  ;;  %s175_s28 = sshll.u32 %s5602_s27, 4  ;;  %s5688_s28 = int_to_ptr.vmem [resolvable:$true] %s175_s28 }
   0xe   : > { %s5603_s30 = smov [#allocation9]   ;;  %s5444_s9 = scalar_lea.hbm %s6794_s1, 288 }
   0xf   : > { %p5285_p9 = pneg %p5684_p8  ;;  %s191_s6 = sshll.u32 %s5603_s30, 4  ;;  %s5699_s6 = int_to_ptr.vmem [resolvable:$true] %s191_s6 }
  0x10   : > { %p5445_p12 = scmp.ne.s32.totalorder %s6794_s1, %s5444_s9  ;;  %p5451_p5 = scmp.lt.u32.totalorder %s5444_s9, %s6794_s1 }
  0x11   : > { %p5695_p11 = pnand %p5285_p9, %p6799_p1 }
  0x13   : > { %p5446_p13 = pneg %p5695_p11 }
  0x15   : > { %p5447_p0 = pnand %p5446_p13, %p5445_p12 }
  0x17   : > { %p5448_p3 = pneg %p5447_p0 }
  0x19   : > { %p5453_p7 = pnand %p5451_p5, %p5448_p3 }
  0x1b   : > { %5456 = shalt.err (!%p5453_p7)
}
  0x1c   : > { %s5457_s14 = scalar_lea.vmem %s5688_s28, 288  ;;  %p5465_p2 = scmp.lt.s32.totalorder %s5688_s28, %s5688_s28 }
  0x1d   : > { %p5458_p9 = scmp.ne.s32.totalorder %s5688_s28, %s5457_s14  ;;  %p5466_p12 = scmp.lt.s32.totalorder %s5457_s14, %s5457_s14 }
  0x1f   : > { %p5460_p10 = pnand %p5458_p9, %p5446_p13  ;;  %p5467_p0 = por %p5466_p12, %p5465_p2 }
  0x21   : > { %p5461_p1 = pneg %p5460_p10 }
  0x23   : > { %p5468_p6 = pnand %p5467_p0, %p5461_p1 }
  0x25   : > { %5471 = shalt.err (!%p5468_p6)
}
  0x26   : > { %s5604_s15 = smov 32   ;;  %s5605_s16 = smov 2  }
  0x27   : > { %5288 = dma.hbm_to_vmem [thread:$0]  (!%p5695_p11), %s6794_s1, 288, %s5688_s28, [#allocation8], %s5604_s15, %s5604_s15, %s5605_s16  }
  0x28   : > { %s5472_s7 = scalar_lea.hbm %s6796_s3, 9216 }
  0x29   : > { %p5473_p2 = scmp.ne.s32.totalorder %s6796_s3, %s5472_s7  ;;  %p5479_p10 = scmp.lt.u32.totalorder %s5472_s7, %s6796_s3 }
  0x2b   : > { %p5475_p1 = pnand %p5473_p2, %p5446_p13 }
  0x2d   : > { %p5476_p6 = pneg %p5475_p1 }
  0x2f   : > { %p5481_p3 = pnand %p5479_p10, %p5476_p6 }
  0x31   : > { %5484 = shalt.err (!%p5481_p3)
}
  0x32   : > { %s5485_s28 = scalar_lea.vmem %s5699_s6, 9216  ;;  %p5493_p12 = scmp.lt.s32.totalorder %s5699_s6, %s5699_s6 }
  0x33   : > { %p5486_p5 = scmp.ne.s32.totalorder %s5699_s6, %s5485_s28  ;;  %p5494_p0 = scmp.lt.s32.totalorder %s5485_s28, %s5485_s28 }
  0x35   : > { %p5488_p7 = pnand %p5486_p5, %p5446_p13  ;;  %p5495_p2 = por %p5494_p0, %p5493_p12 }
  0x37   : > { %p5489_p9 = pneg %p5488_p7 }
  0x39   : > { %p5496_p1 = pnand %p5495_p2, %p5489_p9 }
  0x3b   : > { %5499 = shalt.err (!%p5496_p1)
}
  0x3c   : > { %s5606_s12 = smov 64   ;;  %s5607_s13 = smov 4  }
  0x3d   : > { %5291 = dma.hbm_to_vmem [thread:$0]  (!%p5695_p11), %s6796_s3, 9216, %s5699_s6, [#allocation8], %s5606_s12, %s5606_s12, %s5607_s13  }
  0x3e   : > { %s5757_s16 = sadd.s32 1, %s5600_s21   ;;  %s29_s23 = sadd.s32 1, %s5596_s20 }
  0x3f   : > { %s26_s17 = ssub.s32 %s5600_s21, %s5757_s16  ;;  %p36_p6 = scmp.ne.s32.totalorder %s5596_s20, %s5592_s19 }
  0x40   : > { %p27_p13 = scmp.eq.s32.totalorder %s26_s17, 0  ;;  %p37_p10 = scmp.eq.s32.totalorder %s5600_s21, 0 }
  0x41   : > { %p6806_p5 = scmp.eq.s32.totalorder %s5665_s22, 1  ;;  %p5302_p9 = scmp.lt.s32.totalorder %s5600_s21, 2 }
  0x42   : > { %s5766_s27 = scalar_select %p27_p13, %s5596_s20, %s29_s23  }
  0x43   : > { %p38_p3 = por %p37_p10, %p36_p6  ;;  %p5770_p7 = por %p6806_p5, %p36_p6 }
  0x44   : > { %s208_s30 = sand.u32 1, %s5596_s20   ;;  %s4651_s6 = sshll.u32 %s5600_s21, 10 }
  0x45   : > { %s6807_s29 = scalar_select %p5770_p7, 1, 0 }
  0x46   : > { %s4400_s7 = sshll.u32 %s208_s30, 6  ;;  %s5780_s10 = scalar_lea.hbm %s6793_s0, %s4651_s6 }
  0x47   : > { %s212_s11 = scalar_lea.vmem [#allocation4], %s4400_s7  ;;  %p5784_p11 = pnand %p5302_p9, %p38_p3 }
  0x48   : > { %s219_s28 = sshll.u32 %s212_s11, 4  ;;  %s5788_s15 = scalar_lea.sflag [#allocation5], %s208_s30  ;;  %s5782_s28 = int_to_ptr.vmem [resolvable:$true] %s219_s28 }
  0x49   : > { %s5500_s17 = scalar_lea.hbm %s5780_s10, 1024  ;;  %p5502_p0 = pneg %p5784_p11 }
  0x4a   : > { %p5501_p12 = scmp.ne.s32.totalorder %s5780_s10, %s5500_s17  ;;  %s5505_s6 = scalar_lea.hbm %s6793_s0, 2048 }
  0x4b   : > { %p5506_p13 = scmp.lt.u32.totalorder %s5780_s10, %s6793_s0  ;;  %p5507_p6 = scmp.lt.u32.totalorder %s5505_s6, %s5500_s17 }
  0x4c   : > { %p5503_p2 = pnand %p5502_p0, %p5501_p12  ;;  %p5509_p3 = scmp.lt.u32.totalorder %s5500_s17, %s5780_s10 }
  0x4d   : > { %p5508_p10 = por %p5507_p6, %p5506_p13 }
  0x4e   : > { %p5504_p1 = pneg %p5503_p2 }
  0x4f   : > { %p5510_p5 = por %p5509_p3, %p5508_p10 }
  0x51   : > { %p5511_p9 = pnand %p5510_p5, %p5504_p1 }
  0x53   : > { %5514 = shalt.err (!%p5511_p9)
}
  0x54   : > { %s5515_s30 = scalar_lea.vmem %s5782_s28, 1024  ;;  %s5608_s11 = smov [#allocation4]  }
  0x55   : > { %p5516_p12 = scmp.ne.s32.totalorder %s5782_s28, %s5515_s30  ;;  %s5520_s23 = sshll.u32 %s5608_s11, 4  ;;  %s5521_s23 = int_to_ptr.vmem [resolvable:$false] %s5520_s23 }
  0x56   : > { %s5522_s7 = scalar_lea.vmem %s5521_s23, 2048  ;;  %p5523_p4 = scmp.lt.s32.totalorder %s5782_s28, %s5521_s23 }
  0x57   : > { %p5518_p2 = pnand %p5516_p12, %p5502_p0  ;;  %p5524_p13 = scmp.lt.s32.totalorder %s5522_s7, %s5515_s30 }
  0x59   : > { %p5519_p7 = pneg %p5518_p2  ;;  %p5525_p6 = por %p5524_p13, %p5523_p4 }
  0x5b   : > { %p5526_p10 = pnand %p5525_p6, %p5519_p7 }
  0x5d   : > { %5529 = shalt.err (!%p5526_p10)
}
  0x5e   : > { %5295 = dma.hbm_to_vmem [thread:$0]  (!%p5784_p11), %s5780_s10, 1024, %s5782_s28, %s5788_s15, %s5606_s12, %s5606_s12, %s5607_s13  }
  0x5f   : > { %231 = sbr.rel (%p5684_p8) target bundleno = 1070 (0x42e), region = 40  ;;  %s5822_s17 = sand.u32 (!%p5684_p8), 1, %s5592_s19  }
  0x60   : > { %s4404_s6 = sshll.u32 (!%p5684_p8), %s5822_s17, 6  ;;  %s234_s8 = scalar_lea.sflag (!%p5684_p8), [#allocation5], %s5822_s17 }
  0x61   : > { %s5828_s14 = scalar_lea.vmem (!%p5684_p8), [#allocation4], %s4404_s6  ;;  %p6809_p4 = scmp.ne.s32.totalorder (!%p5684_p8), %s6802_s24, 0 }
  0x66   : > { %5575 = dma.done.wait (%p6809_p4), %s234_s8, 1024  }
  0x67   : > { %5577 = vsyncadd (%p6809_p4), %s234_s8, 4294966272  ;;  %p6810_p7 = scmp.eq.s32.totalorder %s5665_s22, 0 }
  0x69   : > { %5579 = dma.done.wait (%p6810_p7), [#allocation8], 9504   ;;  %p6811_p8 = pmov %p6810_p7 }
  0x6a   : > { %vm273_vm0 = vcmask 27648   ;;  %vm275_vm1 = vcmask 24576   ;;  %v5609_v0 = vmov 0   ;;  %vm281_vm2 = vsmask.f32 256  ;;  %s5610_s24 = smov 124  }
  0x6b   : > { %5581 = vsyncadd (%p6811_p8), [#allocation8], 4294957792  ;;  %274 = vst.msk [vmem:[#allocation2] sm:$0xf] %vm273_vm0, %v5609_v0  ;;  %v417_v1 = vld [vmem:[%s5828_s14 + $0x10] sm:$0xf] }
  0x6c   : > { %276 = vst.msk [vmem:[#allocation2 + $0x4] sm:$0x1] %vm275_vm1, %v5609_v0  ;;  %279 = vst.msk [vmem:[#allocation2 + $0x4c] sm:$0x1] %vm275_vm1, %v5609_v0  ;;  %v418_v2 = vld [vmem:[%s5828_s14 + $0x14] sm:$0xf] }
  0x6d   : > { %278 = vst.msk [vmem:[#allocation2 + $0x48] sm:$0xf] %vm273_vm0, %v5609_v0  ;;  %345 = vst [vmem:[#allocation3] sm:$0xf] %v5609_v0  ;;  %v413_v3 = vld [vmem:[%s5828_s14] sm:$0xf]  ;;  %v5845_v4 = vmax.bf16 %v418_v2, %v417_v1 }
  0x6e   : > { %346 = vst [vmem:[#allocation3 + $0x4] sm:$0x1] %v5609_v0  ;;  %348 = vst [vmem:[#allocation3 + $0x48] sm:$0xf] %v5609_v0  ;;  %v414_v5 = vld [vmem:[%s5828_s14 + $0x4] sm:$0xf] }
  0x6f   : > { %349 = vst [vmem:[#allocation3 + $0x4c] sm:$0x1] %v5609_v0  ;;  %v419_v6 = vld [vmem:[%s5828_s14 + $0x18] sm:$0xf]  ;;  %v420_v7 = vld [vmem:[%s5828_s14 + $0x1c] sm:$0xf]  ;;  %v5850_v8 = vmax.bf16 %v414_v5, %v413_v3  ;;  %449 = vrot.lane.b32.xlu1 %v5845_v4, %s5610_s24  ;;  %vm5860_vm3 = vmand %vm275_vm1, %vm281_vm2 }
  0x70   : > { %v415_v9 = vld [vmem:[%s5828_s14 + $0x8] sm:$0xf]  ;;  %v416_v10 = vld [vmem:[%s5828_s14 + $0xc] sm:$0xf]  ;;  %v5856_v11 = vmax.bf16 %v420_v7, %v419_v6  ;;  %vm313_vm4 = vsmask.f32 7938 }
  0x71   : > { %445 = vrot.lane.b32.xlu0 %v5850_v8, %s5610_s24  ;;  %v5866_v13 = vmax.bf16 %v416_v10, %v415_v9  ;;  %v423_v14 = vld [vmem:[%s5828_s14 + $0x28] sm:$0xf]  ;;  %v424_v15 = vld [vmem:[%s5828_s14 + $0x2c] sm:$0xf]  ;;  %v421_v16 = vld [vmem:[%s5828_s14 + $0x20] sm:$0xf] }
  0x72   : > { %v422_v17 = vld [vmem:[%s5828_s14 + $0x24] sm:$0xf]  ;;  %v283_v18 = vld [vmem:[#allocation2] sm:$0x1]  ;;  %v292_v19 = vld [vmem:[#allocation2 + $0x18] sm:$0x1]  ;;  %v5886_v27 = vmax.bf16 %v424_v15, %v423_v14 }
  0x73   : > { %v427_v20 = vld [vmem:[%s5828_s14 + $0x38] sm:$0xf]  ;;  %v428_v21 = vld [vmem:[%s5828_s14 + $0x3c] sm:$0xf]  ;;  %vm5876_vm5 = vmand %vm275_vm1, %vm313_vm4  ;;  %v284_v23 = vsel %vm5860_vm3, 0, %v283_v18  ;;  %v293_v24 = vsel %vm5860_vm3, 0, %v292_v19  ;;  %451 = vrot.lane.b32.xlu1 %v5856_v11, %s5610_s24  ;;  %v5896_v34 = vmax.bf16 %v422_v17, %v421_v16 }
  0x74   : > { %v310_v25 = vld [vmem:[#allocation2 + $0x48] sm:$0x1]  ;;  %v324_v26 = vld [vmem:[#allocation2 + $0x1c] sm:$0x1]  ;;  %v425_v28 = vld [vmem:[%s5828_s14 + $0x30] sm:$0xf]  ;;  %v5912_v47 = vmax.bf16 %v428_v21, %v427_v20 }
  0x75   : > { %v426_v29 = vld [vmem:[%s5828_s14 + $0x34] sm:$0xf]  ;;  %285 = vst [vmem:[#allocation2] sm:$0x1] %v284_v23  ;;  %294 = vst [vmem:[#allocation2 + $0x18] sm:$0x1] %v293_v24  ;;  %447 = vrot.lane.b32.xlu0 %v5866_v13, %s5610_s24 }
  0x76   : > { %v311_v30 = vsel %vm5860_vm3, 0, %v310_v25  ;;  %v325_v31 = vsel %vm5876_vm5, 0, %v324_v26  ;;  %v342_v32 = vld [vmem:[#allocation2 + $0x4c] sm:$0x1]  ;;  %v286_v33 = vld [vmem:[#allocation2 + $0x8] sm:$0x1]  ;;  %v5920_v52 = vmax.bf16 %v426_v29, %v425_v28  ;;  %vm5965_vm7 = vmand %vm273_vm0, %vm313_vm4 }
  0x77   : > { %312 = vst [vmem:[#allocation2 + $0x48] sm:$0x1] %v311_v30  ;;  %326 = vst [vmem:[#allocation2 + $0x1c] sm:$0x1] %v325_v31  ;;  %v343_v35 = vsel %vm5876_vm5, 0, %v342_v32  ;;  %v287_v36 = vsel %vm5860_vm3, 0, %v286_v33  ;;  %455 = vrot.lane.b32.xlu1 %v5886_v27, %s5610_s24 }
  0x78   : > { %v318_v37 = vld [vmem:[#allocation2 + $0xc] sm:$0x1]  ;;  %v295_v38 = vld [vmem:[#allocation2 + $0x20] sm:$0x1]  ;;  %344 = vst [vmem:[#allocation2 + $0x4c] sm:$0x1] %v343_v35 }
  0x79   : > { %288 = vst [vmem:[#allocation2 + $0x8] sm:$0x1] %v287_v36  ;;  %v319_v39 = vsel %vm5876_vm5, 0, %v318_v37  ;;  %v296_v40 = vsel %vm5860_vm3, 0, %v295_v38  ;;  %v327_v41 = vld [vmem:[#allocation2 + $0x24] sm:$0x1]  ;;  %453 = vrot.lane.b32.xlu0 %v5896_v34, %s5610_s24 }
  0x7a   : > { %v289_v42 = vld [vmem:[#allocation2 + $0x10] sm:$0x1]  ;;  %320 = vst [vmem:[#allocation2 + $0xc] sm:$0x1] %v319_v39  ;;  %297 = vst [vmem:[#allocation2 + $0x20] sm:$0x1] %v296_v40 }
  0x7b   : > { %v328_v43 = vsel %vm5876_vm5, 0, %v327_v41  ;;  %v290_v44 = vsel %vm5860_vm3, 0, %v289_v42  ;;  %v321_v45 = vld [vmem:[#allocation2 + $0x14] sm:$0x1]  ;;  %v301_v46 = vld [vmem:[#allocation2 + $0x30] sm:$0x1]  ;;  %459 = vrot.lane.b32.xlu1 %v5912_v47, %s5610_s24 }
  0x7c   : > { %329 = vst [vmem:[#allocation2 + $0x24] sm:$0x1] %v328_v43  ;;  %291 = vst [vmem:[#allocation2 + $0x10] sm:$0x1] %v290_v44  ;;  %v322_v48 = vsel %vm5876_vm5, 0, %v321_v45  ;;  %v302_v49 = vsel %vm5860_vm3, 0, %v301_v46 }
  0x7d   : > { %v333_v50 = vld [vmem:[#allocation2 + $0x34] sm:$0x1]  ;;  %v298_v51 = vld [vmem:[#allocation2 + $0x28] sm:$0x1]  ;;  %323 = vst [vmem:[#allocation2 + $0x14] sm:$0x1] %v322_v48  ;;  %457 = vrot.lane.b32.xlu0 %v5920_v52, %s5610_s24 }
  0x7e   : > { %303 = vst [vmem:[#allocation2 + $0x30] sm:$0x1] %v302_v49  ;;  %v334_v53 = vsel %vm5876_vm5, 0, %v333_v50  ;;  %v299_v54 = vsel %vm5860_vm3, 0, %v298_v51  ;;  %v330_v55 = vld [vmem:[#allocation2 + $0x2c] sm:$0x1] }
  0x7f   : > { %v307_v56 = vld [vmem:[#allocation2 + $0x40] sm:$0x1]  ;;  %335 = vst [vmem:[#allocation2 + $0x34] sm:$0x1] %v334_v53  ;;  %300 = vst [vmem:[#allocation2 + $0x28] sm:$0x1] %v299_v54 }
  0x80   : > { %v331_v57 = vsel %vm5876_vm5, 0, %v330_v55  ;;  %v308_v58 = vsel %vm5860_vm3, 0, %v307_v56  ;;  %v339_v59 = vld [vmem:[#allocation2 + $0x44] sm:$0x1]  ;;  %v304_v60 = vld [vmem:[#allocation2 + $0x38] sm:$0x1] }
  0x81   : > { %332 = vst [vmem:[#allocation2 + $0x2c] sm:$0x1] %v331_v57  ;;  %309 = vst [vmem:[#allocation2 + $0x40] sm:$0x1] %v308_v58  ;;  %v340_v61 = vsel %vm5876_vm5, 0, %v339_v59  ;;  %v305_v62 = vsel %vm5860_vm3, 0, %v304_v60 }
  0x82   : > { %v336_v63 = vld [vmem:[#allocation2 + $0x3c] sm:$0x1]  ;;  %341 = vst [vmem:[#allocation2 + $0x44] sm:$0x1] %v340_v61  ;;  %306 = vst [vmem:[#allocation2 + $0x38] sm:$0x1] %v305_v62 }
  0x83   : > { %v337_v0 = vsel %vm5876_vm5, 0, %v336_v63  ;;  %v741_v1 = vld [vmem:[#allocation7 + $0x2] sm:$0x3]  ;;  %vm767_vm6 = vcmask 1041408   ;;  %v315_v3 = vld [vmem:[#allocation2 + $0x4] sm:$0x1] }
  0x84   : > { %338 = vst [vmem:[#allocation2 + $0x3c] sm:$0x1] %v337_v0  ;;  %5264 = vmatprep.subr.msk.bf16.mxu0 %vm767_vm6, %v741_v1  ;;  %v769_v2 = vsel %vm767_vm6, %v741_v1, 0  ;;  %v316_v5 = vsel %vm5876_vm5, 0, %v315_v3  ;;  %v5944_v6 = vld [vmem:[#allocation7] sm:$0x3] }
  0x85   : > { %4815 = vmatpush3.bf16.msra.mxu0 %v769_v2  ;;  %317 = vst [vmem:[#allocation2 + $0x4] sm:$0x1] %v316_v5  ;;  %v5948_v7 = vld [vmem:[#allocation2] sm:$0xf]  ;;  %v572_v22 = vld [vmem:[#allocation2 + $0x18] sm:$0xf] }
  0x86   : > { %5265 = vmatprep.subr.msk.bf16.mxu0 %vm767_vm6, %v5944_v6  ;;  %v629_v9 = vshrl.u32 %v5948_v7, 16  ;;  %v632_v10 = vshll.u32 %v5948_v7, 16  ;;  %v575_v26 = vld [vmem:[#allocation2 + $0x1c] sm:$0x1]  ;;  %v560_v33 = vld [vmem:[#allocation2 + $0x8] sm:$0xf] }
  0x87   : > { %v563_v38 = vld [vmem:[#allocation2 + $0xc] sm:$0x1]  ;;  %v581_v55 = vld [vmem:[#allocation2 + $0x24] sm:$0x1]  ;;  %v566_v57 = vld [vmem:[#allocation2 + $0x10] sm:$0xf] }
  0x88   : > { %v5953_v17 = vrot.slane %v629_v9, 4  ;;  %v5955_v18 = vrot.slane %v632_v10, 5  ;;  %vm625_vm8 = vsmask.f32 3328  ;;  %vm626_vm9 = vsmask.f32 7440 }
  0x89   : > { %v569_v60 = vld [vmem:[#allocation2 + $0x14] sm:$0x1]  ;;  %v590_v10 = vld [vmem:[#allocation2 + $0x30] sm:$0xf]  ;;  %vm6022_vm10 = vmor %vm625_vm8, %vm626_vm9  ;;  %vm754_vm11 = vcmask 31744   ;;  %vm960_vm12 = vcmask 1042432  }
  0x8a   : > { %vm961_vm13 = vcmask 1046532   ;;  %vm350_vm15 = vcmask 1040384   ;;  %s271_s28 = scalar_lea.vmem [#allocation10], %s4404_s6  ;;  %s4660_s15 = sshll.u32 %s5665_s22, 10 }
  0x8b   : > { %vm6105_vm14 = vmor %vm960_vm12, %vm961_vm13  ;;  %s4303_s9 = sshll.u32 %s271_s28, 4  ;;  %s6747_s23 = scalar_lea.hbm %s6798_s5, %s4660_s15  ;;  %s6749_s9 = int_to_ptr.vmem [resolvable:$true] %s4303_s9 }
  0x8c   : > { %v5959_v30 = vld [vmem:[#allocation2 + $0x4] sm:$0x1]  ;;  %vm6173_vm0 = vmand %vm350_vm15, %vm281_vm2  ;;  %vm2246_vm2 = vcmask 1043456   ;;  %s4290_s22 = scalar_lea.sflag [#allocation6], %s5822_s17  ;;  %s5530_s7 = scalar_lea.vmem %s6749_s9, 1024 }
  0x8d   : > { %v638_v36 = vshll.u32 %v5959_v30, 16  ;;  %vm6179_vm1 = vmand %vm350_vm15, %vm313_vm4  ;;  %p5531_p11 = scmp.ne.s32.totalorder %s6749_s9, %s5530_s7  ;;  %p6828_p0 = scmp.ne.s32.totalorder %s6807_s29, 0 }
  0x8e   : > { %s5611_s6 = smov [#allocation10]  }
  0x8f   : > { %p5532_p1 = pnand %p5531_p11, %p6828_p0  ;;  %s5534_s8 = sshll.u32 %s5611_s6, 4  ;;  %s5535_s8 = int_to_ptr.vmem [resolvable:$false] %s5534_s8 }
  0x90   : > { %s5536_s14 = scalar_lea.vmem %s5535_s8, 2048  ;;  %p5537_p5 = scmp.lt.s32.totalorder %s6749_s9, %s5535_s8 }
  0x91   : > { %p5533_p3 = pneg %p5532_p1  ;;  %p5538_p9 = scmp.lt.s32.totalorder %s5536_s14, %s5530_s7 }
  0x93   : > { %p5539_p12 = por %p5538_p9, %p5537_p5 }
  0x95   : > { %p5540_p2 = pnand %p5539_p12, %p5533_p3 }
  0xe1   : > { %v450_v14 = vpop.permute.xlu1 %449 }
  0xe2   : > { %v471_v15 = vmax.bf16 %v450_v14, %v5845_v4  ;;  %v635_v4 = vor.u32 %v5955_v18, %v5953_v17 }
  0xe3   : > { %v446_v16 = vpop.permute.xlu0 %445 }
  0xe4   : > { %v469_v19 = vmax.bf16 %v446_v16, %v5850_v8  ;;  %v494_v20 = vshrl.u32 %v471_v15, 16  ;;  %v497_v21 = vshll.u32 %v471_v15, 16 }
  0xe5   : > { %v452_v24 = vpop.permute.xlu1 %451 }
  0xe6   : > { %v478_v23 = vshrl.u32 %v469_v19, 16  ;;  %v496_v25 = vrot.slane %v494_v20, 7  ;;  %v472_v28 = vmax.bf16 %v452_v24, %v5856_v11  ;;  %v481_v32 = vshll.u32 %v469_v19, 16  ;;  %v593_v20 = vld [vmem:[#allocation2 + $0x34] sm:$0x1] }
  0xe7   : > { %v448_v29 = vpop.permute.xlu0 %447 }
  0xe8   : > { %v480_v8 = vrot.slane %v478_v23, 7  ;;  %v470_v35 = vmax.bf16 %v448_v29, %v5866_v13  ;;  %v499_v11 = vor.u32 %v497_v21, %v496_v25  ;;  %v500_v37 = vrot.slane %v496_v25, 4  ;;  %v578_v13 = vld [vmem:[#allocation2 + $0x20] sm:$0xf] }
  0xe9   : > { %v502_v39 = vshrl.u32 %v472_v28, 16  ;;  %v505_v40 = vshll.u32 %v472_v28, 16  ;;  %v456_v45 = vpop.permute.xlu1 %455 }
  0xea   : > { %v483_v41 = vor.u32 %v481_v32, %v480_v8  ;;  %v484_v42 = vrot.slane %v480_v8, 4  ;;  %v486_v43 = vshrl.u32 %v470_v35, 16  ;;  %v489_v44 = vshll.u32 %v470_v35, 16  ;;  %v602_v32 = vld [vmem:[#allocation2 + $0x40] sm:$0xf] }
  0xeb   : > { %v573_v46 = vsel %vm5965_vm7, %v499_v11, %v572_v22  ;;  %v576_v48 = vsel %vm5860_vm3, %v500_v37, %v575_v26  ;;  %v504_v49 = vrot.slane %v502_v39, 7  ;;  %v474_v50 = vmax.bf16 %v456_v45, %v5886_v27  ;;  %v454_v51 = vpop.permute.xlu0 %453  ;;  %v584_v22 = vld [vmem:[#allocation2 + $0x28] sm:$0xf]  ;;  %v587_v26 = vld [vmem:[#allocation2 + $0x2c] sm:$0x1] }
  0xec   : > { %574 = vst [vmem:[#allocation2 + $0x18] sm:$0xf] %v573_v46  ;;  %577 = vst [vmem:[#allocation2 + $0x1c] sm:$0x1] %v576_v48  ;;  %v561_v53 = vsel %vm5965_vm7, %v483_v41, %v560_v33  ;;  %v564_v54 = vsel %vm5860_vm3, %v484_v42, %v563_v38  ;;  %v488_v56 = vrot.slane %v486_v43, 7  ;;  %v473_v58 = vmax.bf16 %v454_v51, %v5896_v34 }
  0xed   : > { %562 = vst [vmem:[#allocation2 + $0x8] sm:$0xf] %v561_v53  ;;  %565 = vst [vmem:[#allocation2 + $0xc] sm:$0x1] %v564_v54  ;;  %v507_v59 = vor.u32 %v505_v40, %v504_v49  ;;  %v508_v27 = vrot.slane %v504_v49, 4  ;;  %v518_v61 = vshrl.u32 %v474_v50, 16  ;;  %v460_v3 = vpop.permute.xlu1 %459 }
  0xee   : > { %v521_v62 = vshll.u32 %v474_v50, 16  ;;  %v491_v63 = vor.u32 %v489_v44, %v488_v56  ;;  %v492_v0 = vrot.slane %v488_v56, 4  ;;  %v510_v1 = vshrl.u32 %v473_v58, 16  ;;  %v605_v33 = vld [vmem:[#allocation2 + $0x44] sm:$0x1] }
  0xef   : > { %v513_v2 = vshll.u32 %v473_v58, 16  ;;  %v579_v5 = vsel %vm5965_vm7, %v507_v59, %v578_v13  ;;  %v582_v34 = vsel %vm5860_vm3, %v508_v27, %v581_v55  ;;  %v520_v9 = vrot.slane %v518_v61, 7  ;;  %v458_v15 = vpop.permute.xlu0 %457  ;;  %v596_v39 = vld [vmem:[#allocation2 + $0x38] sm:$0xf]  ;;  %v599_v46 = vld [vmem:[#allocation2 + $0x3c] sm:$0x1] }
  0xf0   : > { %v476_v14 = vmax.bf16 %v460_v3, %v5912_v47  ;;  %580 = vst [vmem:[#allocation2 + $0x20] sm:$0xf] %v579_v5  ;;  %583 = vst [vmem:[#allocation2 + $0x24] sm:$0x1] %v582_v34  ;;  %v567_v16 = vsel %vm5965_vm7, %v491_v63, %v566_v57  ;;  %v570_v19 = vsel %vm5860_vm3, %v492_v0, %v569_v60  ;;  %v512_v21 = vrot.slane %v510_v1, 7 }
  0xf1   : > { %v475_v23 = vmax.bf16 %v458_v15, %v5920_v52  ;;  %568 = vst [vmem:[#allocation2 + $0x10] sm:$0xf] %v567_v16  ;;  %571 = vst [vmem:[#allocation2 + $0x14] sm:$0x1] %v570_v19  ;;  %v523_v24 = vor.u32 %v521_v62, %v520_v9  ;;  %v524_v25 = vrot.slane %v520_v9, 4  ;;  %v5994_v11 = vrot.slane %v635_v4, 4 }
  0xf2   : > { %v534_v47 = vshrl.u32 %v476_v14, 16  ;;  %v537_v28 = vshll.u32 %v476_v14, 16  ;;  %v515_v29 = vor.u32 %v513_v2, %v512_v21  ;;  %v516_v8 = vrot.slane %v512_v21, 4 }
  0xf3   : > { %v526_v35 = vshrl.u32 %v475_v23, 16  ;;  %v591_v52 = vsel %vm5965_vm7, %v523_v24, %v590_v10  ;;  %v594_v37 = vsel %vm5860_vm3, %v524_v25, %v593_v20  ;;  %v640_v40 = vrot.slane %v638_v36, 5  ;;  %v6002_v41 = vld [vmem:[#allocation2 + $0x18] sm:$0xf]  ;;  %v6034_v63 = vld [vmem:[#allocation2 + $0x1c] sm:$0x1] }
  0xf4   : > { %v536_v38 = vrot.slane %v534_v47, 7  ;;  %592 = vst [vmem:[#allocation2 + $0x30] sm:$0xf] %v591_v52  ;;  %595 = vst [vmem:[#allocation2 + $0x34] sm:$0x1] %v594_v37  ;;  %v585_v17 = vsel %vm5965_vm7, %v515_v29, %v584_v22  ;;  %v588_v18 = vsel %vm5860_vm3, %v516_v8, %v587_v26  ;;  %v529_v42 = vshll.u32 %v475_v23, 16 }
  0xf5   : > { %v528_v4 = vrot.slane %v526_v35, 7  ;;  %v6008_v43 = vld [vmem:[#allocation2 + $0x8] sm:$0xf]  ;;  %v6010_v44 = vld [vmem:[#allocation2 + $0xc] sm:$0x1]  ;;  %v671_v53 = vshrl.u32 %v6002_v41, 16  ;;  %v641_v12 = vsel %vm6022_vm10, %v5994_v11, %v640_v40 }
  0xf6   : > { %586 = vst [vmem:[#allocation2 + $0x28] sm:$0xf] %v585_v17  ;;  %589 = vst [vmem:[#allocation2 + $0x2c] sm:$0x1] %v588_v18  ;;  %v539_v45 = vor.u32 %v537_v28, %v536_v38  ;;  %v540_v36 = vrot.slane %v536_v38, 4  ;;  %v643_v48 = vshrl.u32 %v6008_v43, 16 }
  0xf7   : > { %v646_v49 = vshll.u32 %v6008_v43, 16  ;;  %v531_v13 = vor.u32 %v529_v42, %v528_v4  ;;  %v532_v50 = vrot.slane %v528_v4, 4  ;;  %v652_v51 = vshll.u32 %v6010_v44, 16  ;;  %v6044_v34 = vld [vmem:[#allocation2 + $0x20] sm:$0xf] }
  0xf8   : > { %v603_v54 = vsel %vm5965_vm7, %v539_v45, %v602_v32  ;;  %v606_v55 = vsel %vm5860_vm3, %v540_v36, %v605_v33  ;;  %v645_v57 = vrot.slane %v643_v48, 4  ;;  %v6030_v60 = vld [vmem:[#allocation2 + $0x10] sm:$0xf]  ;;  %v6032_v61 = vld [vmem:[#allocation2 + $0x14] sm:$0x1]  ;;  %v673_v31 = vrot.slane %v671_v53, 4 }
  0xf9   : > { %v648_v58 = vrot.slane %v646_v49, 5  ;;  %604 = vst [vmem:[#allocation2 + $0x40] sm:$0xf] %v603_v54  ;;  %607 = vst [vmem:[#allocation2 + $0x44] sm:$0x1] %v606_v55  ;;  %v597_v59 = vsel %vm5965_vm7, %v531_v13, %v596_v39  ;;  %v600_v27 = vsel %vm5860_vm3, %v532_v50, %v599_v46  ;;  %v657_v0 = vshrl.u32 %v6030_v60, 16 }
  0xfa   : > { %598 = vst [vmem:[#allocation2 + $0x38] sm:$0xf] %v597_v59  ;;  %601 = vst [vmem:[#allocation2 + $0x3c] sm:$0x1] %v600_v27  ;;  %v660_v1 = vshll.u32 %v6030_v60, 16  ;;  %v666_v2 = vshll.u32 %v6032_v61, 16 }
  0xfb   : > { %v649_v62 = vor.u32 %v648_v58, %v645_v57  ;;  %v674_v3 = vshll.u32 %v6002_v41, 16  ;;  %v680_v5 = vshll.u32 %v6034_v63, 16  ;;  %v654_v10 = vrot.slane %v652_v51, 5  ;;  %v6050_v24 = vld [vmem:[#allocation2 + $0x24] sm:$0x1]  ;;  %vm6387_vm3 = vmand %vm2246_vm2, %vm313_vm4 }
  0xfc   : > { %v659_v14 = vrot.slane %v657_v0, 4  ;;  %v662_v15 = vrot.slane %v660_v1, 5  ;;  %v668_v16 = vrot.slane %v666_v2, 5  ;;  %v685_v26 = vshrl.u32 %v6044_v34, 16  ;;  %v6058_v33 = vld [vmem:[#allocation2 + $0x30] sm:$0xf] }
  0xfd   : > { %v650_v9 = vrot.slane %v649_v62, 4  ;;  %v676_v19 = vrot.slane %v674_v3, 5  ;;  %v682_v20 = vrot.slane %v680_v5, 5  ;;  %v6046_v21 = vld [vmem:[#allocation2 + $0x28] sm:$0xf]  ;;  %v688_v47 = vshll.u32 %v6044_v34, 16 }
  0xfe   : > { %v663_v23 = vor.u32 %v662_v15, %v659_v14  ;;  %v6052_v25 = vld [vmem:[#allocation2 + $0x2c] sm:$0x1]  ;;  %v694_v8 = vshll.u32 %v6050_v24, 16  ;;  %v699_v32 = vshrl.u32 %v6046_v21, 16  ;;  %v687_v11 = vrot.slane %v685_v26, 4 }
  0xff   : > { %v655_v22 = vsel %vm6022_vm10, %v650_v9, %v654_v10  ;;  %v677_v29 = vor.u32 %v676_v19, %v673_v31  ;;  %v690_v52 = vrot.slane %v688_v47, 5  ;;  %v702_v37 = vshll.u32 %v6046_v21, 16  ;;  %v6072_v49 = vld [vmem:[#allocation2 + $0x34] sm:$0x1]  ;;  %v996_v27 = vld [vmem:[#allocation7 + $0x4] sm:$0x3] }
 0x100   : > { %v4408_v28 = vcombine.low %v641_v12, %v655_v22  ;;  %v664_v35 = vrot.slane %v663_v23, 4  ;;  %v869_v39 = vsel %vm767_vm6, %v5944_v6, 0  ;;  %v701_v40 = vrot.slane %v699_v32, 4  ;;  %v5360_v47 = vld [vmem:[#allocation9 + $0x80] sm:$0xff]  }
 0x101   : > { %v678_v38 = vrot.slane %v677_v29, 4  ;;  %v708_v17 = vshll.u32 %v6052_v25, 16  ;;  %v691_v4 = vor.u32 %v690_v52, %v687_v11  ;;  %v704_v42 = vrot.slane %v702_v37, 5  ;;  %v6067_v45 = vld [vmem:[#allocation2 + $0x38] sm:$0xf]  ;;  %4952 = vmatprep.subr.bf16.mxu1 %v5360_v47 }
 0x102   : > { %4816 = vmatprep.mubr.msk.bf16.mxu0 %vm754_vm11, %v4408_v28  ;;  %v669_v18 = vsel %vm6022_vm10, %v664_v35, %v668_v16  ;;  %v713_v36 = vshrl.u32 %v6058_v33, 16  ;;  %v696_v48 = vrot.slane %v694_v8, 5  ;;  %v6074_v13 = vld [vmem:[#allocation2 + $0x3c] sm:$0x1]  ;;  %v716_v6 = vshll.u32 %v6058_v33, 16  ;;  %4953 = vmatpush3.bf16.msra.mxu1 %v5360_v47 }
 0x103   : > { %v683_v46 = vsel %vm6022_vm10, %v678_v38, %v682_v20  ;;  %v692_v51 = vrot.slane %v691_v4, 4  ;;  %v705_v53 = vor.u32 %v704_v42, %v701_v40  ;;  %v722_v57 = vshll.u32 %v6072_v49, 16  ;;  %v936_v28 = vld [vmem:[#allocation2] sm:$0xe]  ;;  %v937_v29 = vld [vmem:[#allocation2 + $0x8] sm:$0xe] }
 0x104   : > { %v4409_v50 = vcombine.low %v669_v18, %v683_v46  ;;  %v715_v54 = vrot.slane %v713_v36, 4  ;;  %v718_v55 = vrot.slane %v716_v6, 5  ;;  %v727_v58 = vshrl.u32 %v6067_v45, 16  ;;  %v939_v38 = vld [vmem:[#allocation2 + $0x18] sm:$0xe] }
 0x105   : > { %v730_v59 = vshll.u32 %v6067_v45, 16  ;;  %v706_v62 = vrot.slane %v705_v53, 4  ;;  %v710_v0 = vrot.slane %v708_v17, 5  ;;  %v736_v31 = vshll.u32 %v6074_v13, 16  ;;  %v940_v18 = vld [vmem:[#allocation2 + $0x20] sm:$0xe] }
 0x106   : > { %4817 = vmatmul.mubr.msk.bf16.vlgmr.msra.gmra.mrb[0].mxu0 %vm754_vm11, %v4409_v50  ;;  %v719_v1 = vor.u32 %v718_v55, %v715_v54  ;;  %v729_v2 = vrot.slane %v727_v58, 4  ;;  %v697_v3 = vsel %vm6022_vm10, %v692_v51, %v696_v48  ;;  %v724_v14 = vrot.slane %v722_v57, 5  ;;  %v942_v53 = vld [vmem:[#allocation2 + $0x30] sm:$0xe]  ;;  %v1344_v57 = vld [vmem:[#allocation7 + $0x8] sm:$0x3] }
 0x107   : > { %4825 = vmatpush3.bf16.msra.mxu0 %v869_v39  ;;  %v732_v12 = vrot.slane %v730_v59, 5  ;;  %v711_v5 = vsel %vm6022_vm10, %v706_v62, %v710_v0  ;;  %v738_v19 = vrot.slane %v736_v31, 5  ;;  %v4416_v26 = vcombine.low %v5948_v7, %v6008_v43  ;;  %v1106_v7 = vld [vmem:[#allocation7 + $0x6] sm:$0x3]  ;;  %v1217_v58 = vld [vmem:[#allocation2 + $0x10] sm:$0xf] }
 0x108   : > { %5266 = vmatprep.subr.msk.bf16.mxu0 %vm767_vm6, %v996_v27  ;;  %v4410_v9 = vcombine.low %v697_v3, %v711_v5  ;;  %v720_v10 = vrot.slane %v719_v1, 4  ;;  %v4417_v8 = vcombine.low %v6030_v60, %v6002_v41  ;;  %v1022_v32 = vsel %vm767_vm6, %v996_v27, 0  ;;  %v1215_v62 = vld [vmem:[#allocation2 + $0x8] sm:$0xf] }
 0x109   : > { %v733_v15 = vor.u32 %v732_v12, %v729_v2  ;;  %v4418_v35 = vcombine.low %v6044_v34, %v6046_v21  ;;  %v965_v43 = vrot.slane %v5959_v30, 5  ;;  %v969_v11 = vrot.slane %v6010_v44, 5  ;;  %v938_v44 = vld [vmem:[#allocation2 + $0x10] sm:$0xe]  ;;  %v941_v34 = vld [vmem:[#allocation2 + $0x28] sm:$0xe] }
 0x10a   : > { %4820 = vmatprep.mubr.msk.bf16.mxu0 %vm754_vm11, %v4410_v9  ;;  %v725_v20 = vsel %vm6022_vm10, %v720_v10, %v724_v14  ;;  %v4424_v52 = vrot.slane %v936_v28, 9  ;;  %v4425_v37 = vrot.slane %v937_v29, 9  ;;  %v4419_v21 = vcombine.low %v6058_v33, %v6067_v45  ;;  %v943_v45 = vld [vmem:[#allocation2 + $0x38] sm:$0xe]  ;;  %v5352_v5 = vld [vmem:[#allocation2 + $0x8] ss:$8 sps:$4 sm:$0xff]  }
 0x10b   : > { %v734_v16 = vrot.slane %v733_v15, 4  ;;  %v973_v39 = vrot.slane %v6032_v61, 5  ;;  %v4426_v17 = vrot.slane %v938_v44, 9  ;;  %v4429_v4 = vrot.slane %v941_v34, 9  ;;  %v1221_v14 = vld [vmem:[#allocation2 + $0x20] sm:$0xf] }
 0x10c   : > { %v966_v60 = vsel %vm6105_vm14, %v4424_v52, %v965_v43  ;;  %v970_v30 = vsel %vm6105_vm14, %v4425_v37, %v969_v11  ;;  %v985_v42 = vrot.slane %v6052_v25, 5  ;;  %v977_v36 = vrot.slane %v6034_v63, 5  ;;  %v6144_v28 = vld [vmem:[#allocation2 + $0xc] sm:$0x1]  ;;  %v6146_v11 = vld [vmem:[#allocation7 + $0xa] sm:$0x3] }
 0x10d   : > { %v739_v22 = vsel %vm6022_vm10, %v734_v16, %v738_v19  ;;  %v4432_v40 = vcombine.low %v966_v60, %v970_v30  ;;  %v4427_v46 = vrot.slane %v939_v38, 9  ;;  %v4428_v48 = vrot.slane %v940_v18, 9  ;;  %v1223_v16 = vld [vmem:[#allocation2 + $0x28] sm:$0xf]  ;;  %v1225_v19 = vld [vmem:[#allocation2 + $0x30] sm:$0xf] }
 0x10e   : > { %v4411_v23 = vcombine.low %v725_v20, %v739_v22  ;;  %v981_v6 = vrot.slane %v6050_v24, 5  ;;  %v974_v33 = vsel %vm6105_vm14, %v4426_v17, %v973_v39  ;;  %v986_v61 = vsel %vm6105_vm14, %v4429_v4, %v985_v42  ;;  %v1219_v20 = vld [vmem:[#allocation2 + $0x18] sm:$0xf]  ;;  %v5354_v30 = vld [vmem:[#allocation2 + $0x28] ss:$8 sps:$4 sm:$0xff]  }
 0x10f   : > { %v978_v50 = vsel %vm6105_vm14, %v4427_v46, %v977_v36  ;;  %v1140_v25 = vsel %vm767_vm6, %v1106_v7, 0  ;;  %v4431_v55 = vrot.slane %v943_v45, 9  ;;  %v993_v24 = vrot.slane %v6074_v13, 5  ;;  %v1227_v17 = vld [vmem:[#allocation2 + $0x38] sm:$0xf] }
 0x110   : > { %4821 = vmatmul.mubr.msk.bf16.gmra.mrb[4].mxu0 %vm754_vm11, %v4411_v23  ;;  %v4433_v51 = vcombine.low %v974_v33, %v978_v50  ;;  %v982_v63 = vsel %vm6105_vm14, %v4428_v48, %v981_v6  ;;  %v4430_v59 = vrot.slane %v942_v53, 9  ;;  %v989_v27 = vrot.slane %v6072_v49, 5  ;;  %v1229_v46 = vld [vmem:[#allocation2 + $0x40] sm:$0xf] }
 0x111   : > { %4826 = vmatprep.mubr.msk.bf16.mxu0 %vm754_vm11, %v4416_v26  ;;  %v4434_v54 = vcombine.low %v982_v63, %v986_v61  ;;  %v994_v0 = vsel %vm6105_vm14, %v4431_v55, %v993_v24  ;;  %v1246_v1 = vshrl.u32 %v1217_v58, 16  ;;  %v1249_v2 = vshll.u32 %v1217_v58, 16  ;;  %v6142_v26 = vld [vmem:[#allocation2 + $0x14] sm:$0x1] }
 0x112   : > { %v990_v13 = vsel %vm6105_vm14, %v4430_v59, %v989_v27  ;;  %v1232_v12 = vshrl.u32 %v1215_v62, 16  ;;  %v1235_v31 = vshll.u32 %v1215_v62, 16  ;;  %v1274_v22 = vshrl.u32 %v1221_v14, 16  ;;  %v6165_v59 = vld [vmem:[#allocation2 + $0x1c] sm:$0x1] }
 0x113   : > { %v4435_v3 = vcombine.low %v990_v13, %v994_v0  ;;  %v1248_v9 = vrot.slane %v1246_v1, 4  ;;  %v1251_v10 = vrot.slane %v1249_v2, 5  ;;  %v1277_v23 = vshll.u32 %v1221_v14, 16 }
 0x114   : > { %v1234_v49 = vrot.slane %v1232_v12, 4  ;;  %v1237_v15 = vrot.slane %v1235_v31, 5  ;;  %v1288_v29 = vshrl.u32 %v1223_v16, 16  ;;  %v1260_v52 = vshrl.u32 %v1219_v20, 16  ;;  %v5355_v12 = vld [vmem:[#allocation2 + $0x38] ss:$8 sps:$4 sm:$0xff]  }
 0x115   : > { %v1252_v47 = vor.u32 %v1251_v10, %v1248_v9  ;;  %v1263_v37 = vshll.u32 %v1219_v20, 16  ;;  %v1370_v60 = vsel %vm767_vm6, %v1344_v57, 0  ;;  %v1255_v44 = vshll.u32 %v6142_v26, 16 }
 0x116   : > { %v1238_v43 = vor.u32 %v1237_v15, %v1234_v49  ;;  %v1276_v34 = vrot.slane %v1274_v22, 4  ;;  %v1241_v38 = vshll.u32 %v6144_v28, 16  ;;  %v1290_v18 = vrot.slane %v1288_v29, 4 }
 0x117   : > { %v1253_v39 = vrot.slane %v1252_v47, 4  ;;  %v1262_v6 = vrot.slane %v1260_v52, 4  ;;  %v1265_v33 = vrot.slane %v1263_v37, 5  ;;  %v1257_v45 = vrot.slane %v1255_v44, 5  ;;  %v392_v47 = vld [vmem:[#allocation3 + $0x1c] sm:$0x1] }
 0x118   : > { %4827 = vmatmul.mubr.msk.bf16.vlgmr.msra.gmra.mrb[0].mxu0 %vm754_vm11, %v4417_v8  ;;  %v1291_v8 = vshll.u32 %v1223_v16, 16  ;;  %v1239_v48 = vrot.slane %v1238_v43, 4  ;;  %v1319_v63 = vshll.u32 %v1227_v17, 16  ;;  %v1243_v53 = vrot.slane %v1241_v38, 5  ;;  %v6189_v43 = vld [vmem:[#allocation2 + $0x44] sm:$0x1] }
 0x119   : > { %4835 = vmatpush3.bf16.msra.mxu0 %v1022_v32  ;;  %4830 = vmatprep.mubr.msk.bf16.mxu0 %vm754_vm11, %v4418_v35  ;;  %v1302_v32 = vshrl.u32 %v1225_v19, 16  ;;  %v1305_v35 = vshll.u32 %v1225_v19, 16  ;;  %v1330_v24 = vshrl.u32 %v1229_v46, 16  ;;  %v1258_v58 = vsel %vm6022_vm10, %v1253_v39, %v1257_v45 }
 0x11a   : > { %5267 = vmatprep.subr.msk.bf16.mxu0 %vm767_vm6, %v1106_v7  ;;  %v5353_v7 = vld [vmem:[#allocation2 + $0x18] ss:$8 sps:$4 sm:$0xff]   ;;  %v1293_v4 = vrot.slane %v1291_v8, 5  ;;  %v1244_v0 = vsel %vm6022_vm10, %v1239_v48, %v1243_v53  ;;  %v1266_v1 = vor.u32 %v1265_v33, %v1262_v6  ;;  %v1269_v2 = vshll.u32 %v6165_v59, 16  ;;  %v1445_v33 = vld [vmem:[#allocation2 + $0x8] sm:$0xe] }
 0x11b   : > { %v1304_v42 = vrot.slane %v1302_v32, 4  ;;  %v1307_v36 = vrot.slane %v1305_v35, 5  ;;  %v1321_v9 = vrot.slane %v1319_v63, 5  ;;  %v4448_v14 = vcombine.low %v1244_v0, %v1258_v58 }
 0x11c   : > { %v1294_v27 = vor.u32 %v1293_v4, %v1290_v18  ;;  %v1332_v15 = vrot.slane %v1330_v24, 4  ;;  %v1267_v29 = vrot.slane %v1266_v1, 4  ;;  %v1271_v8 = vrot.slane %v1269_v2, 5  ;;  %v1448_v24 = vld [vmem:[#allocation2 + $0x20] sm:$0xe] }
 0x11d   : > { %v1308_v62 = vor.u32 %v1307_v36, %v1304_v42  ;;  %v393_v44 = vsel %vm6179_vm1, 0, %v392_v47  ;;  %v1528_v4 = vsel %vm767_vm6, %v6146_v11, 0  ;;  %v1613_v42 = vld [vmem:[#allocation7 + $0xc] sm:$0x3]  ;;  %v1475_v45 = vrot.slane %v6142_v26, 5 }
 0x11e   : > { %v1295_v20 = vrot.slane %v1294_v27, 4  ;;  %394 = vst [vmem:[#allocation3 + $0x1c] sm:$0x1] %v393_v44  ;;  %v1272_v38 = vsel %vm6022_vm10, %v1267_v29, %v1271_v8  ;;  %v1471_v63 = vrot.slane %v6144_v28, 5  ;;  %v1449_v26 = vld [vmem:[#allocation2 + $0x28] sm:$0xe] }
 0x11f   : > { %v1309_v22 = vrot.slane %v1308_v62, 4  ;;  %v1447_v62 = vld [vmem:[#allocation2 + $0x18] sm:$0xe]  ;;  %v4459_v0 = vrot.slane %v1448_v24, 9  ;;  %v4460_v2 = vrot.slane %v1449_v26, 9  ;;  %v1499_v47 = vrot.slane %v6189_v43, 5 }
 0x120   : > { %4831 = vmatmul.mubr.msk.bf16.gmra.mrb[4].mxu0 %vm754_vm11, %v4419_v21  ;;  %v1279_v21 = vrot.slane %v1277_v23, 5  ;;  %v361_v23 = vld [vmem:[#allocation3 + $0x18] sm:$0x1]  ;;  %v1851_v29 = vld [vmem:[#allocation7 + $0xe] sm:$0x3] }
 0x121   : > { %4836 = vmatprep.mubr.msk.bf16.mxu0 %vm754_vm11, %v4432_v40  ;;  %v6151_v40 = vld [vmem:[#allocation2 + $0x24] sm:$0x1]  ;;  %v1722_v8 = vld [vmem:[#allocation2 + $0x10] sm:$0xf]  ;;  %v1736_v24 = vld [vmem:[#allocation2 + $0x48] sm:$0xf] }
 0x122   : > { %v1283_v61 = vshll.u32 %v6151_v40, 16  ;;  %v1280_v50 = vor.u32 %v1279_v21, %v1276_v34  ;;  %v1483_v1 = vrot.slane %v6151_v40, 5  ;;  %v5356_v44 = vld [vmem:[#allocation2 + $0x10] ss:$8 sps:$4 sm:$0xff]   ;;  %v5357_v26 = vld [vmem:[#allocation2 + $0x20] ss:$8 sps:$4 sm:$0xff]  }
 0x124   : > { %v1285_v13 = vrot.slane %v1283_v61, 5  ;;  %v1281_v31 = vrot.slane %v1280_v50, 4 }
 0x126   : > { %v1286_v32 = vsel %vm6022_vm10, %v1281_v31, %v1285_v13 }
 0x127   : > { %v4449_v18 = vcombine.low %v1272_v38, %v1286_v32  ;;  %v1724_v32 = vld [vmem:[#allocation2 + $0x18] sm:$0xf]  ;;  %v1728_v38 = vld [vmem:[#allocation2 + $0x28] sm:$0xf] }
 0x128   : > { %4837 = vmatmul.mubr.msk.bf16.vlgmr.msra.gmra.mrb[0].mxu0 %vm754_vm11, %v4433_v51  ;;  %v6158_v51 = vld [vmem:[#allocation2 + $0x34] sm:$0x1] }
 0x129   : > { %4845 = vmatpush3.bf16.msra.mxu0 %v1140_v25  ;;  %4840 = vmatprep.mubr.msk.bf16.mxu0 %vm754_vm11, %v4434_v54  ;;  %v1316_v25 = vshrl.u32 %v1227_v17, 16  ;;  %v6160_v54 = vld [vmem:[#allocation2 + $0x2c] sm:$0x1]  ;;  %v1311_v55 = vshll.u32 %v6158_v51, 16  ;;  %v1446_v17 = vld [vmem:[#allocation2 + $0x10] sm:$0xe] }
 0x12a   : > { %5268 = vmatprep.subr.msk.bf16.mxu0 %vm767_vm6, %v1344_v57  ;;  %v1333_v57 = vshll.u32 %v1229_v46, 16  ;;  %v4457_v61 = vrot.slane %v1446_v17, 9  ;;  %v1487_v13 = vrot.slane %v6160_v54, 5  ;;  %v1491_v31 = vrot.slane %v6158_v51, 5 }
 0x12b   : > { %v1313_v49 = vrot.slane %v1311_v55, 5 }
 0x12c   : > { %v1335_v16 = vrot.slane %v1333_v57, 5  ;;  %v1476_v55 = vsel %vm6105_vm14, %v4457_v61, %v1475_v45  ;;  %v1450_v57 = vld [vmem:[#allocation2 + $0x30] sm:$0xe]  ;;  %v1488_v40 = vsel %vm6105_vm14, %v4460_v2, %v1487_v13  ;;  %v6247_v61 = vld [vmem:[#allocation2 + $0x1c] sm:$0x1] }
 0x12d   : > { %v1314_v21 = vsel %vm6022_vm10, %v1309_v22, %v1313_v49 }
 0x12e   : > { %v1336_v37 = vor.u32 %v1335_v16, %v1332_v15  ;;  %v1452_v15 = vld [vmem:[#allocation2 + $0x40] sm:$0xe]  ;;  %v1647_v16 = vsel %vm767_vm6, %v1613_v42, 0 }
 0x130   : > { %4841 = vmatmul.mubr.msk.bf16.gmra.mrb[4].mxu0 %vm754_vm11, %v4435_v3  ;;  %v1297_v3 = vshll.u32 %v6160_v54, 16  ;;  %v1337_v48 = vrot.slane %v1336_v37, 4  ;;  %v1742_v37 = vshll.u32 %v1722_v8, 16 }
 0x131   : > { %4846 = vmatprep.mubr.msk.bf16.mxu0 %vm754_vm11, %v5352_v5  ;;  %v1318_v5 = vrot.slane %v1316_v25, 4  ;;  %v4456_v25 = vrot.slane %v1445_v33, 9  ;;  %v1877_v33 = vsel %vm767_vm6, %v1851_v29, 0 }
 0x132   : > { %v1299_v35 = vrot.slane %v1297_v3, 5  ;;  %v4458_v3 = vrot.slane %v1447_v62, 9 }
 0x133   : > { %v1322_v52 = vor.u32 %v1321_v9, %v1318_v5  ;;  %v1472_v27 = vsel %vm6105_vm14, %v4456_v25, %v1471_v63  ;;  %v1479_v5 = vrot.slane %v6165_v59, 5  ;;  %v1484_v9 = vsel %vm6105_vm14, %v4459_v0, %v1483_v1  ;;  %v2009_v1 = vld [vmem:[#allocation7 + $0x10] sm:$0x3] }
 0x134   : > { %v1300_v34 = vsel %vm6022_vm10, %v1295_v20, %v1299_v35  ;;  %v4464_v28 = vcombine.low %v1472_v27, %v1476_v55 }
 0x135   : > { %v4450_v36 = vcombine.low %v1300_v34, %v1314_v21  ;;  %v1323_v46 = vrot.slane %v1322_v52, 4  ;;  %v1480_v54 = vsel %vm6105_vm14, %v4458_v3, %v1479_v5  ;;  %v1744_v21 = vrot.slane %v1742_v37, 5 }
 0x136   : > { %v4465_v51 = vcombine.low %v1480_v54, %v1484_v9  ;;  %v1837_v3 = vshrl.u32 %v1736_v24, 16 }
 0x138   : > { %4847 = vmatmul.mubr.msk.bf16.vlgmr.msra.gmra.mrb[0].mxu0 %vm754_vm11, %v5353_v7  ;;  %v6187_v7 = vld [vmem:[#allocation2 + $0x3c] sm:$0x1] }
 0x139   : > { %4855 = vmatpush3.bf16.msra.mxu0 %v1370_v60  ;;  %4850 = vmatprep.mubr.msk.bf16.mxu0 %vm754_vm11, %v5354_v30  ;;  %v1339_v60 = vshll.u32 %v6189_v43, 16  ;;  %v362_v30 = vsel %vm6173_vm0, 0, %v361_v23  ;;  %v1325_v39 = vshll.u32 %v6187_v7, 16  ;;  %v1495_v59 = vrot.slane %v6187_v7, 5 }
 0x13a   : > { %5269 = vmatprep.subr.msk.bf16.mxu0 %vm767_vm6, %v6146_v11  ;;  %363 = vst [vmem:[#allocation3 + $0x18] sm:$0x1] %v362_v30  ;;  %v4463_v23 = vrot.slane %v1452_v15, 9  ;;  %v1739_v7 = vshrl.u32 %v1722_v8, 16  ;;  %v1756_v43 = vshll.u32 %v1724_v32, 16 }
 0x13b   : > { %v1341_v6 = vrot.slane %v1339_v60, 5  ;;  %v1327_v50 = vrot.slane %v1325_v39, 5  ;;  %v1753_v60 = vshrl.u32 %v1724_v32, 16  ;;  %v6244_v39 = vld [vmem:[#allocation2 + $0x14] sm:$0x1] }
 0x13c   : > { %v1500_v52 = vsel %vm6105_vm14, %v4463_v23, %v1499_v47  ;;  %v1741_v34 = vrot.slane %v1739_v7, 4  ;;  %v1748_v45 = vshll.u32 %v6244_v39, 16  ;;  %v6256_v15 = vld [vmem:[#allocation2 + $0x2c] sm:$0x1]  ;;  %v1840_v47 = vshll.u32 %v1736_v24, 16 }
 0x13d   : > { %v1328_v11 = vsel %vm6022_vm10, %v1323_v46, %v1327_v50  ;;  %v1342_v53 = vsel %vm6022_vm10, %v1337_v48, %v1341_v6  ;;  %v1755_v17 = vrot.slane %v1753_v60, 4  ;;  %v1784_v46 = vshll.u32 %v1728_v38, 16  ;;  %v1730_v6 = vld [vmem:[#allocation2 + $0x30] sm:$0xf]  ;;  %v6263_v8 = vld [vmem:[#allocation2 + $0x34] sm:$0x1] }
 0x13e   : > { %v4451_v58 = vcombine.low %v1328_v11, %v1342_v53  ;;  %v1745_v48 = vor.u32 %v1744_v21, %v1741_v34  ;;  %v1762_v11 = vshll.u32 %v6247_v61, 16  ;;  %v1795_v27 = vshrl.u32 %v1730_v6, 16  ;;  %v5359_v60 = vld [vmem:[#allocation2 + $0x40] ss:$8 sps:$4 sm:$0xff]  }
 0x13f   : > { %v1798_v62 = vshll.u32 %v1730_v6, 16  ;;  %v1750_v2 = vrot.slane %v1748_v45, 5  ;;  %v1790_v7 = vshll.u32 %v6256_v15, 16  ;;  %v1804_v37 = vshll.u32 %v6263_v8, 16 }
 0x140   : > { %4851 = vmatmul.mubr.msk.bf16.gmra.mrb[4].mxu0 %vm754_vm11, %v5355_v12  ;;  %v4461_v12 = vrot.slane %v1450_v57, 9  ;;  %v1746_v0 = vrot.slane %v1745_v48, 4  ;;  %v1764_v9 = vrot.slane %v1762_v11, 5  ;;  %v6272_v48 = vld [vmem:[#allocation2 + $0x44] sm:$0x1] }
 0x141   : > { %4856 = vmatprep.mubr.msk.bf16.mxu0 %vm754_vm11, %v4448_v14  ;;  %v1451_v14 = vld [vmem:[#allocation2 + $0x38] sm:$0xe] }
 0x142   : > { %v1492_v49 = vsel %vm6105_vm14, %v4461_v12, %v1491_v31  ;;  %v4462_v20 = vrot.slane %v1451_v14, 9  ;;  %v1734_v31 = vld [vmem:[#allocation2 + $0x40] sm:$0xf] }
 0x143   : > { %v4466_v22 = vcombine.low %v1488_v40, %v1492_v49  ;;  %v6254_v49 = vld [vmem:[#allocation2 + $0x24] sm:$0x1]  ;;  %v1826_v23 = vshll.u32 %v1734_v31, 16 }
 0x144   : > { %v1496_v35 = vsel %vm6105_vm14, %v4462_v20, %v1495_v59  ;;  %v1751_v20 = vsel %vm6022_vm10, %v1746_v0, %v1750_v2  ;;  %v1823_v59 = vshrl.u32 %v1734_v31, 16  ;;  %v1953_v31 = vld [vmem:[#allocation2 + $0x18] sm:$0xe] }
 0x145   : > { %v4467_v30 = vcombine.low %v1496_v35, %v1500_v52 }
 0x146   : > { %v1825_v21 = vrot.slane %v1823_v59, 4  ;;  %v1954_v59 = vld [vmem:[#allocation2 + $0x20] sm:$0xe] }
 0x148   : > { %4857 = vmatmul.mubr.msk.bf16.vlgmr.msra.gmra.mrb[0].mxu0 %vm754_vm11, %v4449_v18  ;;  %v1758_v18 = vrot.slane %v1756_v43, 5 }
 0x149   : > { %4865 = vmatpush3.bf16.msra.mxu0 %v1528_v4  ;;  %4860 = vmatprep.mubr.msk.bf16.mxu0 %vm754_vm11, %v4450_v36  ;;  %v1732_v4 = vld [vmem:[#allocation2 + $0x38] sm:$0xf]  ;;  %v1781_v36 = vshrl.u32 %v1728_v38, 16  ;;  %v1828_v38 = vrot.slane %v1826_v23, 5 }
 0x14a   : > { %5270 = vmatprep.subr.msk.bf16.mxu0 %vm767_vm6, %v1613_v42  ;;  %v1726_v42 = vld [vmem:[#allocation2 + $0x20] sm:$0xf]  ;;  %v1809_v50 = vshrl.u32 %v1732_v4, 16  ;;  %v1812_v25 = vshll.u32 %v1732_v4, 16  ;;  %v1759_v63 = vor.u32 %v1758_v18, %v1755_v17  ;;  %v1839_v17 = vrot.slane %v1837_v3, 4 }
 0x14b   : > { %v1767_v53 = vshrl.u32 %v1726_v42, 16  ;;  %v1770_v55 = vshll.u32 %v1726_v42, 16  ;;  %v1783_v57 = vrot.slane %v1781_v36, 4  ;;  %v1842_v18 = vrot.slane %v1840_v47, 5 }
 0x14c   : > { %v1811_v13 = vrot.slane %v1809_v50, 4  ;;  %v1814_v12 = vrot.slane %v1812_v25, 5  ;;  %v1760_v5 = vrot.slane %v1759_v63, 4  ;;  %v1737_v50 = vld [vmem:[#allocation2 + $0x4c] sm:$0x1]  ;;  %v1832_v25 = vshll.u32 %v6272_v48, 16 }
 0x14d   : > { %v1769_v14 = vrot.slane %v1767_v53, 4  ;;  %v1772_v40 = vrot.slane %v1770_v55, 5  ;;  %v1829_v11 = vor.u32 %v1828_v38, %v1825_v21  ;;  %v1843_v53 = vor.u32 %v1842_v18, %v1839_v17 }
 0x14e   : > { %v1815_v32 = vor.u32 %v1814_v12, %v1811_v13  ;;  %v1765_v35 = vsel %vm6022_vm10, %v1760_v5, %v1764_v9  ;;  %v1846_v55 = vshll.u32 %v1737_v50, 16  ;;  %v1978_v5 = vrot.slane %v6244_v39, 5 }
 0x14f   : > { %v1773_v52 = vor.u32 %v1772_v40, %v1769_v14  ;;  %v4480_v43 = vcombine.low %v1751_v20, %v1765_v35  ;;  %v1830_v2 = vrot.slane %v1829_v11, 4  ;;  %v1844_v13 = vrot.slane %v1843_v53, 4  ;;  %v358_v11 = vld [vmem:[#allocation3 + $0x10] sm:$0x1] }
 0x150   : > { %4861 = vmatmul.mubr.msk.bf16.gmra.mrb[4].mxu0 %vm754_vm11, %v4451_v58  ;;  %v1786_v58 = vrot.slane %v1784_v46, 5  ;;  %v1816_v4 = vrot.slane %v1815_v32, 4  ;;  %v1792_v46 = vrot.slane %v1790_v7, 5  ;;  %v1848_v12 = vrot.slane %v1846_v55, 5 }
 0x151   : > { %4866 = vmatprep.mubr.msk.bf16.mxu0 %vm754_vm11, %v4464_v28  ;;  %v5358_v28 = vld [vmem:[#allocation2 + $0x30] ss:$8 sps:$4 sm:$0xff]   ;;  %v1774_v42 = vrot.slane %v1773_v52, 4  ;;  %v4489_v9 = vrot.slane %v1953_v31, 9  ;;  %v4490_v52 = vrot.slane %v1954_v59, 9  ;;  %v1986_v7 = vrot.slane %v6254_v49, 5 }
 0x152   : > { %v1787_v54 = vor.u32 %v1786_v58, %v1783_v57  ;;  %v1952_v57 = vld [vmem:[#allocation2 + $0x10] sm:$0xe]  ;;  %v1849_v40 = vsel %vm6022_vm10, %v1844_v13, %v1848_v12  ;;  %v2002_v17 = vrot.slane %v6272_v48, 5  ;;  %v2006_v18 = vrot.slane %v1737_v50, 5  ;;  %v364_v50 = vld [vmem:[#allocation3 + $0x20] sm:$0x1] }
 0x153   : > { %v4488_v3 = vrot.slane %v1952_v57, 9  ;;  %v359_v55 = vsel %vm6173_vm0, 0, %v358_v11  ;;  %v5363_v57 = vld [vmem:[#allocation9 + $0x90] sm:$0xff]   ;;  %v367_v13 = vld [vmem:[#allocation3 + $0x28] sm:$0x1] }
 0x154   : > { %360 = vst [vmem:[#allocation3 + $0x10] sm:$0x1] %v359_v55  ;;  %v398_v12 = vld [vmem:[#allocation3 + $0x2c] sm:$0x1]  ;;  %v368_v31 = vsel %vm6173_vm0, 0, %v367_v13  ;;  %v5367_v59 = vld [vmem:[#allocation9 + $0xa0] sm:$0xff]  }
 0x155   : > { %369 = vst [vmem:[#allocation3 + $0x28] sm:$0x1] %v368_v31  ;;  %v6375_v11 = vld [vmem:[#allocation3] sm:$0xe] }
 0x158   : > { %4867 = vmatmul.mubr.msk.bf16.vlgmr.msra.gmra.mrb[0].mxu0 %vm754_vm11, %v4465_v51  ;;  %v1797_v51 = vrot.slane %v1795_v27, 4  ;;  %v2035_v27 = vsel %vm767_vm6, %v2009_v1, 0 }
 0x159   : > { %4875 = vmatpush3.bf16.msra.mxu0 %v1647_v16  ;;  %4870 = vmatprep.mubr.msk.bf16.mxu0 %vm754_vm11, %v4466_v22  ;;  %v1800_v16 = vrot.slane %v1798_v62, 5  ;;  %v6260_v22 = vld [vmem:[#allocation2 + $0x3c] sm:$0x1] }
 0x15a   : > { %5271 = vmatprep.subr.msk.bf16.mxu0 %vm767_vm6, %v1851_v29  ;;  %v1776_v29 = vshll.u32 %v6254_v49, 16  ;;  %v1818_v34 = vshll.u32 %v6260_v22, 16  ;;  %v1998_v35 = vrot.slane %v6260_v22, 5 }
 0x15c   : > { %v1778_v36 = vrot.slane %v1776_v29, 5  ;;  %v1820_v45 = vrot.slane %v1818_v34, 5  ;;  %v1956_v29 = vld [vmem:[#allocation2 + $0x30] sm:$0xe]  ;;  %v1987_v34 = vsel %vm6105_vm14, %v4490_v52, %v1986_v7  ;;  %v383_v52 = vld [vmem:[#allocation3 + $0x4] sm:$0x1] }
 0x15d   : > { %v384_v7 = vsel %vm6179_vm1, 0, %v383_v52 }
 0x15e   : > { %v1821_v24 = vsel %vm6022_vm10, %v1816_v4, %v1820_v45  ;;  %v5361_v45 = vld [vmem:[#allocation9 + $0x88] sm:$0xff]   ;;  %385 = vst [vmem:[#allocation3 + $0x4] sm:$0x1] %v384_v7 }
 0x15f   : > { %4954 = vmatprep.subr.bf16.mxu1 %v5361_v45 }
 0x160   : > { %4871 = vmatmul.mubr.msk.bf16.gmra.mrb[4].mxu0 %vm754_vm11, %v4467_v30  ;;  %v1788_v30 = vrot.slane %v1787_v54, 4  ;;  %v1979_v54 = vsel %vm6105_vm14, %v4488_v3, %v1978_v5  ;;  %4955 = vmatpush3.bf16.msra.mxu1 %v5361_v45  ;;  %v399_v3 = vsel %vm6179_vm1, 0, %v398_v12  ;;  %v5365_v5 = vld [vmem:[#allocation9 + $0x98] sm:$0xff]  }
 0x161   : > { %4876 = vmatprep.mubr.msk.bf16.mxu0 %vm754_vm11, %v5356_v44  ;;  %v1801_v44 = vor.u32 %v1800_v16, %v1797_v51  ;;  %v1955_v51 = vld [vmem:[#allocation2 + $0x28] sm:$0xe]  ;;  %v1957_v16 = vld [vmem:[#allocation2 + $0x38] sm:$0xe]  ;;  %4956 = vmatprep.subr.bf16.mxu1 %v5363_v57  ;;  %400 = vst [vmem:[#allocation3 + $0x2c] sm:$0x1] %v399_v3 }
 0x162   : > { %v1793_v63 = vsel %vm6022_vm10, %v1788_v30, %v1792_v46  ;;  %v4491_v47 = vrot.slane %v1955_v51, 9  ;;  %v4493_v32 = vrot.slane %v1957_v16, 9  ;;  %v1958_v30 = vld [vmem:[#allocation2 + $0x40] sm:$0xe]  ;;  %v355_v46 = vld [vmem:[#allocation3 + $0x8] sm:$0x1] }
 0x163   : > { %v1802_v6 = vrot.slane %v1801_v44, 4  ;;  %v1959_v44 = vld [vmem:[#allocation2 + $0x48] sm:$0xe]  ;;  %v4494_v38 = vrot.slane %v1958_v30, 9  ;;  %v356_v48 = vsel %vm6173_vm0, 0, %v355_v46  ;;  %v6350_v30 = vld [vmem:[#allocation9 + $0xc0] sm:$0xff]  }
 0x164   : > { %357 = vst [vmem:[#allocation3 + $0x8] sm:$0x1] %v356_v48  ;;  %4957 = vmatpush3.bf16.msra.mxu1 %v5363_v57  ;;  %v401_v51 = vld [vmem:[#allocation3 + $0x34] sm:$0x1]  ;;  %v2260_v3 = vld [vmem:[#allocation3 + $0x18] sm:$0xf] }
 0x165   : > { %v2003_v4 = vsel %vm6105_vm14, %v4494_v38, %v2002_v17  ;;  %4958 = vmatprep.subr.bf16.mxu1 %v5365_v5  ;;  %v5366_v16 = vld [vmem:[#allocation9 + $0x50] sm:$0xff]  }
 0x168   : > { %4877 = vmatmul.mubr.msk.bf16.vlgmr.msra.gmra.mrb[0].mxu0 %vm754_vm11, %v5357_v26  ;;  %v1779_v26 = vsel %vm6022_vm10, %v1774_v42, %v1778_v36  ;;  %4959 = vmatpush3.bf16.msra.mxu1 %v5365_v5  ;;  %v2263_v5 = vld [vmem:[#allocation3 + $0x1c] sm:$0x1] }
 0x169   : > { %4885 = vmatpush3.bf16.msra.mxu0 %v1877_v33  ;;  %4880 = vmatprep.mubr.msk.bf16.mxu0 %vm754_vm11, %v5358_v28  ;;  %v1806_v33 = vrot.slane %v1804_v37, 5  ;;  %v4481_v58 = vcombine.low %v1779_v26, %v1793_v63  ;;  %v1834_v28 = vrot.slane %v1832_v25, 5  ;;  %v4492_v37 = vrot.slane %v1956_v29, 9  ;;  %v395_v63 = vld [vmem:[#allocation3 + $0x24] sm:$0x1] }
 0x16a   : > { %5272 = vmatprep.subr.msk.bf16.mxu0 %vm767_vm6, %v2009_v1  ;;  %v1982_v1 = vrot.slane %v6247_v61, 5  ;;  %v1990_v61 = vrot.slane %v6256_v15, 5  ;;  %v1999_v15 = vsel %vm6105_vm14, %v4493_v32, %v1998_v35  ;;  %v365_v25 = vsel %vm6173_vm0, 0, %v364_v50  ;;  %v5362_v26 = vld [vmem:[#allocation9 + $0x40] sm:$0xff]   ;;  %4960 = vmatprep.subr.bf16.mxu1 %v5367_v59  ;;  %v5371_v35 = vld [vmem:[#allocation9 + $0xb0] sm:$0xff]  }
 0x16b   : > { %v1807_v62 = vsel %vm6022_vm10, %v1802_v6, %v1806_v33  ;;  %v1835_v14 = vsel %vm6022_vm10, %v1830_v2, %v1834_v28  ;;  %v386_v6 = vld [vmem:[#allocation3 + $0xc] sm:$0x1]  ;;  %366 = vst [vmem:[#allocation3 + $0x20] sm:$0x1] %v365_v25  ;;  %v396_v53 = vsel %vm6179_vm1, 0, %v395_v63  ;;  %v5370_v29 = vld [vmem:[#allocation9 + $0x60] sm:$0xff]  }
 0x16c   : > { %v4482_v0 = vcombine.low %v1807_v62, %v1821_v24  ;;  %v4483_v20 = vcombine.low %v1835_v14, %v1849_v40  ;;  %v1983_v39 = vsel %vm6105_vm14, %v4489_v9, %v1982_v1  ;;  %v387_v33 = vsel %vm6179_vm1, 0, %v386_v6  ;;  %v389_v24 = vld [vmem:[#allocation3 + $0x14] sm:$0x1]  ;;  %397 = vst [vmem:[#allocation3 + $0x24] sm:$0x1] %v396_v53  ;;  %4961 = vmatpush3.bf16.msra.mxu1 %v5367_v59 }
 0x16d   : > { %v4496_v23 = vcombine.low %v1979_v54, %v1983_v39  ;;  %388 = vst [vmem:[#allocation3 + $0xc] sm:$0x1] %v387_v33  ;;  %v373_v62 = vld [vmem:[#allocation3 + $0x38] sm:$0x1]  ;;  %v404_v28 = vld [vmem:[#allocation3 + $0x3c] sm:$0x1] }
 0x16e   : > { %v405_v2 = vsel %vm6179_vm1, 0, %v404_v28  ;;  %v376_v9 = vld [vmem:[#allocation3 + $0x40] sm:$0x1]  ;;  %v407_v14 = vld [vmem:[#allocation3 + $0x44] sm:$0x1]  ;;  %v402_v39 = vsel %vm6179_vm1, 0, %v401_v51 }
 0x16f   : > { %406 = vst [vmem:[#allocation3 + $0x3c] sm:$0x1] %v405_v2  ;;  %v377_v1 = vsel %vm6173_vm0, 0, %v376_v9  ;;  %v408_v40 = vsel %vm6179_vm1, 0, %v407_v14  ;;  %v370_v54 = vld [vmem:[#allocation3 + $0x30] sm:$0x1] }
 0x170   : > { %4881 = vmatmul.mubr.msk.bf16.gmra.mrb[4].mxu0 %vm754_vm11, %v5359_v60  ;;  %v1994_v60 = vrot.slane %v6263_v8, 5  ;;  %v4495_v8 = vrot.slane %v1959_v44, 9  ;;  %378 = vst [vmem:[#allocation3 + $0x40] sm:$0x1] %v377_v1  ;;  %409 = vst [vmem:[#allocation3 + $0x44] sm:$0x1] %v408_v40 }
 0x171   : > { %4886 = vmatprep.mubr.msk.bf16.mxu0 %vm754_vm11, %v4480_v43  ;;  %v1991_v43 = vsel %vm6105_vm14, %v4491_v47, %v1990_v61  ;;  %v5369_v47 = vld [vmem:[#allocation9 + $0xa8] sm:$0xff]   ;;  %403 = vst [vmem:[#allocation3 + $0x34] sm:$0x1] %v402_v39  ;;  %v352_v61 = vld [vmem:[#allocation3] sm:$0x1]  ;;  %v6353_v44 = vld [vmem:[#allocation9] sm:$0xff]  }
 0x172   : > { %v4497_v22 = vcombine.low %v1987_v34, %v1991_v43  ;;  %v1995_v21 = vsel %vm6105_vm14, %v4492_v37, %v1994_v60  ;;  %v2007_v42 = vsel %vm6105_vm14, %v4495_v8, %v2006_v18  ;;  %v353_v32 = vsel %vm6173_vm0, 0, %v352_v61  ;;  %4962 = vmatprep.subr.bf16.mxu1 %v5369_v47  ;;  %v5372_v37 = vld [vmem:[#allocation9 + $0x68] sm:$0xff]   ;;  %v5373_v60 = vld [vmem:[#allocation9 + $0xb8] sm:$0xff]   ;;  %v5374_v43 = vld [vmem:[#allocation9 + $0x70] sm:$0xff]  }
 0x173   : > { %v4498_v49 = vcombine.low %v1995_v21, %v1999_v15  ;;  %v4499_v36 = vcombine.low %v2003_v4, %v2007_v42  ;;  %354 = vst [vmem:[#allocation3] sm:$0x1] %v353_v32  ;;  %4963 = vmatpush3.bf16.msra.mxu1 %v5369_v47  ;;  %v5376_v15 = vld [vmem:[#allocation9 + $0x78] sm:$0xff]   ;;  %v379_v34 = vld [vmem:[#allocation3 + $0x48] sm:$0x1] }
 0x174   : > { %4964 = vmatprep.subr.bf16.mxu1 %v5371_v35  ;;  %v380_v21 = vsel %vm6173_vm0, 0, %v379_v34  ;;  %v6367_v18 = vld [vmem:[%s6795_s2] ss:$0 sm:$0xff]  ;;  %v6371_v33 = vld [vmem:[#allocation3 + $0x4] sm:$0x1] }
 0x175   : > { %381 = vst [vmem:[#allocation3 + $0x48] sm:$0x1] %v380_v21  ;;  %v2338_v63 = vshll.u32 %v6371_v33, 16  ;;  %v2749_v28 = vrot.slane %v6371_v33, 5  ;;  %v2248_v51 = vld [vmem:[#allocation3 + $0x8] sm:$0xf] }
 0x176   : > { %v2251_v61 = vld [vmem:[#allocation3 + $0xc] sm:$0x1] }
 0x177   : > { %4965 = vmatpush3.bf16.msra.mxu1 %v5371_v35  ;;  %v6380_v13 = vrot.slane %v2338_v63, 5 }
 0x178   : > { %4887 = vmatmul.mubr.msk.bf16.vlgmr.msra.gmra.mrb[0].mxu0 %vm754_vm11, %v4481_v58  ;;  %v390_v58 = vsel %vm6179_vm1, 0, %v389_v24  ;;  %4966 = vmatprep.subr.bf16.mxu1 %v5373_v60 }
 0x179   : > { %4895 = vmatpush3.bf16.msra.mxu0 %v2035_v27  ;;  %4890 = vmatprep.mubr.msk.bf16.mxu0 %vm754_vm11, %v4482_v0  ;;  %v5364_v27 = vld [vmem:[#allocation9 + $0x48] sm:$0xff]   ;;  %391 = vst [vmem:[#allocation3 + $0x14] sm:$0x1] %v390_v58  ;;  %v374_v0 = vsel %vm6173_vm0, 0, %v373_v62  ;;  %v4537_v62 = vrot.slane %v6375_v11, 9 }
 0x17a   : > { %4904 = vmatprep.subr.bf16.mxu0 %v5362_v26  ;;  %375 = vst [vmem:[#allocation3 + $0x38] sm:$0x1] %v374_v0 }
 0x17b   : > { %4967 = vmatpush3.bf16.msra.mxu1 %v5373_v60 }
 0x17c   : > { %4976 = vmatprep.subr.bf16.mxu1 %v6350_v30 }
 0x180   : > { %4891 = vmatmul.mubr.msk.bf16.gmra.mrb[4].mxu0 %vm754_vm11, %v4483_v20  ;;  %v371_v20 = vsel %vm6173_vm0, 0, %v370_v54 }
 0x181   : > { %4896 = vmatprep.mubr.msk.bf16.mxu0 %vm754_vm11, %v4496_v23  ;;  %v5368_v23 = vld [vmem:[#allocation9 + $0x58] sm:$0xff]   ;;  %372 = vst [vmem:[#allocation3 + $0x30] sm:$0x1] %v371_v20 }
 0x188   : > { %4897 = vmatmul.mubr.msk.bf16.vlgmr.msra.gmra.mrb[0].mxu0 %vm754_vm11, %v4497_v22  ;;  %v410_v22 = vld [vmem:[#allocation3 + $0x4c] sm:$0x1] }
 0x189   : > { %4900 = vmatprep.mubr.msk.bf16.mxu0 %vm754_vm11, %v4498_v49  ;;  %4905 = vmatpush3.bf16.msra.mxu0 %v5362_v26  ;;  %v411_v38 = vsel %vm6179_vm1, 0, %v410_v22  ;;  %v6360_v49 = vld [vmem:[#allocation3] sm:$0xf] }
 0x18a   : > { %4906 = vmatprep.subr.bf16.mxu0 %v5364_v27  ;;  %412 = vst [vmem:[#allocation3 + $0x4c] sm:$0x1] %v411_v38  ;;  %v2329_v17 = vshrl.u32 %v6360_v49, 16  ;;  %v2332_v8 = vshll.u32 %v6360_v49, 16  ;;  %v2269_v38 = vld [vmem:[#allocation3 + $0x24] sm:$0x1] }
 0x18c   : > { %v2331_v4 = vrot.slane %v2329_v17, 4  ;;  %v2334_v42 = vrot.slane %v2332_v8, 5 }
 0x18d   : > { %4907 = vmatpush3.bf16.msra.mxu0 %v5364_v27 }
 0x18e   : > { %4908 = vmatprep.subr.bf16.mxu0 %v5366_v16  ;;  %v2335_v53 = vor.u32 %v2334_v42, %v2331_v4 }
 0x190   : > { %4901 = vmatmul.mubr.msk.bf16.gmra.mrb[4].mxu0 %vm754_vm11, %v4499_v36  ;;  %v6382_v12 = vrot.slane %v2335_v53, 4 }
 0x191   : > { %4909 = vmatpush3.bf16.msra.mxu0 %v5366_v16 }
 0x192   : > { %4910 = vmatprep.subr.bf16.mxu0 %v5368_v23 }
 0x195   : > { %4911 = vmatpush3.bf16.msra.mxu0 %v5368_v23 }
 0x196   : > { %4912 = vmatprep.subr.bf16.mxu0 %v5370_v29 }
 0x199   : > { %4913 = vmatpush3.bf16.msra.mxu0 %v5370_v29 }
 0x19a   : > { %4914 = vmatprep.subr.bf16.mxu0 %v5372_v37 }
 0x19d   : > { %4915 = vmatpush3.bf16.msra.mxu0 %v5372_v37 }
 0x19e   : > { %4916 = vmatprep.subr.bf16.mxu0 %v5374_v43 }
 0x1a1   : > { %4917 = vmatpush3.bf16.msra.mxu0 %v5374_v43  ;;  %v2266_v43 = vld [vmem:[#allocation3 + $0x20] sm:$0xf] }
 0x1a2   : > { %4918 = vmatprep.subr.bf16.mxu0 %v5376_v15 }
 0x1a5   : > { %4919 = vmatpush3.bf16.msra.mxu0 %v5376_v15 }
 0x1a6   : > { %4928 = vmatprep.subr.bf16.mxu0 %v6353_v44 }
 0x25b   : > { %v4898_v36 = vpop.f32.mrb[0].mxu0 }
 0x25c   : > { %v2119_v46 = vadd.f32 %v4898_v36, %v6367_v18  ;;  %v2071_v19 = vpop.f32.mrb[1].mxu0 }
 0x25d   : > { %v2117_v6 = vadd.f32 %v6367_v18, %v2071_v19  ;;  %v4899_v48 = vpop.f32.mrb[2].mxu0  ;;  %v2254_v19 = vld [vmem:[#allocation3 + $0x10] sm:$0xf] }
 0x25e   : > { %v2127_v45 = vmax.f32 %v2119_v46, 0.0  ;;  %v2120_v50 = vadd.f32 %v4899_v48, %v6367_v18  ;;  %v2074_v25 = vpop.f32.mrb[3].mxu0 }
 0x25f   : > { %v2125_v55 = vmax.f32 %v2117_v6, 0.0  ;;  %v2118_v24 = vadd.f32 %v6367_v18, %v2074_v25  ;;  %v2257_v6 = vld [vmem:[#allocation3 + $0x14] sm:$0x1] }
 0x260   : > { %v4654_v26 = vpack.c.bf16 %v2127_v45, %v2127_v45  ;;  %v2128_v57 = vmax.f32 %v2120_v50, 0.0 }
 0x261   : > { %v4652_v58 = vpack.c.bf16 %v2125_v55, %v2125_v55  ;;  %v2126_v27 = vmax.f32 %v2118_v24, 0.0 }
 0x262   : > { %v2182_v0 = vshrl.u32 %v4654_v26, 16  ;;  %v4655_v2 = vpack.c.bf16 %v2128_v57, %v2128_v57  ;;  %v2185_v31 = vshll.u32 %v4654_v26, 16 }
 0x263   : > { %v2166_v9 = vshrl.u32 %v4652_v58, 16  ;;  %v2169_v1 = vshll.u32 %v4652_v58, 16  ;;  %v4653_v14 = vpack.c.bf16 %v2126_v27, %v2126_v27  ;;  %v4902_v40 = vpop.f32.mrb[4].mxu0 }
 0x264   : > { %v2184_v54 = vrot.slane %v2182_v0, 7  ;;  %v2190_v16 = vshrl.u32 %v4655_v2, 16  ;;  %v2193_v20 = vshll.u32 %v4655_v2, 16  ;;  %v2123_v39 = vadd.f32 %v4902_v40, %v6367_v18  ;;  %v2087_v59 = vpop.f32.mrb[5].mxu0 }
 0x265   : > { %v2168_v47 = vrot.slane %v2166_v9, 7  ;;  %v2174_v29 = vshrl.u32 %v4653_v14, 16  ;;  %v2177_v32 = vshll.u32 %v4653_v14, 16  ;;  %v2121_v35 = vadd.f32 %v6367_v18, %v2087_v59  ;;  %v4903_v52 = vpop.f32.mrb[6].mxu0 }
 0x266   : > { %v2187_v7 = vor.u32 %v2185_v31, %v2184_v54  ;;  %v2188_v37 = vrot.slane %v2184_v54, 4  ;;  %v2192_v60 = vrot.slane %v2190_v16, 7  ;;  %v2131_v15 = vmax.f32 %v2123_v39, 0.0  ;;  %v2090_v34 = vpop.f32.mrb[7].mxu0  ;;  %v2287_v54 = vld [vmem:[#allocation3 + $0x3c] sm:$0x1] }
 0x267   : > { %v2171_v22 = vor.u32 %v2169_v1, %v2168_v47  ;;  %v2172_v21 = vrot.slane %v2168_v47, 4  ;;  %v2176_v17 = vrot.slane %v2174_v29, 7  ;;  %v2129_v8 = vmax.f32 %v2121_v35, 0.0  ;;  %v2284_v1 = vld [vmem:[#allocation3 + $0x38] sm:$0xf] }
 0x268   : > { %v2261_v4 = vsel %vm6387_vm3, %v2187_v7, %v2260_v3  ;;  %v2264_v42 = vsel %vm6173_vm0, %v2188_v37, %v2263_v5  ;;  %v2195_v36 = vor.u32 %v2193_v20, %v2192_v60  ;;  %v2196_v46 = vrot.slane %v2192_v60, 4  ;;  %v2275_v16 = vld [vmem:[#allocation3 + $0x2c] sm:$0x1] }
 0x269   : > { %2262 = vst [vmem:[#allocation3 + $0x18] sm:$0xf] %v2261_v4  ;;  %2265 = vst [vmem:[#allocation3 + $0x1c] sm:$0x1] %v2264_v42  ;;  %v2249_v48 = vsel %vm6387_vm3, %v2171_v22, %v2248_v51  ;;  %v2252_v45 = vsel %vm6173_vm0, %v2172_v21, %v2251_v61  ;;  %v2179_v50 = vor.u32 %v2177_v32, %v2176_v17  ;;  %v2180_v25 = vrot.slane %v2176_v17, 4 }
 0x26a   : > { %2250 = vst [vmem:[#allocation3 + $0x8] sm:$0xf] %v2249_v48  ;;  %2253 = vst [vmem:[#allocation3 + $0xc] sm:$0x1] %v2252_v45  ;;  %v2267_v63 = vsel %vm6387_vm3, %v2195_v36, %v2266_v43  ;;  %v2270_v53 = vsel %vm6173_vm0, %v2196_v46, %v2269_v38  ;;  %v4658_v55 = vpack.c.bf16 %v2131_v15, %v2131_v15  ;;  %v2272_v51 = vld [vmem:[#allocation3 + $0x28] sm:$0xf] }
 0x26b   : > { %v4656_v24 = vpack.c.bf16 %v2129_v8, %v2129_v8  ;;  %2268 = vst [vmem:[#allocation3 + $0x20] sm:$0xf] %v2267_v63  ;;  %2271 = vst [vmem:[#allocation3 + $0x24] sm:$0x1] %v2270_v53  ;;  %v2255_v26 = vsel %vm6387_vm3, %v2179_v50, %v2254_v19  ;;  %v2258_v57 = vsel %vm6173_vm0, %v2180_v25, %v2257_v6  ;;  %v2290_v15 = vld [vmem:[#allocation3 + $0x40] sm:$0xf] }
 0x26c   : > { %v2124_v58 = vadd.f32 %v4903_v52, %v6367_v18  ;;  %v2122_v27 = vadd.f32 %v6367_v18, %v2090_v34  ;;  %2256 = vst [vmem:[#allocation3 + $0x10] sm:$0xf] %v2255_v26  ;;  %2259 = vst [vmem:[#allocation3 + $0x14] sm:$0x1] %v2258_v57  ;;  %v2214_v0 = vshrl.u32 %v4658_v55, 16  ;;  %v2217_v9 = vshll.u32 %v4658_v55, 16 }
 0x26d   : > { %v2198_v2 = vshrl.u32 %v4656_v24, 16  ;;  %v2201_v40 = vshll.u32 %v4656_v24, 16  ;;  %v6416_v18 = vsel %vm6105_vm14, %v4537_v62, %v2749_v28  ;;  %v2341_v59 = vsel %vm6022_vm10, %v6382_v12, %v6380_v13  ;;  %v2293_v34 = vld [vmem:[#allocation3 + $0x44] sm:$0x1]  ;;  %v2278_v22 = vld [vmem:[#allocation3 + $0x30] sm:$0xf] }
 0x26e   : > { %v2132_v31 = vmax.f32 %v2124_v58, 0.0  ;;  %v2130_v3 = vmax.f32 %v2122_v27, 0.0  ;;  %v2216_v5 = vrot.slane %v2214_v0, 7  ;;  %v2281_v21 = vld [vmem:[#allocation3 + $0x34] sm:$0x1] }
 0x26f   : > { %v2200_v14 = vrot.slane %v2198_v2, 7 }
 0x270   : > { %v4659_v20 = vpack.c.bf16 %v2132_v31, %v2132_v31  ;;  %v4657_v39 = vpack.c.bf16 %v2130_v3, %v2130_v3  ;;  %v2219_v47 = vor.u32 %v2217_v9, %v2216_v5  ;;  %v2220_v61 = vrot.slane %v2216_v5, 4  ;;  %v6422_v35 = vld [vmem:[#allocation3 + $0x1c] sm:$0x1]  ;;  %v2726_v48 = vld [vmem:[#allocation3 + $0x18] sm:$0xe] }
 0x271   : > { %v2203_v29 = vor.u32 %v2201_v40, %v2200_v14  ;;  %v2204_v32 = vrot.slane %v2200_v14, 4  ;;  %v2321_v11 = vld [vmem:[#allocation3 + $0xc] sm:$0x1]  ;;  %v2724_v38 = vld [vmem:[#allocation3 + $0x8] sm:$0xe]  ;;  %v2380_v6 = vshll.u32 %v6422_v35, 16 }
 0x272   : > { %v2222_v52 = vshrl.u32 %v4659_v20, 16  ;;  %v2225_v7 = vshll.u32 %v4659_v20, 16  ;;  %v2206_v33 = vshrl.u32 %v4657_v39, 16  ;;  %v2209_v37 = vshll.u32 %v4657_v39, 16  ;;  %v6433_v24 = vld [vmem:[#allocation3 + $0x8] sm:$0xf] }
 0x273   : > { %v2285_v62 = vsel %vm6387_vm3, %v2219_v47, %v2284_v1  ;;  %v2288_v28 = vsel %vm6173_vm0, %v2220_v61, %v2287_v54  ;;  %v2273_v60 = vsel %vm6387_vm3, %v2203_v29, %v2272_v51  ;;  %v2276_v43 = vsel %vm6173_vm0, %v2204_v32, %v2275_v16  ;;  %v2322_v36 = vld [vmem:[#allocation3 + $0x14] sm:$0x1]  ;;  %v2725_v55 = vld [vmem:[#allocation3 + $0x10] sm:$0xe]  ;;  %v6453_v9 = vld [vmem:[#allocation3 + $0x18] sm:$0xf] }
 0x274   : > { %2286 = vst [vmem:[#allocation3 + $0x38] sm:$0xf] %v2285_v62  ;;  %2289 = vst [vmem:[#allocation3 + $0x3c] sm:$0x1] %v2288_v28  ;;  %v2224_v17 = vrot.slane %v2222_v52, 7  ;;  %v2208_v8 = vrot.slane %v2206_v33, 7 }
 0x275   : > { %2274 = vst [vmem:[#allocation3 + $0x28] sm:$0xf] %v2273_v60  ;;  %2277 = vst [vmem:[#allocation3 + $0x2c] sm:$0x1] %v2276_v43  ;;  %v2352_v4 = vshll.u32 %v2321_v11, 16  ;;  %v4538_v42 = vrot.slane %v2724_v38, 9 }
 0x276   : > { %v2753_v46 = vrot.slane %v2321_v11, 5  ;;  %v2366_v19 = vshll.u32 %v2322_v36, 16  ;;  %v2757_v45 = vrot.slane %v2322_v36, 5  ;;  %v2227_v50 = vor.u32 %v2225_v7, %v2224_v17  ;;  %v6443_v0 = vld [vmem:[#allocation3 + $0x10] sm:$0xf] }
 0x277   : > { %v2228_v25 = vrot.slane %v2224_v17, 4  ;;  %v2211_v63 = vor.u32 %v2209_v37, %v2208_v8  ;;  %v2212_v53 = vrot.slane %v2208_v8, 4  ;;  %v6435_v26 = vrot.slane %v2352_v4, 5  ;;  %v6457_v51 = vld [vmem:[#allocation3 + $0x24] sm:$0x1]  ;;  %v5377_v33 = vld [vmem:[#allocation9 + $0xc8] sm:$0xff]  }
 0x278   : > { %v2754_v57 = vsel %vm6105_vm14, %v4538_v42, %v2753_v46  ;;  %v6439_v58 = vrot.slane %v2366_v19, 5  ;;  %v6441_v27 = vrot.slane %v2380_v6, 5  ;;  %v2291_v2 = vsel %vm6387_vm3, %v2227_v50, %v2290_v15  ;;  %v2727_v16 = vld [vmem:[#allocation3 + $0x20] sm:$0xe]  ;;  %v5379_v36 = vld [vmem:[#allocation9 + $0xd0] sm:$0xff]  }
 0x279   : > { %v2294_v31 = vsel %vm6173_vm0, %v2228_v25, %v2293_v34  ;;  %v2279_v3 = vsel %vm6387_vm3, %v2211_v63, %v2278_v22  ;;  %v2282_v5 = vsel %vm6173_vm0, %v2212_v53, %v2281_v21  ;;  %2292 = vst [vmem:[#allocation3 + $0x40] sm:$0xf] %v2291_v2  ;;  %v4545_v1 = vcombine.low %v6416_v18, %v2754_v57  ;;  %v6471_v52 = vld [vmem:[#allocation3 + $0x20] sm:$0xf] }
 0x27a   : > { %2295 = vst [vmem:[#allocation3 + $0x44] sm:$0x1] %v2294_v31  ;;  %2280 = vst [vmem:[#allocation3 + $0x30] sm:$0xf] %v2279_v3  ;;  %v4539_v14 = vrot.slane %v2725_v55, 9  ;;  %v4540_v40 = vrot.slane %v2726_v48, 9 }
 0x27b   : > { %2283 = vst [vmem:[#allocation3 + $0x34] sm:$0x1] %v2282_v5  ;;  %v2761_v54 = vrot.slane %v6422_v35, 5  ;;  %v2343_v23 = vshrl.u32 %v6433_v24, 16  ;;  %v2346_v10 = vshll.u32 %v6433_v24, 16  ;;  %v2357_v20 = vshrl.u32 %v6443_v0, 16  ;;  %4968 = vmatprep.mubr.bf16.mxu1 %v4545_v1 }
 0x27c   : > { %v2360_v39 = vshll.u32 %v6443_v0, 16  ;;  %v2758_v47 = vsel %vm6105_vm14, %v4539_v14, %v2757_v45  ;;  %v2371_v61 = vshrl.u32 %v6453_v9, 16  ;;  %v2374_v29 = vshll.u32 %v6453_v9, 16  ;;  %v6469_v32 = vld [vmem:[#allocation3 + $0x2c] sm:$0x1] }
 0x27d   : > { %v2762_v18 = vsel %vm6105_vm14, %v4540_v40, %v2761_v54  ;;  %v2728_v35 = vld [vmem:[#allocation3 + $0x28] sm:$0xe]  ;;  %v2345_v37 = vrot.slane %v2343_v23, 4  ;;  %v2348_v11 = vrot.slane %v2346_v10, 5  ;;  %v2359_v62 = vrot.slane %v2357_v20, 4  ;;  %v5382_v10 = vld [vmem:[#allocation9 + $0xd8] sm:$0xff]  }
 0x27e   : > { %v4546_v7 = vcombine.low %v2758_v47, %v2762_v18  ;;  %v6473_v28 = vld [vmem:[#allocation3 + $0x3c] sm:$0x1]  ;;  %v2362_v60 = vrot.slane %v2360_v39, 5  ;;  %v2373_v43 = vrot.slane %v2371_v61, 4  ;;  %v2376_v15 = vrot.slane %v2374_v29, 5 }
 0x27f   : > { %v4541_v34 = vrot.slane %v2727_v16, 9  ;;  %v2730_v22 = vld [vmem:[#allocation3 + $0x38] sm:$0xe]  ;;  %v2349_v21 = vor.u32 %v2348_v11, %v2345_v37  ;;  %v2765_v38 = vrot.slane %v6457_v51, 5  ;;  %v4542_v17 = vrot.slane %v2728_v35, 9 }
 0x280   : > { %4969 = vmatmul.mubr.bf16.vlgmr.msra.gmra.mrb[0].mxu1 %v4546_v7  ;;  %v2769_v8 = vrot.slane %v6469_v32, 5  ;;  %v2363_v4 = vor.u32 %v2362_v60, %v2359_v62  ;;  %v2377_v42 = vor.u32 %v2376_v15, %v2373_v43  ;;  %v4544_v46 = vrot.slane %v2730_v22, 9  ;;  %v6486_v2 = vld [vmem:[#allocation3 + $0x28] sm:$0xf]  ;;  %v6512_v39 = vld [vmem:[#allocation3 + $0x38] sm:$0xf] }
 0x281   : > { %4977 = vmatpush3.bf16.msra.mxu1 %v6350_v30  ;;  %v2777_v19 = vrot.slane %v6473_v28, 5  ;;  %v2350_v6 = vrot.slane %v2349_v21, 4  ;;  %v2766_v48 = vsel %vm6105_vm14, %v4541_v34, %v2765_v38  ;;  %v2729_v25 = vld [vmem:[#allocation3 + $0x30] sm:$0xe]  ;;  %v2385_v63 = vshrl.u32 %v6471_v52, 16  ;;  %v5385_v22 = vld [vmem:[#allocation9 + $0xe0] sm:$0xff]  }
 0x282   : > { %4978 = vmatprep.subr.bf16.mxu1 %v5377_v33  ;;  %v2770_v45 = vsel %vm6105_vm14, %v4542_v17, %v2769_v8  ;;  %v6483_v50 = vld [vmem:[#allocation3 + $0x34] sm:$0x1]  ;;  %v2364_v30 = vrot.slane %v2363_v4, 4  ;;  %v2378_v53 = vrot.slane %v2377_v42, 4  ;;  %v4543_v57 = vrot.slane %v2729_v25, 9 }
 0x283   : > { %v4547_v55 = vcombine.low %v2766_v48, %v2770_v45  ;;  %v2355_v31 = vsel %vm6022_vm10, %v2350_v6, %v6435_v26  ;;  %v2773_v3 = vrot.slane %v6483_v50, 5  ;;  %v2387_v5 = vrot.slane %v2385_v63, 4  ;;  %v6504_v54 = vld [vmem:[#allocation3 + $0x30] sm:$0xf]  ;;  %v5386_v45 = vld [vmem:[#allocation9 + $0x18] sm:$0xff]  }
 0x284   : > { %v4513_v1 = vcombine.low %v2341_v59, %v2355_v31  ;;  %v2369_v14 = vsel %vm6022_vm10, %v2364_v30, %v6439_v58  ;;  %v2383_v40 = vsel %vm6022_vm10, %v2378_v53, %v6441_v27  ;;  %v2388_v26 = vshll.u32 %v6471_v52, 16  ;;  %v5380_v59 = vld [vmem:[#allocation9 + $0x8] sm:$0xff]   ;;  %v5383_v62 = vld [vmem:[#allocation9 + $0x10] sm:$0xff]   ;;  %v4054_v56 = vld [vmem:[#allocation3 + $0x40] sm:$0xe] }
 0x285   : > { %4979 = vmatpush3.bf16.msra.mxu1 %v5377_v33  ;;  %4972 = vmatprep.mubr.bf16.mxu1 %v4547_v55  ;;  %v4514_v16 = vcombine.low %v2369_v14, %v2383_v40  ;;  %v2774_v13 = vsel %vm6105_vm14, %v4543_v57, %v2773_v3  ;;  %v2778_v12 = vsel %vm6105_vm14, %v4544_v46, %v2777_v19  ;;  %v2399_v58 = vshrl.u32 %v6486_v2, 16  ;;  %v5381_v35 = vld [vmem:[#allocation3 + $0x8] ss:$8 sps:$4 sm:$0xff]  }
 0x286   : > { %4980 = vmatprep.subr.bf16.mxu1 %v5379_v36  ;;  %4920 = vmatprep.mubr.bf16.mxu0 %v4513_v1  ;;  %v4548_v23 = vcombine.low %v2774_v13, %v2778_v12  ;;  %v2390_v27 = vrot.slane %v2388_v26, 5  ;;  %v2402_v20 = vshll.u32 %v6486_v2, 16  ;;  %v2394_v47 = vshll.u32 %v6457_v51, 16  ;;  %v5388_v57 = vld [vmem:[#allocation9 + $0x20] sm:$0xff]   ;;  %v5389_v3 = vld [vmem:[#allocation9 + $0xf0] sm:$0xff]   ;;  %v5390_v14 = vld [vmem:[#allocation9 + $0x28] sm:$0xff]  }
 0x287   : > { %4921 = vmatmul.mubr.bf16.vlgmr.msra.gmra.mrb[8].mxu0 %v4514_v16  ;;  %v2401_v18 = vrot.slane %v2399_v58, 4  ;;  %v2413_v61 = vshrl.u32 %v6504_v54, 16  ;;  %v2416_v29 = vshll.u32 %v6504_v54, 16  ;;  %v2408_v37 = vshll.u32 %v6469_v32, 16  ;;  %v3103_v1 = vld [vmem:[#allocation3 + $0x8] sm:$0xf] }
 0x288   : > { %4929 = vmatpush3.bf16.msra.mxu0 %v6353_v44  ;;  %4973 = vmatmul.mubr.bf16.gmra.mrb[4].mxu1 %v4548_v23  ;;  %v2391_v7 = vor.u32 %v2390_v27, %v2387_v5  ;;  %v2404_v33 = vrot.slane %v2402_v20, 5  ;;  %v2422_v11 = vshll.u32 %v6483_v50, 16  ;;  %v2427_v43 = vshrl.u32 %v6512_v39, 16  ;;  %v5387_v50 = vld [vmem:[#allocation9 + $0xe8] sm:$0xff]   ;;  %v5391_v16 = vld [vmem:[#allocation9 + $0xf8] sm:$0xff]   ;;  %v5394_v58 = vld [vmem:[#allocation9 + $0x100] sm:$0xff]  }
 0x289   : > { %4981 = vmatpush3.bf16.msra.mxu1 %v5379_v36  ;;  %4930 = vmatprep.subr.bf16.mxu0 %v5380_v59  ;;  %v2415_v60 = vrot.slane %v2413_v61, 4  ;;  %v2418_v51 = vrot.slane %v2416_v29, 5  ;;  %v2430_v15 = vshll.u32 %v6512_v39, 16  ;;  %v2436_v32 = vshll.u32 %v6473_v28, 16  ;;  %v3105_v5 = vld [vmem:[#allocation3 + $0x10] sm:$0xf] }
 0x28a   : > { %4992 = vmatprep.mubr.bf16.mxu1 %v5381_v35  ;;  %4982 = vmatprep.subr.bf16.mxu1 %v5382_v10  ;;  %v2392_v44 = vrot.slane %v2391_v7, 4  ;;  %v2405_v34 = vor.u32 %v2404_v33, %v2401_v18  ;;  %v2429_v38 = vrot.slane %v2427_v43, 4  ;;  %v2396_v8 = vrot.slane %v2394_v47, 5  ;;  %v5393_v27 = vld [vmem:[#allocation3 + $0x18] ss:$8 sps:$4 sm:$0xff]   ;;  %v5397_v47 = vld [vmem:[#allocation9 + $0x108] sm:$0xff]  }
 0x28b   : > { %v2419_v21 = vor.u32 %v2418_v51, %v2415_v60  ;;  %v2432_v17 = vrot.slane %v2430_v15, 5  ;;  %v2410_v42 = vrot.slane %v2408_v37, 5  ;;  %v2424_v46 = vrot.slane %v2422_v11, 5  ;;  %v5396_v20 = vld [vmem:[#allocation9 + $0x38] sm:$0xff]   ;;  %v6533_v18 = vld [vmem:[#allocation3 + $0x14] sm:$0x1] }
 0x28c   : > { %4931 = vmatpush3.bf16.msra.mxu0 %v5380_v59  ;;  %v2406_v4 = vrot.slane %v2405_v34, 4  ;;  %v2397_v6 = vsel %vm6022_vm10, %v2392_v44, %v2396_v8  ;;  %v2438_v30 = vrot.slane %v2436_v32, 5  ;;  %v4525_v31 = vcombine.low %v6360_v49, %v6433_v24  ;;  %v5392_v59 = vld [vmem:[#allocation9 + $0x30] sm:$0xff]   ;;  %v6535_v29 = vld [vmem:[#allocation3 + $0xc] sm:$0x1]  ;;  %v6539_v37 = vld [vmem:[#allocation9 + $0x200] sm:$0xff]  }
 0x28d   : > { %4983 = vmatpush3.bf16.msra.mxu1 %v5382_v10  ;;  %4932 = vmatprep.subr.bf16.mxu0 %v5383_v62  ;;  %v2420_v36 = vrot.slane %v2419_v21, 4  ;;  %v2433_v19 = vor.u32 %v2432_v17, %v2429_v38  ;;  %v3134_v40 = vshrl.u32 %v3105_v5, 16  ;;  %v3137_v26 = vshll.u32 %v3105_v5, 16  ;;  %v5395_v61 = vld [vmem:[#allocation3 + $0x28] ss:$8 sps:$4 sm:$0xff]  }
 0x28e   : > { %v2411_v48 = vsel %vm6022_vm10, %v2406_v4, %v2410_v42  ;;  %4984 = vmatprep.subr.bf16.mxu1 %v5385_v22  ;;  %v3120_v13 = vshrl.u32 %v3103_v1, 16  ;;  %v3123_v12 = vshll.u32 %v3103_v1, 16  ;;  %v6537_v7 = vld [vmem:[#allocation3 + $0x14] sm:$0x1]  ;;  %v4048_v33 = vld [vmem:[#allocation3 + $0x10] sm:$0xe]  ;;  %v4528_v5 = vcombine.low %v6504_v54, %v6512_v39 }
 0x28f   : > { %v4515_v25 = vcombine.low %v2397_v6, %v2411_v48  ;;  %v2425_v28 = vsel %vm6022_vm10, %v2420_v36, %v2424_v46  ;;  %v2434_v63 = vrot.slane %v2433_v19, 4  ;;  %v3136_v49 = vrot.slane %v3134_v40, 4  ;;  %v3107_v60 = vld [vmem:[#allocation3 + $0x18] sm:$0xf]  ;;  %v6542_v43 = vld [vmem:[#allocation3 + $0x1c] sm:$0x1] }
 0x290   : > { %4933 = vmatpush3.bf16.msra.mxu0 %v5383_v62  ;;  %v3139_v24 = vrot.slane %v3137_v26, 5  ;;  %v3122_v23 = vrot.slane %v3120_v13, 4  ;;  %v3125_v10 = vrot.slane %v3123_v12, 5  ;;  %v3143_v62 = vshll.u32 %v6533_v18, 16  ;;  %v5402_v51 = vld [vmem:[#allocation9 + $0x110] sm:$0xff]  }
 0x291   : > { %4924 = vmatprep.mubr.bf16.mxu0 %v4515_v25  ;;  %v2439_v53 = vsel %vm6022_vm10, %v2434_v63, %v2438_v30  ;;  %4985 = vmatpush3.bf16.msra.mxu1 %v5385_v22  ;;  %v3129_v15 = vshll.u32 %v6535_v29, 16  ;;  %v4049_v34 = vld [vmem:[#allocation3 + $0x18] sm:$0xe]  ;;  %v4625_v22 = vrot.slane %v4048_v33, 9  ;;  %v4074_v21 = vrot.slane %v6537_v7, 5 }
 0x292   : > { %v4516_v55 = vcombine.low %v2425_v28, %v2439_v53  ;;  %4934 = vmatprep.subr.bf16.mxu0 %v5386_v45  ;;  %4986 = vmatprep.subr.bf16.mxu1 %v5387_v50  ;;  %v3140_v35 = vor.u32 %v3139_v24, %v3136_v49  ;;  %v3126_v11 = vor.u32 %v3125_v10, %v3122_v23  ;;  %v3148_v38 = vshrl.u32 %v3107_v60, 16  ;;  %v3109_v4 = vld [vmem:[#allocation3 + $0x20] sm:$0xf]  ;;  %v6564_v63 = vld [vmem:[#allocation3 + $0x28] sm:$0xf]  ;;  %v6576_v1 = vld [vmem:[#allocation9 + $0x210] sm:$0xff]  }
 0x293   : > { %v3151_v17 = vshll.u32 %v3107_v60, 16  ;;  %v3145_v8 = vrot.slane %v3143_v62, 5  ;;  %v4626_v42 = vrot.slane %v4049_v34, 9  ;;  %v4078_v36 = vrot.slane %v6542_v43, 5  ;;  %v6568_v30 = vld [vmem:[#allocation3 + $0x24] sm:$0x1] }
 0x294   : > { %4925 = vmatmul.mubr.bf16.gmra.mrb[12].mxu0 %v4516_v55  ;;  %v3141_v44 = vrot.slane %v3140_v35, 4  ;;  %v3127_v32 = vrot.slane %v3126_v11, 4  ;;  %v4526_v46 = vcombine.low %v6443_v0, %v6453_v9  ;;  %v4527_v19 = vcombine.low %v6471_v52, %v6486_v2  ;;  %v5401_v52 = vld [vmem:[#allocation3 + $0x38] ss:$8 sps:$4 sm:$0xff]   ;;  %v3113_v53 = vld [vmem:[#allocation3 + $0x30] sm:$0xf] }
 0x295   : > { %4944 = vmatprep.mubr.bf16.mxu0 %v4525_v31  ;;  %4935 = vmatpush3.bf16.msra.mxu0 %v5386_v45  ;;  %v3131_v6 = vrot.slane %v3129_v15, 5  ;;  %v6554_v45 = vld [vmem:[#allocation9 + $0x208] sm:$0xff]   ;;  %v6558_v25 = vsel %vm6105_vm14, %v4625_v22, %v4074_v21  ;;  %v6560_v28 = vrot.slane %v3148_v38, 4  ;;  %v6562_v0 = vrot.slane %v3151_v17, 5  ;;  %v3768_v26 = vld [vmem:[#allocation3 + $0x18] sm:$0xf] }
 0x296   : > { %4987 = vmatpush3.bf16.msra.mxu1 %v5387_v50  ;;  %4936 = vmatprep.subr.bf16.mxu0 %v5388_v57  ;;  %v3146_v48 = vsel %vm6022_vm10, %v3141_v44, %v3145_v8  ;;  %v5404_v50 = vld [vmem:[#allocation9 + $0x118] sm:$0xff]   ;;  %v3162_v9 = vshrl.u32 %v3109_v4, 16  ;;  %v3165_v31 = vshll.u32 %v3109_v4, 16  ;;  %v3176_v40 = vshrl.u32 %v6564_v63, 16  ;;  %v3772_v60 = vld [vmem:[#allocation3 + $0x28] sm:$0xf] }
 0x297   : > { %4988 = vmatprep.subr.bf16.mxu1 %v5389_v3  ;;  %v3132_v2 = vsel %vm6022_vm10, %v3127_v32, %v3131_v6  ;;  %v3154_v13 = vor.u32 %v6562_v0, %v6560_v28  ;;  %v3190_v49 = vshrl.u32 %v3113_v53, 16  ;;  %v3179_v54 = vshll.u32 %v6564_v63, 16  ;;  %v3770_v23 = vld [vmem:[#allocation3 + $0x20] sm:$0xf]  ;;  %v6598_v15 = vld [vmem:[#allocation3 + $0x24] sm:$0x1] }
 0x298   : > { %v4569_v55 = vcombine.low %v3132_v2, %v3146_v48  ;;  %v6582_v12 = vrot.slane %v3162_v9, 4  ;;  %v3193_v39 = vshll.u32 %v3113_v53, 16  ;;  %v6587_v10 = vld [vmem:[#allocation9 + $0x218] sm:$0xff]   ;;  %v6593_v35 = vrot.slane %v3176_v40, 4  ;;  %v6602_v38 = vld [vmem:[#allocation3 + $0x2c] sm:$0x1] }
 0x299   : > { %4937 = vmatpush3.bf16.msra.mxu0 %v5388_v57  ;;  %v4079_v57 = vsel %vm6105_vm14, %v4626_v42, %v4078_v36  ;;  %v3806_v62 = vshll.u32 %v6542_v43, 16  ;;  %v3811_v22 = vshrl.u32 %v3770_v23, 16  ;;  %v3814_v8 = vshll.u32 %v3770_v23, 16  ;;  %v6605_v43 = vld [vmem:[#allocation9 + $0x220] sm:$0xff]   ;;  %v3115_v9 = vld [vmem:[#allocation3 + $0x38] sm:$0xf] }
 0x29a   : > { %4989 = vmatpush3.bf16.msra.mxu1 %v5389_v3  ;;  %4938 = vmatprep.subr.bf16.mxu0 %v5390_v14  ;;  %v3766_v3 = vld [vmem:[#allocation3 + $0x10] sm:$0xf]  ;;  %v6600_v21 = vrot.slane %v3193_v39, 5  ;;  %v3825_v36 = vshrl.u32 %v3772_v60, 16  ;;  %v3834_v53 = vshll.u32 %v6602_v38, 16 }
 0x29b   : > { %4990 = vmatprep.subr.bf16.mxu1 %v5391_v16  ;;  %v3783_v24 = vshrl.u32 %v3766_v3, 16  ;;  %v3813_v42 = vrot.slane %v3811_v22, 4  ;;  %v3808_v48 = vrot.slane %v3806_v62, 5  ;;  %v6617_v40 = vld [vmem:[#allocation3 + $0x34] sm:$0x1] }
 0x29c   : > { %v4050_v0 = vld [vmem:[#allocation3 + $0x20] sm:$0xe] }
 0x29d   : > { %4939 = vmatpush3.bf16.msra.mxu0 %v5390_v14  ;;  %v4633_v14 = vcombine.low %v6558_v25, %v4079_v57  ;;  %v3785_v33 = vrot.slane %v3783_v24, 4  ;;  %v3820_v25 = vshll.u32 %v6598_v15, 16  ;;  %v3204_v24 = vshrl.u32 %v3115_v9, 16 }
 0x29e   : > { %4991 = vmatpush3.bf16.msra.mxu1 %v5391_v16  ;;  %4940 = vmatprep.subr.bf16.mxu0 %v5392_v59  ;;  %v5407_v16 = vld [vmem:[#allocation9 + $0x120] sm:$0xff]  }
 0x29f   : > { %5000 = vmatprep.subr.bf16.mxu1 %v5394_v58 }
 0x2a1   : > { %4941 = vmatpush3.bf16.msra.mxu0 %v5392_v59  ;;  %4993 = vmatmul.mubr.bf16.vlgmr.msra.gmra.mrb[0].mxu1 %v5393_v27  ;;  %v3171_v59 = vshll.u32 %v6568_v30, 16  ;;  %v6589_v27 = vrot.slane %v3165_v31, 5  ;;  %v3181_v31 = vrot.slane %v3179_v54, 5 }
 0x2a2   : > { %4996 = vmatprep.mubr.bf16.mxu1 %v5395_v61  ;;  %5001 = vmatpush3.bf16.msra.mxu1 %v5394_v58  ;;  %v3786_v58 = vshll.u32 %v3766_v3, 16  ;;  %v3800_v61 = vshll.u32 %v3768_v26, 16 }
 0x2a3   : > { %4942 = vmatprep.subr.bf16.mxu0 %v5396_v20  ;;  %5002 = vmatprep.subr.bf16.mxu1 %v5397_v47  ;;  %v3168_v57 = vor.u32 %v6589_v27, %v6582_v12  ;;  %v6622_v12 = vld [vmem:[#allocation9 + $0x228] sm:$0xff]  }
 0x2a4   : > { %v3788_v11 = vrot.slane %v3786_v58, 5  ;;  %v3802_v34 = vrot.slane %v3800_v61, 5  ;;  %v6628_v27 = vld [vmem:[#allocation3 + $0x2c] sm:$0x1] }
 0x2a5   : > { %4943 = vmatpush3.bf16.msra.mxu0 %v5396_v20  ;;  %v3792_v20 = vshll.u32 %v6537_v7, 16  ;;  %v5409_v7 = vld [vmem:[#allocation9 + $0x128] sm:$0xff]  }
 0x2a6   : > { %5003 = vmatpush3.bf16.msra.mxu1 %v5397_v47  ;;  %5096 = vmatprep.subr.bf16.mxu0 %v6539_v37  ;;  %v3797_v47 = vshrl.u32 %v3768_v26, 16  ;;  %v3789_v17 = vor.u32 %v3788_v11, %v3785_v33  ;;  %v3836_v33 = vrot.slane %v3834_v53, 5  ;;  %v5413_v11 = vld [vmem:[#allocation9 + $0x138] sm:$0xff]  }
 0x2a7   : > { %5004 = vmatprep.subr.bf16.mxu1 %v5402_v51  ;;  %v3794_v32 = vrot.slane %v3792_v20, 5  ;;  %v3207_v20 = vshll.u32 %v3115_v9, 16  ;;  %v6649_v9 = vld [vmem:[#allocation3 + $0x44] sm:$0x1]  ;;  %v6661_v53 = vld [vmem:[#allocation3 + $0x3c] sm:$0x1] }
 0x2a8   : > { %4945 = vmatmul.mubr.bf16.vlgmr.msra.gmra.mrb[8].mxu0 %v4526_v46  ;;  %v3799_v44 = vrot.slane %v3797_v47, 4  ;;  %v3828_v46 = vshll.u32 %v3772_v60, 16  ;;  %v3790_v6 = vrot.slane %v3789_v17, 4  ;;  %v3822_v47 = vrot.slane %v3820_v25, 5  ;;  %v6639_v17 = vld [vmem:[#allocation9 + $0x230] sm:$0xff]  }
 0x2a9   : > { %4948 = vmatprep.mubr.bf16.mxu0 %v4527_v19  ;;  %5097 = vmatpush3.bf16.msra.mxu0 %v6539_v37  ;;  %v3117_v19 = vld [vmem:[#allocation3 + $0x40] sm:$0xf]  ;;  %v3169_v60 = vrot.slane %v3168_v57, 4  ;;  %v4086_v57 = vrot.slane %v6602_v38, 5  ;;  %v3385_v38 = vld [vmem:[#allocation3 + $0x8] sm:$0xe] }
 0x2aa   : > { %4997 = vmatmul.mubr.bf16.gmra.mrb[4].mxu1 %v5401_v52  ;;  %5098 = vmatprep.subr.bf16.mxu0 %v6554_v45  ;;  %v3803_v4 = vor.u32 %v3802_v34, %v3799_v44  ;;  %v3827_v52 = vrot.slane %v3825_v36, 4  ;;  %v3830_v2 = vrot.slane %v3828_v46, 5  ;;  %v3795_v3 = vsel %vm6022_vm10, %v3790_v6, %v3794_v32  ;;  %v4051_v36 = vld [vmem:[#allocation3 + $0x28] sm:$0xe] }
 0x2ab   : > { %5005 = vmatpush3.bf16.msra.mxu1 %v5402_v51  ;;  %5016 = vmatprep.mubr.bf16.mxu1 %v4569_v55  ;;  %v6596_v51 = vrot.slane %v3190_v49, 4  ;;  %v5411_v55 = vld [vmem:[#allocation9 + $0x130] sm:$0xff]   ;;  %v3218_v26 = vshrl.u32 %v3117_v19, 16  ;;  %v3182_v44 = vor.u32 %v3181_v31, %v6593_v35  ;;  %v3155_v35 = vrot.slane %v3154_v13, 4 }
 0x2ac   : > { %5006 = vmatprep.subr.bf16.mxu1 %v5404_v50  ;;  %v3804_v63 = vrot.slane %v3803_v4, 4  ;;  %v3831_v39 = vor.u32 %v3830_v2, %v3827_v52  ;;  %v3185_v32 = vshll.u32 %v6628_v27, 16  ;;  %v3206_v46 = vrot.slane %v3204_v24, 4  ;;  %v6659_v2 = vld [vmem:[#allocation9 + $0x238] sm:$0xff]  }
 0x2ad   : > { %5099 = vmatpush3.bf16.msra.mxu0 %v6554_v45  ;;  %v3196_v54 = vor.u32 %v6600_v21, %v6596_v51  ;;  %v3199_v51 = vshll.u32 %v6617_v40, 16  ;;  %v3220_v34 = vrot.slane %v3218_v26, 4  ;;  %v4082_v24 = vrot.slane %v6598_v15, 5 }
 0x2ae   : > { %5100 = vmatprep.subr.bf16.mxu0 %v6576_v1  ;;  %v3809_v49 = vsel %vm6022_vm10, %v3804_v63, %v3808_v48  ;;  %v3832_v61 = vrot.slane %v3831_v39, 4  ;;  %v5415_v48 = vld [vmem:[#allocation9 + $0x140] sm:$0xff]   ;;  %v3187_v63 = vrot.slane %v3185_v32, 5  ;;  %v4627_v39 = vrot.slane %v4050_v0, 9  ;;  %v5419_v32 = vld [vmem:[#allocation9 + $0x158] sm:$0xff]  }
 0x2af   : > { %5007 = vmatpush3.bf16.msra.mxu1 %v5404_v50  ;;  %v3816_v50 = vrot.slane %v3814_v8, 5  ;;  %v6626_v58 = vcombine.low %v3795_v3, %v3809_v49  ;;  %v3197_v8 = vrot.slane %v3196_v54, 4  ;;  %v3201_v25 = vrot.slane %v3199_v51, 5  ;;  %v5417_v49 = vld [vmem:[#allocation9 + $0x148] sm:$0xff]  }
 0x2b0   : > { %4949 = vmatmul.mubr.bf16.gmra.mrb[12].mxu0 %v4528_v5  ;;  %5008 = vmatprep.subr.bf16.mxu1 %v5407_v16  ;;  %v3837_v21 = vsel %vm6022_vm10, %v3832_v61, %v3836_v33  ;;  %v3227_v3 = vshll.u32 %v6649_v9, 16  ;;  %v3415_v61 = vrot.slane %v6533_v18, 5  ;;  %v4581_v15 = vrot.slane %v3385_v38, 9  ;;  %v3389_v0 = vld [vmem:[#allocation3 + $0x28] sm:$0xe] }
 0x2b1   : > { %5101 = vmatpush3.bf16.msra.mxu0 %v6576_v1  ;;  %5112 = vmatprep.mubr.bf16.mxu0 %v4633_v14  ;;  %v3817_v5 = vor.u32 %v3816_v50, %v3813_v42  ;;  %v6615_v14 = vld [vmem:[#allocation3 + $0x1c] sm:$0x1]  ;;  %v3173_v42 = vrot.slane %v3171_v59, 5  ;;  %v3183_v50 = vrot.slane %v3182_v44, 4  ;;  %v3202_v52 = vsel %vm6022_vm10, %v3197_v8, %v3201_v25 }
 0x2b2   : > { %5102 = vmatprep.subr.bf16.mxu0 %v6587_v10  ;;  %v3157_v62 = vshll.u32 %v6615_v14, 16  ;;  %v3411_v44 = vrot.slane %v6535_v29, 5  ;;  %v4083_v51 = vsel %vm6105_vm14, %v4627_v39, %v4082_v24 }
 0x2b3   : > { %5009 = vmatpush3.bf16.msra.mxu1 %v5407_v16  ;;  %v3221_v16 = vshll.u32 %v3117_v19, 16  ;;  %v3818_v23 = vrot.slane %v3817_v5, 4  ;;  %v3209_v19 = vrot.slane %v3207_v20, 5  ;;  %v3174_v28 = vsel %vm6022_vm10, %v3169_v60, %v3173_v42  ;;  %v3386_v5 = vld [vmem:[#allocation3 + $0x10] sm:$0xe]  ;;  %v5420_v42 = vld [vmem:[#allocation9 + $0x160] sm:$0xff]  }
 0x2b4   : > { %5010 = vmatprep.subr.bf16.mxu1 %v5409_v7  ;;  %v3159_v6 = vrot.slane %v3157_v62, 5  ;;  %v3229_v62 = vrot.slane %v3227_v3, 5  ;;  %v5418_v60 = vld [vmem:[#allocation9 + $0x150] sm:$0xff]   ;;  %v3412_v29 = vsel %vm6105_vm14, %v4581_v15, %v3411_v44  ;;  %v5434_v15 = vld [vmem:[#allocation9 + $0x1c0] sm:$0xff]  }
 0x2b5   : > { %5103 = vmatpush3.bf16.msra.mxu0 %v6587_v10  ;;  %v3223_v22 = vrot.slane %v3221_v16, 5  ;;  %v3210_v31 = vor.u32 %v3209_v19, %v3206_v46  ;;  %v3188_v16 = vsel %vm6022_vm10, %v3183_v50, %v3187_v63  ;;  %v5422_v46 = vld [vmem:[#allocation9 + $0x170] sm:$0xff]   ;;  %v3388_v19 = vld [vmem:[#allocation3 + $0x20] sm:$0xe] }
 0x2b6   : > { %5104 = vmatprep.subr.bf16.mxu0 %v6605_v43  ;;  %v3160_v59 = vsel %vm6022_vm10, %v3155_v35, %v3159_v6  ;;  %v4571_v54 = vcombine.low %v3188_v16, %v3202_v52  ;;  %v3390_v6 = vld [vmem:[#allocation3 + $0x30] sm:$0xe]  ;;  %v3387_v50 = vld [vmem:[#allocation3 + $0x18] sm:$0xe]  ;;  %v4584_v25 = vrot.slane %v3388_v19, 9  ;;  %v3419_v52 = vrot.slane %v6615_v14, 5 }
 0x2b7   : > { %5011 = vmatpush3.bf16.msra.mxu1 %v5409_v7  ;;  %v3823_v7 = vsel %vm6022_vm10, %v3818_v23, %v3822_v47  ;;  %v3224_v13 = vor.u32 %v3223_v22, %v3220_v34  ;;  %v4570_v26 = vcombine.low %v3160_v59, %v3174_v28  ;;  %v3213_v23 = vshll.u32 %v6661_v53, 16  ;;  %v5425_v16 = vld [vmem:[#allocation9 + $0x188] sm:$0xff]  }
 0x2b8   : > { %5012 = vmatprep.subr.bf16.mxu1 %v5411_v55  ;;  %v6645_v4 = vcombine.low %v3823_v7, %v3837_v21  ;;  %v4582_v47 = vrot.slane %v3386_v5, 9  ;;  %v3423_v28 = vrot.slane %v6568_v30, 5  ;;  %v3431_v59 = vrot.slane %v6617_v40, 5  ;;  %v3392_v30 = vld [vmem:[#allocation3 + $0x40] sm:$0xe] }
 0x2b9   : > { %5105 = vmatpush3.bf16.msra.mxu0 %v6605_v43  ;;  %v3225_v20 = vrot.slane %v3224_v13, 4  ;;  %v3215_v34 = vrot.slane %v3213_v23, 5  ;;  %v4586_v13 = vrot.slane %v3390_v6, 9  ;;  %v4583_v63 = vrot.slane %v3387_v50, 9  ;;  %v5433_v44 = vld [vmem:[#allocation3 + $0x20] ss:$8 sps:$4 sm:$0xff]  }
 0x2ba   : > { %5106 = vmatprep.subr.bf16.mxu0 %v6622_v12  ;;  %v3416_v7 = vsel %vm6105_vm14, %v4582_v47, %v3415_v61  ;;  %v3424_v3 = vsel %vm6105_vm14, %v4584_v25, %v3423_v28  ;;  %v3435_v23 = vrot.slane %v6661_v53, 5  ;;  %v5430_v53 = vld [vmem:[#allocation9 + $0x1a8] sm:$0xff]   ;;  %v5442_v25 = vld [vmem:[#allocation9 + $0x1f0] sm:$0xff]  }
 0x2bb   : > { %5013 = vmatpush3.bf16.msra.mxu1 %v5411_v55  ;;  %v4628_v55 = vrot.slane %v4051_v36, 9  ;;  %v3230_v18 = vsel %vm6022_vm10, %v3225_v20, %v3229_v62  ;;  %v4589_v8 = vcombine.low %v3412_v29, %v3416_v7  ;;  %v5421_v36 = vld [vmem:[#allocation9 + $0x168] sm:$0xff]   ;;  %v3432_v5 = vsel %vm6105_vm14, %v4586_v13, %v3431_v59  ;;  %v5426_v20 = vld [vmem:[#allocation9 + $0x190] sm:$0xff]   ;;  %v5439_v7 = vld [vmem:[#allocation9 + $0x1d8] sm:$0xff]  }
 0x2bc   : > { %5014 = vmatprep.subr.bf16.mxu1 %v5413_v11  ;;  %v3420_v40 = vsel %vm6105_vm14, %v4583_v63, %v3419_v52  ;;  %v5431_v62 = vld [vmem:[#allocation9 + $0x1b0] sm:$0xff]   ;;  %v3780_v50 = vld [vmem:[#allocation3 + $0x48] sm:$0xf] }
 0x2bd   : > { %5107 = vmatpush3.bf16.msra.mxu0 %v6622_v12  ;;  %v4087_v33 = vsel %vm6105_vm14, %v4628_v55, %v4086_v57  ;;  %v5424_v55 = vld [vmem:[#allocation9 + $0x180] sm:$0xff]   ;;  %v4585_v57 = vrot.slane %v3389_v0, 9  ;;  %v3776_v29 = vld [vmem:[#allocation3 + $0x38] sm:$0xf]  ;;  %v3775_v0 = vld [vmem:[#allocation3 + $0x34] sm:$0x1] }
 0x2be   : > { %5108 = vmatprep.subr.bf16.mxu0 %v6639_v17  ;;  %v4634_v22 = vcombine.low %v4083_v51, %v4087_v33  ;;  %v5428_v33 = vld [vmem:[#allocation9 + $0x198] sm:$0xff]   ;;  %v5436_v51 = vld [vmem:[#allocation9 + $0x1c8] sm:$0xff]   ;;  %v3881_v63 = vshrl.u32 %v3780_v50, 16  ;;  %v3884_v52 = vshll.u32 %v3780_v50, 16 }
 0x2bf   : > { %5015 = vmatpush3.bf16.msra.mxu1 %v5413_v11  ;;  %v3211_v11 = vrot.slane %v3210_v31, 4  ;;  %v3427_v31 = vrot.slane %v6628_v27, 5  ;;  %v4588_v27 = vrot.slane %v3392_v30, 9 }
 0x2c0   : > { %5024 = vmatprep.subr.bf16.mxu1 %v5415_v48 }
 0x2c1   : > { %5109 = vmatpush3.bf16.msra.mxu0 %v6639_v17  ;;  %v3216_v21 = vsel %vm6022_vm10, %v3211_v11, %v3215_v34  ;;  %v3428_v14 = vsel %vm6105_vm14, %v4585_v57, %v3427_v31  ;;  %v5427_v11 = vld [vmem:[#allocation3 + $0x10] ss:$8 sps:$4 sm:$0xff]   ;;  %v3777_v57 = vld [vmem:[#allocation3 + $0x3c] sm:$0x1] }
 0x2c2   : > { %5017 = vmatmul.mubr.bf16.vlgmr.msra.gmra.mrb[0].mxu1 %v4570_v26  ;;  %5110 = vmatprep.subr.bf16.mxu0 %v6659_v2  ;;  %v4572_v35 = vcombine.low %v3216_v21, %v3230_v18  ;;  %v4590_v26 = vcombine.low %v3420_v40, %v3424_v3  ;;  %v4591_v39 = vcombine.low %v3428_v14, %v3432_v5  ;;  %v5435_v34 = vld [vmem:[#allocation3 + $0x30] ss:$8 sps:$4 sm:$0xff]   ;;  %v3848_v3 = vshll.u32 %v3775_v0, 16 }
 0x2c3   : > { %5020 = vmatprep.mubr.bf16.mxu1 %v4571_v54  ;;  %5025 = vmatpush3.bf16.msra.mxu1 %v5415_v48  ;;  %v5423_v48 = vld [vmem:[#allocation9 + $0x178] sm:$0xff]   ;;  %v3439_v54 = vrot.slane %v6649_v9, 5  ;;  %v5429_v9 = vld [vmem:[#allocation9 + $0x1a0] sm:$0xff]   ;;  %v5438_v18 = vld [vmem:[#allocation9 + $0x1d0] sm:$0xff]   ;;  %v3886_v14 = vrot.slane %v3884_v52, 5 }
 0x2c4   : > { %5026 = vmatprep.subr.bf16.mxu1 %v5417_v49  ;;  %v3774_v21 = vld [vmem:[#allocation3 + $0x30] sm:$0xf]  ;;  %v5443_v31 = vld [vmem:[#allocation9 + $0x1f8] sm:$0xff]  }
 0x2c5   : > { %5111 = vmatpush3.bf16.msra.mxu0 %v6659_v2  ;;  %v3440_v38 = vsel %vm6105_vm14, %v4588_v27, %v3439_v54  ;;  %v3779_v54 = vld [vmem:[#allocation3 + $0x44] sm:$0x1] }
 0x2c7   : > { %5027 = vmatpush3.bf16.msra.mxu1 %v5417_v49  ;;  %v3391_v49 = vld [vmem:[#allocation3 + $0x38] sm:$0xe] }
 0x2c8   : > { %5113 = vmatmul.mubr.bf16.vlgmr.msra.gmra.mrb[16].mxu0 %v4634_v22  ;;  %5028 = vmatprep.subr.bf16.mxu1 %v5418_v60  ;;  %v4587_v24 = vrot.slane %v3391_v49, 9  ;;  %v5437_v22 = vld [vmem:[#allocation3 + $0x40] ss:$8 sps:$4 sm:$0xff]   ;;  %v3862_v49 = vshll.u32 %v3777_v57, 16 }
 0x2ca   : > { %5021 = vmatmul.mubr.bf16.gmra.mrb[4].mxu1 %v4572_v35  ;;  %v3436_v47 = vsel %vm6105_vm14, %v4587_v24, %v3435_v23  ;;  %v5440_v35 = vld [vmem:[#allocation9 + $0x1e0] sm:$0xff]   ;;  %v3781_v24 = vld [vmem:[#allocation3 + $0x4c] sm:$0x1] }
 0x2cb   : > { %5029 = vmatpush3.bf16.msra.mxu1 %v5418_v60  ;;  %5040 = vmatprep.mubr.bf16.mxu1 %v4589_v8  ;;  %v4592_v61 = vcombine.low %v3436_v47, %v3440_v38  ;;  %v5432_v60 = vld [vmem:[#allocation9 + $0x1b8] sm:$0xff]   ;;  %v3842_v8 = vshll.u32 %v3774_v21, 16  ;;  %v3890_v38 = vshll.u32 %v3781_v24, 16 }
 0x2cc   : > { %5030 = vmatprep.subr.bf16.mxu1 %v5419_v32 }
 0x2cd   : > { %v3844_v6 = vrot.slane %v3842_v8, 5  ;;  %v4098_v8 = vrot.slane %v3779_v54, 5 }
 0x2cf   : > { %5031 = vmatpush3.bf16.msra.mxu1 %v5419_v32  ;;  %v3839_v32 = vshrl.u32 %v3774_v21, 16 }
 0x2d0   : > { %5032 = vmatprep.subr.bf16.mxu1 %v5420_v42 }
 0x2d1   : > { %v3841_v19 = vrot.slane %v3839_v32, 4 }
 0x2d3   : > { %5033 = vmatpush3.bf16.msra.mxu1 %v5420_v42  ;;  %v5441_v42 = vld [vmem:[#allocation9 + $0x1e8] sm:$0xff]  }
 0x2d4   : > { %5034 = vmatprep.subr.bf16.mxu1 %v5421_v36 }
 0x2d7   : > { %5035 = vmatpush3.bf16.msra.mxu1 %v5421_v36  ;;  %v3853_v36 = vshrl.u32 %v3776_v29, 16 }
 0x2d8   : > { %5036 = vmatprep.subr.bf16.mxu1 %v5422_v46 }
 0x2d9   : > { %v3855_v28 = vrot.slane %v3853_v36, 4 }
 0x2db   : > { %5037 = vmatpush3.bf16.msra.mxu1 %v5422_v46  ;;  %v3856_v46 = vshll.u32 %v3776_v29, 16 }
 0x2dc   : > { %5038 = vmatprep.subr.bf16.mxu1 %v5423_v48 }
 0x2df   : > { %5039 = vmatpush3.bf16.msra.mxu1 %v5423_v48  ;;  %v3778_v48 = vld [vmem:[#allocation3 + $0x40] sm:$0xf] }
 0x2e0   : > { %5048 = vmatprep.subr.bf16.mxu1 %v5424_v55  ;;  %v3867_v13 = vshrl.u32 %v3778_v48, 16  ;;  %v3870_v59 = vshll.u32 %v3778_v48, 16 }
 0x2e2   : > { %5041 = vmatmul.mubr.bf16.vlgmr.msra.gmra.mrb[0].mxu1 %v4590_v26  ;;  %v3869_v30 = vrot.slane %v3867_v13, 4  ;;  %v3872_v40 = vrot.slane %v3870_v59, 5  ;;  %v3883_v26 = vrot.slane %v3881_v63, 4 }
 0x2e3   : > { %5044 = vmatprep.mubr.bf16.mxu1 %v4591_v39  ;;  %5049 = vmatpush3.bf16.msra.mxu1 %v5424_v55  ;;  %v3845_v55 = vor.u32 %v3844_v6, %v3841_v19  ;;  %v3850_v39 = vrot.slane %v3848_v3, 5 }
 0x2e4   : > { %5050 = vmatprep.subr.bf16.mxu1 %v5425_v16  ;;  %v3873_v23 = vor.u32 %v3872_v40, %v3869_v30 }
 0x2e7   : > { %5051 = vmatpush3.bf16.msra.mxu1 %v5425_v16  ;;  %v3846_v16 = vrot.slane %v3845_v55, 4 }
 0x2e8   : > { %5052 = vmatprep.subr.bf16.mxu1 %v5426_v20 }
 0x2e9   : > { %v3851_v47 = vsel %vm6022_vm10, %v3846_v16, %v3850_v39 }
 0x2ea   : > { %5045 = vmatmul.mubr.bf16.gmra.mrb[4].mxu1 %v4592_v61  ;;  %v3864_v61 = vrot.slane %v3862_v49, 5 }
 0x2eb   : > { %5053 = vmatpush3.bf16.msra.mxu1 %v5426_v20  ;;  %5064 = vmatprep.mubr.bf16.mxu1 %v5427_v11  ;;  %v3887_v20 = vor.u32 %v3886_v14, %v3883_v26  ;;  %v4052_v11 = vld [vmem:[#allocation3 + $0x30] sm:$0xe] }
 0x2ec   : > { %5054 = vmatprep.subr.bf16.mxu1 %v5428_v33 }
 0x2ef   : > { %5055 = vmatpush3.bf16.msra.mxu1 %v5428_v33  ;;  %v3876_v33 = vshll.u32 %v3779_v54, 16 }
 0x2f0   : > { %5056 = vmatprep.subr.bf16.mxu1 %v5429_v9 }
 0x2f3   : > { %5057 = vmatpush3.bf16.msra.mxu1 %v5429_v9 }
 0x2f4   : > { %5058 = vmatprep.subr.bf16.mxu1 %v5430_v53 }
 0x2f7   : > { %5059 = vmatpush3.bf16.msra.mxu1 %v5430_v53 }
 0x2f8   : > { %5060 = vmatprep.subr.bf16.mxu1 %v5431_v62 }
 0x2fb   : > { %5061 = vmatpush3.bf16.msra.mxu1 %v5431_v62  ;;  %v3874_v62 = vrot.slane %v3873_v23, 4 }
 0x2fc   : > { %5062 = vmatprep.subr.bf16.mxu1 %v5432_v60 }
 0x2ff   : > { %5063 = vmatpush3.bf16.msra.mxu1 %v5432_v60  ;;  %v3888_v60 = vrot.slane %v3887_v20, 4 }
 0x300   : > { %5072 = vmatprep.subr.bf16.mxu1 %v5434_v15 }
 0x302   : > { %5065 = vmatmul.mubr.bf16.vlgmr.msra.gmra.mrb[0].mxu1 %v5433_v44  ;;  %v4053_v44 = vld [vmem:[#allocation3 + $0x38] sm:$0xe] }
 0x303   : > { %5068 = vmatprep.mubr.bf16.mxu1 %v5435_v34  ;;  %5073 = vmatpush3.bf16.msra.mxu1 %v5434_v15  ;;  %v3892_v15 = vrot.slane %v3890_v38, 5  ;;  %v4090_v34 = vrot.slane %v3775_v0, 5 }
 0x304   : > { %5074 = vmatprep.subr.bf16.mxu1 %v5436_v51 }
 0x307   : > { %5075 = vmatpush3.bf16.msra.mxu1 %v5436_v51  ;;  %v4629_v51 = vrot.slane %v4052_v11, 9 }
 0x308   : > { %5076 = vmatprep.subr.bf16.mxu1 %v5438_v18 }
 0x309   : > { %v4091_v29 = vsel %vm6105_vm14, %v4629_v51, %v4090_v34 }
 0x30a   : > { %5069 = vmatmul.mubr.bf16.gmra.mrb[4].mxu1 %v5437_v22  ;;  %v4630_v22 = vrot.slane %v4053_v44, 9 }
 0x30b   : > { %5077 = vmatpush3.bf16.msra.mxu1 %v5438_v18  ;;  %5088 = vmatprep.mubr.bf16.mxu1 %v6626_v58  ;;  %v3858_v58 = vrot.slane %v3856_v46, 5  ;;  %v3878_v18 = vrot.slane %v3876_v33, 5 }
 0x30c   : > { %5078 = vmatprep.subr.bf16.mxu1 %v5439_v7 }
 0x30d   : > { %v3859_v5 = vor.u32 %v3858_v58, %v3855_v28  ;;  %v3879_v21 = vsel %vm6022_vm10, %v3874_v62, %v3878_v18 }
 0x30f   : > { %5079 = vmatpush3.bf16.msra.mxu1 %v5439_v7  ;;  %v3860_v27 = vrot.slane %v3859_v5, 4  ;;  %v4094_v7 = vrot.slane %v3777_v57, 5 }
 0x310   : > { %5080 = vmatprep.subr.bf16.mxu1 %v5440_v35 }
 0x311   : > { %v3865_v9 = vsel %vm6022_vm10, %v3860_v27, %v3864_v61 }
 0x312   : > { %v4615_v53 = vcombine.low %v3851_v47, %v3865_v9 }
 0x313   : > { %5081 = vmatpush3.bf16.msra.mxu1 %v5440_v35  ;;  %v3893_v35 = vsel %vm6022_vm10, %v3888_v60, %v3892_v15 }
 0x314   : > { %5082 = vmatprep.subr.bf16.mxu1 %v5441_v42 }
 0x317   : > { %5083 = vmatpush3.bf16.msra.mxu1 %v5441_v42  ;;  %v4102_v42 = vrot.slane %v3781_v24, 5 }
 0x318   : > { %5084 = vmatprep.subr.bf16.mxu1 %v5442_v25 }
 0x31b   : > { %5085 = vmatpush3.bf16.msra.mxu1 %v5442_v25 }
 0x31c   : > { %5086 = vmatprep.subr.bf16.mxu1 %v5443_v31 }
 0x31f   : > { %5087 = vmatpush3.bf16.msra.mxu1 %v5443_v31 }
 0x320   : > { %5120 = vmatprep.subr.bf16.mxu1 %v6539_v37 }
 0x322   : > { %5089 = vmatmul.mubr.bf16.vlgmr.msra.gmra.mrb[0].mxu1 %v6645_v4  ;;  %v4616_v4 = vcombine.low %v3879_v21, %v3893_v35 }
 0x323   : > { %5092 = vmatprep.mubr.bf16.mxu1 %v4615_v53  ;;  %5128 = vmatpush3.bf16.msra.mxu1 %v6539_v37  ;;  %v4095_v37 = vsel %vm6105_vm14, %v4630_v22, %v4094_v7 }
 0x324   : > { %5121 = vmatprep.subr.bf16.mxu1 %v6554_v45  ;;  %v4635_v32 = vcombine.low %v4091_v29, %v4095_v37 }
 0x327   : > { %5129 = vmatpush3.bf16.msra.mxu1 %v6554_v45  ;;  %v4055_v45 = vld [vmem:[#allocation3 + $0x48] sm:$0xe] }
 0x328   : > { %5122 = vmatprep.subr.bf16.mxu1 %v6576_v1  ;;  %v4632_v36 = vrot.slane %v4055_v45, 9 }
 0x32a   : > { %5093 = vmatmul.mubr.bf16.gmra.mrb[4].mxu1 %v4616_v4 }
 0x32b   : > { %5130 = vmatpush3.bf16.msra.mxu1 %v6576_v1  ;;  %5116 = vmatprep.mubr.bf16.mxu1 %v4635_v32  ;;  %v4631_v1 = vrot.slane %v4054_v56, 9 }
 0x32c   : > { %5123 = vmatprep.subr.bf16.mxu1 %v6587_v10 }
 0x32f   : > { %5131 = vmatpush3.bf16.msra.mxu1 %v6587_v10  ;;  %v4099_v10 = vsel %vm6105_vm14, %v4631_v1, %v4098_v8 }
 0x330   : > { %5124 = vmatprep.subr.bf16.mxu1 %v6605_v43 }
 0x333   : > { %5132 = vmatpush3.bf16.msra.mxu1 %v6605_v43  ;;  %v4103_v43 = vsel %vm6105_vm14, %v4632_v36, %v4102_v42 }
 0x334   : > { %5125 = vmatprep.subr.bf16.mxu1 %v6622_v12  ;;  %v4636_v46 = vcombine.low %v4099_v10, %v4103_v43 }
 0x337   : > { %5133 = vmatpush3.bf16.msra.mxu1 %v6622_v12 }
 0x338   : > { %5126 = vmatprep.subr.bf16.mxu1 %v6639_v17 }
 0x33b   : > { %5134 = vmatpush3.bf16.msra.mxu1 %v6639_v17 }
 0x33c   : > { %5127 = vmatprep.subr.bf16.mxu1 %v6659_v2 }
 0x33f   : > { %5135 = vmatpush3.bf16.msra.mxu1 %v6659_v2  ;;  %v4645_v2 = vld [vmem:[%s6797_s4] ss:$0 sm:$0xff] }
 0x342   : > { %5117 = vmatmul.mubr.bf16.vlgmr.msra.gmra.mrb[4].mxu1 %v4636_v46 }
 0x37b   : > { %v4946_v12 = vpop.f32.mrb[8].mxu0 }
 0x37c   : > { %v2692_v19 = vpop.f32.mrb[9].mxu0 }
 0x37d   : > { %v4947_v6 = vpop.f32.mrb[10].mxu0 }
 0x37e   : > { %v2695_v48 = vpop.f32.mrb[11].mxu0 }
 0x383   : > { %v4950_v50 = vpop.f32.mrb[12].mxu0 }
 0x384   : > { %v2708_v25 = vpop.f32.mrb[13].mxu0 }
 0x385   : > { %v4951_v28 = vpop.f32.mrb[14].mxu0 }
 0x386   : > { %v2711_v17 = vpop.f32.mrb[15].mxu0 }
 0x39b   : > { %v5114_v58 = vpop.f32.mrb[16].mxu0 }
 0x39c   : > { %v4219_v0 = vpop.f32.mrb[17].mxu0 }
 0x39d   : > { %v5115_v13 = vpop.f32.mrb[18].mxu0 }
 0x39e   : > { %v4222_v59 = vpop.f32.mrb[19].mxu0 }
 0x3f5   : > { %v5090_v63 = vpop.f32.mrb[0].mxu1 }
 0x3f6   : > { %v5136_v52 = vadd.f32 %v5090_v63, %v4946_v12  ;;  %v4009_v41 = vpop.f32.mrb[1].mxu1 }
 0x3f7   : > { %v5138_v55 = vadd.f32 %v4009_v41, %v2692_v19  ;;  %v5091_v57 = vpop.f32.mrb[2].mxu1 }
 0x3f8   : > { %v5137_v31 = vadd.f32 %v5136_v52, %v5114_v58  ;;  %v5140_v3 = vadd.f32 %v5091_v57, %v4947_v6  ;;  %v4012_v5 = vpop.f32.mrb[3].mxu1 }
 0x3f9   : > { %v5139_v30 = vadd.f32 %v5138_v55, %v4219_v0  ;;  %v5142_v40 = vadd.f32 %v4012_v5, %v2695_v48 }
 0x3fa   : > { %v4267_v26 = vadd.f32 %v5137_v31, %v4645_v2  ;;  %v5141_v14 = vadd.f32 %v5140_v3, %v5115_v13 }
 0x3fb   : > { %v4265_v16 = vadd.f32 %v5139_v30, %v4645_v2  ;;  %v5143_v49 = vadd.f32 %v5142_v40, %v4222_v59 }
 0x3fc   : > { %v4275_v39 = vmax.f32 %v4267_v26, 0.0  ;;  %v4268_v27 = vadd.f32 %v5141_v14, %v4645_v2 }
 0x3fd   : > { %v4273_v54 = vmax.f32 %v4265_v16, 0.0  ;;  %v4266_v24 = vadd.f32 %v5143_v49, %v4645_v2 }
 0x3fe   : > { %4283 = vst [vmem:[%s271_s28 + $0x10] sm:$0xff] %v4275_v39  ;;  %v4276_v23 = vmax.f32 %v4268_v27, 0.0 }
 0x3ff   : > { %4281 = vst [vmem:[%s271_s28] sm:$0xff] %v4273_v54  ;;  %v4274_v20 = vmax.f32 %v4266_v24, 0.0 }
 0x400   : > { %4284 = vst [vmem:[%s271_s28 + $0x18] sm:$0xff] %v4276_v23 }
 0x401   : > { %4282 = vst [vmem:[%s271_s28 + $0x8] sm:$0xff] %v4274_v20 }
 0x415   : > { %v5118_v38 = vpop.f32.mrb[4].mxu1 }
 0x416   : > { %v5144_v47 = vadd.f32 %v5118_v38, %v4950_v50  ;;  %v4235_v61 = vpop.f32.mrb[5].mxu1 }
 0x417   : > { %v5145_v33 = vadd.f32 %v4235_v61, %v2708_v25  ;;  %v5119_v11 = vpop.f32.mrb[6].mxu1 }
 0x418   : > { %v4271_v9 = vadd.f32 %v5144_v47, %v4645_v2  ;;  %v5146_v53 = vadd.f32 %v5119_v11, %v4951_v28  ;;  %v4238_v62 = vpop.f32.mrb[7].mxu1 }
 0x419   : > { %v4269_v60 = vadd.f32 %v5145_v33, %v4645_v2  ;;  %v5147_v15 = vadd.f32 %v4238_v62, %v2711_v17 }
 0x41a   : > { %v4279_v44 = vmax.f32 %v4271_v9, 0.0  ;;  %v4272_v51 = vadd.f32 %v5146_v53, %v4645_v2 }
 0x41b   : > { %v4277_v34 = vmax.f32 %v4269_v60, 0.0  ;;  %v4270_v18 = vadd.f32 %v5147_v15, %v4645_v2 }
 0x41c   : > { %4287 = vst [vmem:[%s271_s28 + $0x30] sm:$0xff] %v4279_v44  ;;  %v4280_v22 = vmax.f32 %v4272_v51, 0.0 }
 0x41d   : > { %4285 = vst [vmem:[%s271_s28 + $0x20] sm:$0xff] %v4277_v34  ;;  %v4278_v7 = vmax.f32 %v4270_v18, 0.0 }
 0x41e   : > { %4288 = vst [vmem:[%s271_s28 + $0x38] sm:$0xff] %v4280_v22 }
 0x41f   : > { %4286 = vst [vmem:[%s271_s28 + $0x28] sm:$0xff] %v4278_v7 }
 0x420   : > { %5543 = shalt.err (!%p5540_p2)
}
 0x421   : > { %s5544_s24 = scalar_lea.hbm %s6747_s23, 1024  ;;  %s5548_s13 = scalar_lea.hbm %s6798_s5, 2048 }
 0x422   : > { %p5545_p13 = scmp.ne.s32.totalorder %s6747_s23, %s5544_s24  ;;  %p5549_p4 = scmp.lt.u32.totalorder %s6747_s23, %s6798_s5 }
 0x423   : > { %p5550_p7 = scmp.lt.u32.totalorder %s5548_s13, %s5544_s24  ;;  %p5552_p11 = scmp.lt.u32.totalorder %s5544_s24, %s6747_s23 }
 0x424   : > { %p5546_p6 = pnand %p5545_p13, %p6828_p0 }
 0x425   : > { %p5551_p8 = por %p5550_p7, %p5549_p4 }
 0x426   : > { %p5547_p10 = pneg %p5546_p6 }
 0x427   : > { %p5553_p1 = por %p5552_p11, %p5551_p8 }
 0x429   : > { %p5554_p3 = pnand %p5553_p1, %p5547_p10 }
 0x42b   : > { %5557 = shalt.err (!%p5554_p3)
}
 0x42c   : > { %s5612_s15 = smov 128   ;;  %s5613_s30 = smov 8  }
 0x42d   : > { %5283 = dma.vmem_to_hbm [thread:$0]  (%p6828_p0), %s6749_s9, 1024, %s6747_s23, %s4290_s22, %s5612_s15, %s5612_s15, %s5613_s30  }
 0x42e PF: > { %s4318_s11 = sand.u32 1, %s5588_s18   ;;  %p6829_p5 = scmp.ne.s32.totalorder %s6803_s25, 0 }
 0x42f   : > { %p6830_p9 = scmp.ge.s32.totalorder %s5600_s21, 2  ;;  %s4319_s7 = scalar_lea.sflag [#allocation6], %s4318_s11 }
 0x431   : > { %p5297_p12 = pnand %p6830_p9, %p6829_p5 }
 0x433   : > { %5583 = dma.done.wait (!%p5297_p12), %s4319_s7, 1024  }
 0x434   : > { %5585 = vsyncadd (!%p5297_p12), %s4319_s7, 4294966272  ;;  %p19_p2 = scmp.ge.s32.totalorder %s5757_s16, 4   ;;  %s6831_s18 = smov %s5592_s19 }
 0x435   : > { %s6832_s19 = smov %s5596_s20  ;;  %s6833_s20 = smov %s5766_s27 }
 0x436   : > { %s6834_s21 = smov %s5757_s16  ;;  %21 = sbr.rel (!%p19_p2) target bundleno = 6 (0x6), region = 115 }
 0x43d   :  { %4324 = vsyncpa [#allocation5], 1 }
 0x43e   :  { %4326 = vsyncpa [#allocation5 + $0x1], 1 }
 0x43f   :  { %4327 = vsyncpa [#allocation8], 1 }
 0x440   :  { %4328 = vsyncpa [#allocation6], 1 }
 0x441   :  { %4330 = vsyncpa [#allocation6 + $0x1], 1 }

</bundles_post_ra>
